<compile_context>
chip_gen: v6e
topology: v6e:2x2x1
jax: 0.10.0
libtpu: 0.0.40
codegen_flags: <defaults>
</compile_context>

<pallas_src>
import functools
import math

import jax
import jax.numpy as jnp
from jax.experimental import pallas as pl
from jax.experimental.pallas import tpu as pltpu


_VMEM = pl.BlockSpec(memory_space=pltpu.MemorySpace.VMEM)


# ----------------------------------------------------------------------------
# Pallas kernels
# ----------------------------------------------------------------------------
def _prenorm_kernel(x_ref, s_ref, b_ref, o_ref):
    # x: (C, P); s, b: (L, C, 1); o: (L, C, P) = relu(s_l * x + b_l)
    o_ref[...] = jnp.maximum(x_ref[...][None, :, :] * s_ref[...] + b_ref[...], 0.0)


def prenorm(x2d, scales, shifts):
    """Eval-mode BN + ReLU for L different per-channel affines of the same input.

    x2d: (C, P) float32; scales/shifts: (L, C). Returns (L, C, P)."""
    c, p = x2d.shape
    l = scales.shape[0]
    return pl.pallas_call(
        _prenorm_kernel,
        out_shape=jax.ShapeDtypeStruct((l, c, p), jnp.float32),
        in_specs=[_VMEM, _VMEM, _VMEM],
        out_specs=_VMEM,
    )(x2d, scales.reshape(l, c, 1).astype(jnp.float32),
      shifts.reshape(l, c, 1).astype(jnp.float32))


def _conv_kernel(*refs, relu, has_res, has_post):
    it = iter(refs)
    p_ref = next(it)        # (K, bm) patches
    w_ref = next(it)        # (Cout, K) weights
    os_ref = next(it)       # (Cout, 1) output scale (BN scale or 1)
    ob_ref = next(it)       # (Cout, 1) output shift (bias or BN shift)
    res_ref = next(it) if has_res else None
    if has_post:
        ps_ref = next(it)   # (Cout, 1) fused next-layer BN scale
        pb_ref = next(it)   # (Cout, 1) fused next-layer BN shift
    o_ref = next(it)        # (Cout, bm)

    acc = jnp.dot(w_ref[...].astype(jnp.bfloat16),
                  p_ref[...].astype(jnp.bfloat16),
                  preferred_element_type=jnp.float32)
    y = acc * os_ref[...] + ob_ref[...]
    if has_res:
        y = y + res_ref[...]
    if relu:
        y = jnp.maximum(y, 0.0)
    if has_post:
        y = jnp.maximum(y * ps_ref[...] + pb_ref[...], 0.0)
    o_ref[...] = y


def conv_matmul(patches, w2d, out_scale, out_shift, *, res=None, post=None,
                relu=False, block_m=512):
    """out(Cout, M) = epilogue( w2d(Cout,K) @ patches(K,M) ); all float32."""
    k, m = patches.shape
    cout = w2d.shape[0]
    bm = block_m if (m % block_m == 0) else m       # lane-dense blocks of M
    grid = (m // bm,)

    col_map = lambda i: (0, i)
    rep_map = lambda i: (0, 0)

    in_specs = [
        pl.BlockSpec((k, bm), col_map),
        pl.BlockSpec((cout, k), rep_map),
        pl.BlockSpec((cout, 1), rep_map),
        pl.BlockSpec((cout, 1), rep_map),
    ]
    args = [patches, w2d,
            out_scale.reshape(cout, 1).astype(jnp.float32),
            out_shift.reshape(cout, 1).astype(jnp.float32)]
    if res is not None:
        in_specs.append(pl.BlockSpec((cout, bm), col_map))
        args.append(res)
    if post is not None:
        ps, pb = post
        in_specs += [pl.BlockSpec((cout, 1), rep_map),
                     pl.BlockSpec((cout, 1), rep_map)]
        args += [ps.reshape(cout, 1).astype(jnp.float32),
                 pb.reshape(cout, 1).astype(jnp.float32)]

    kernel = functools.partial(_conv_kernel, relu=relu,
                               has_res=res is not None, has_post=post is not None)
    return pl.pallas_call(
        kernel,
        out_shape=jax.ShapeDtypeStruct((cout, m), jnp.float32),
        grid=grid,
        in_specs=in_specs,
        out_specs=pl.BlockSpec((cout, bm), col_map),
        compiler_params=pltpu.CompilerParams(dimension_semantics=("parallel",)),
    )(*args)


def _classifier_kernel(x_ref, w1_ref, b1_ref, w2_ref, b2_ref, o_ref):
    h = jnp.dot(x_ref[...], w1_ref[...], preferred_element_type=jnp.float32) + b1_ref[...]
    h = jnp.maximum(h, 0.0)
    o_ref[...] = jnp.dot(h, w2_ref[...], preferred_element_type=jnp.float32) + b2_ref[...]


def classifier(x, params):
    """Fused Linear -> ReLU -> Linear."""
    n = x.shape[0]
    emb = params["b1"].shape[0]
    ncls = params["b2"].shape[0]
    return pl.pallas_call(
        _classifier_kernel,
        out_shape=jax.ShapeDtypeStruct((n, ncls), jnp.float32),
        in_specs=[_VMEM] * 5,
        out_specs=_VMEM,
    )(x, params["w1"].T, params["b1"].reshape(1, emb),
      params["w2"].T, params["b2"].reshape(1, ncls))


# ----------------------------------------------------------------------------
# Conv2d = im2col in (K, M) order (glue) + fused Pallas matmul
# ----------------------------------------------------------------------------
def im2col(x, kh, kw, stride, padding, dilation):
    """x: (C, N, H, W) -> patches (C*kh*kw, N*oh*ow), K-row order (c, kh, kw)
    with kw fastest, matching PyTorch weight.reshape(Cout, Cin*kh*kw)."""
    c, n, h, w = x.shape
    sh, sw = stride
    ph, pw = padding
    dh, dw = dilation
    oh = (h + 2 * ph - dh * (kh - 1) - 1) // sh + 1
    ow = (w + 2 * pw - dw * (kw - 1) - 1) // sw + 1
    xp = jnp.pad(x, ((0, 0), (0, 0), (ph, ph), (pw, pw)))
    cols = []
    for ki in range(kh):
        for kj in range(kw):
            h0, w0 = ki * dh, kj * dw
            cols.append(
                xp[:, :, h0:h0 + (oh - 1) * sh + 1:sh, w0:w0 + (ow - 1) * sw + 1:sw]
            )  # (C, N, oh, ow)
    p = jnp.stack(cols, axis=1).reshape(c * kh * kw, n * oh * ow)
    return p, oh, ow


def conv2d_fused(x, w, *, stride, padding, dilation, out_scale, out_shift,
                 res=None, post=None, relu=False):
    """x: (Cin, N, H, W); w: (Cout, Cin, kh, kw) -> (Cout, N, oh, ow)."""
    cout, cin, kh, kw = w.shape
    _, n, _, _ = x.shape
    patches, oh, ow = im2col(x, kh, kw, stride, padding, dilation)
    res2d = None if res is None else res.reshape(cout, -1)
    out = conv_matmul(patches, w.reshape(cout, cin * kh * kw),
                      out_scale, out_shift, res=res2d, post=post, relu=relu)
    return out.reshape(cout, n, oh, ow)


def bn_affine(bn, eps=1e-5):
    scale = bn["gamma"] / jnp.sqrt(bn["var"] + eps)
    shift = bn["beta"] - bn["mean"] * scale
    return scale, shift


# ----------------------------------------------------------------------------
# Model definition (small, shape-consistent hyperparameters)
# ----------------------------------------------------------------------------
CFG = dict(
    in_channels=1, temp_channels=4, out_channels=8, num_classes=5,
    embedding_size=32, input_width=64, input_height=16,
    temporal_dilation_list=[(1, 1), (1, 2)], temporal_kernel=(1, 5),
    temporal_stride=(1, 2), num_temp_layers=2, num_spatial_layers=2,
    spatial_stride=(2, 1), num_residual_blocks=1, down_kernel=3, down_stride=2,
)


def _init_conv(key, cout, cin, kh, kw, bias=True):
    k1, k2 = jax.random.split(key)
    fan_in = cin * kh * kw
    w = jax.random.normal(k1, (cout, cin, kh, kw), jnp.float32) / jnp.sqrt(fan_in)
    b = 0.01 * jax.random.normal(k2, (cout,), jnp.float32) if bias else None
    return w, b


def _init_bn(key, c):
    k1, k2, k3 = jax.random.split(key, 3)
    return dict(
        gamma=1.0 + 0.1 * jax.random.normal(k1, (c,), jnp.float32),
        beta=0.05 * jax.random.normal(k2, (c,), jnp.float32),
        mean=0.02 * jax.random.normal(k3, (c,), jnp.float32),
        var=jnp.ones((c,), jnp.float32),
    )


def init_encoder_params(cfg, key):
    keys = iter(jax.random.split(key, 64))
    p = {}
    tin, tch = cfg["in_channels"], cfg["temp_channels"]
    kh, kw = cfg["temporal_kernel"]
    p["temporal"] = []
    for _ in range(cfg["num_temp_layers"]):
        w, b = _init_conv(next(keys), tch, tin, kh, kw)
        p["temporal"].append(dict(bn=_init_bn(next(keys), tin), w=w, b=b))

    sin = tch * cfg["num_temp_layers"]
    och = cfg["out_channels"]
    kernel_list = [(cfg["input_height"] // (i + 1), 1) for i in range(cfg["num_spatial_layers"])]
    p["spatial"] = []
    for i in range(cfg["num_spatial_layers"]):
        skh, skw = kernel_list[i]
        w, b = _init_conv(next(keys), och, sin, skh, skw)
        p["spatial"].append(dict(bn=_init_bn(next(keys), sin), w=w, b=b))

    rch = och * cfg["num_spatial_layers"]
    dk = cfg["down_kernel"]
    p["res"] = []
    for _ in range(cfg["num_residual_blocks"]):
        w1, _ = _init_conv(next(keys), rch, rch, 3, 3, bias=False)
        w2, _ = _init_conv(next(keys), rch, rch, 3, 3, bias=False)
        wd, bd = _init_conv(next(keys), rch, rch, dk, dk)
        p["res"].append(dict(
            w1=w1, bn1=_init_bn(next(keys), rch),
            w2=w2, bn2=_init_bn(next(keys), rch),
            down=dict(bn=_init_bn(next(keys), rch), w=wd, b=bd),
        ))

    wf, bf = _init_conv(next(keys), och, rch, dk, dk)
    p["final"] = dict(bn=_init_bn(next(keys), rch), w=wf, b=bf)
    return p


def init_classifier_params(cfg, key, enc_size):
    k1, k2, k3, k4 = jax.random.split(key, 4)
    return dict(
        w1=jax.random.normal(k1, (cfg["embedding_size"], enc_size), jnp.float32) / jnp.sqrt(enc_size),
        b1=0.01 * jax.random.normal(k2, (cfg["embedding_size"],), jnp.float32),
        w2=jax.random.normal(k3, (cfg["num_classes"], cfg["embedding_size"]), jnp.float32)
        / jnp.sqrt(cfg["embedding_size"]),
        b2=0.01 * jax.random.normal(k4, (cfg["num_classes"],), jnp.float32),
    )


# ----------------------------------------------------------------------------
# Forward pass
# ----------------------------------------------------------------------------
def encoder_forward(x_nchw, p, cfg):
    n, cin, h, w = x_nchw.shape
    x = jnp.transpose(x_nchw, (1, 0, 2, 3))          # (C, N, H, W), channel-first

    # --- TemporalBlock: one fused prenorm call + parallel dilated convs -----
    tk, ts = cfg["temporal_kernel"], cfg["temporal_stride"]
    dils = cfg["temporal_dilation_list"]
    tpads = []
    for dil in dils:
        fs = tk[1] * dil[1] - 1
        tpads.append((0, math.floor((fs - 1) / 2) - 1 * (dil[1] // 2 - 1)))

    t_aff = [bn_affine(lp["bn"]) for lp in p["temporal"]]
    xn = prenorm(x.reshape(cin, n * h * w),
                 jnp.stack([a[0] for a in t_aff]), jnp.stack([a[1] for a in t_aff]))
    feats = []
    for i, lp in enumerate(p["temporal"]):
        xi = xn[i].reshape(cin, n, h, w)
        cout = lp["w"].shape[0]
        feats.append(conv2d_fused(
            xi, lp["w"], stride=ts, padding=tpads[i], dilation=dils[i],
            out_scale=jnp.ones((cout,), jnp.float32), out_shift=lp["b"]))
    out = jnp.concatenate(feats, axis=0)             # (Ct, N, oh, ow)

    # --- SpatialBlock: one fused prenorm call + parallel (kh,1) convs -------
    kernel_list = [(cfg["input_height"] // (i + 1), 1) for i in range(cfg["num_spatial_layers"])]
    spads = [((k0 - 1) // 2, 0) for (k0, _) in kernel_list]
    cT, nT, hT, wT = out.shape
    s_aff = [bn_affine(lp["bn"]) for lp in p["spatial"]]
    outn = prenorm(out.reshape(cT, nT * hT * wT),
                   jnp.stack([a[0] for a in s_aff]), jnp.stack([a[1] for a in s_aff]))
    feats = []
    for j, lp in enumerate(p["spatial"]):
        xj = outn[j].reshape(cT, nT, hT, wT)
        cout = lp["w"].shape[0]
        feats.append(conv2d_fused(
            xj, lp["w"], stride=cfg["spatial_stride"], padding=spads[j], dilation=(1, 1),
            out_scale=jnp.ones((cout,), jnp.float32), out_shift=lp["b"]))
    out = jnp.concatenate(feats, axis=0)             # (Cs, N, oh, ow)

    # --- Residual blocks + bottleneck down-conv (epilogue-fused) ------------
    dk, ds = cfg["down_kernel"], cfg["down_stride"]
    nres = len(p["res"])
    for idx, rp in enumerate(p["res"]):
        is_last = idx == nres - 1
        skip = out
        s1, b1 = bn_affine(rp["bn1"])
        h1 = conv2d_fused(out, rp["w1"], stride=(1, 1), padding=(1, 1), dilation=(1, 1),
                          out_scale=s1, out_shift=b1, relu=True)
        s2, b2 = bn_affine(rp["bn2"])
        # fuse BN2 + residual add + ReLU + the following down-layer's BN+ReLU
        h2 = conv2d_fused(h1, rp["w2"], stride=(1, 1), padding=(1, 1), dilation=(1, 1),
                          out_scale=s2, out_shift=b2, res=skip, relu=True,
                          post=bn_affine(rp["down"]["bn"]))
        cout_d = rp["down"]["w"].shape[0]
        post_d = bn_affine(p["final"]["bn"]) if is_last else None
        out = conv2d_fused(h2, rp["down"]["w"], stride=(ds, ds), padding=(0, 0),
                           dilation=(1, 1),
                           out_scale=jnp.ones((cout_d,), jnp.float32),
                           out_shift=rp["down"]["b"], post=post_d)

    # --- Final ConvLayer2D (its input BN+ReLU already fused upstream) -------
    if nres == 0:
        c_f = out.shape[0]
        sf, bf = bn_affine(p["final"]["bn"])
        out = prenorm(out.reshape(c_f, -1), sf[None], bf[None])[0].reshape(out.shape)
    cout_f = p["final"]["w"].shape[0]
    out = conv2d_fused(out, p["final"]["w"], stride=(1, 1), padding=(0, 0), dilation=(1, 1),
                       out_scale=jnp.ones((cout_f,), jnp.float32),
                       out_shift=p["final"]["b"])
    return jnp.transpose(out, (1, 0, 2, 3))          # back to NCHW


def model_forward(x, enc_params, cls_params, cfg):
    feat = encoder_forward(x, enc_params, cfg)       # (N, C, H, W)
    flat = feat.reshape(x.shape[0], -1)
    return classifier(flat, cls_params)


if __name__ == "__main__":
    cfg = CFG
    key = jax.random.PRNGKey(0)
    k_x, k_enc, k_cls = jax.random.split(key, 3)

    x = jax.random.normal(
        k_x, (2, cfg["in_channels"], cfg["input_height"], cfg["input_width"]), jnp.float32
    )

    enc_params = init_encoder_params(cfg, k_enc)

    # Mirror the torch.zeros(1, C, H, W) shape probe in Model.__init__.
    probe = jnp.zeros((1, cfg["in_channels"], cfg["input_height"], cfg["input_width"]), jnp.float32)
    enc_shape = jax.eval_shape(lambda a: encoder_forward(a, enc_params, cfg), probe).shape
    enc_size = math.prod(enc_shape)

    cls_params = init_classifier_params(cfg, k_cls, enc_size)

    fwd = jax.jit(functools.partial(model_forward, cfg=cfg))
    logits = fwd(x, enc_params, cls_params)
    jax.block_until_ready(logits)
    assert logits.shape == (2, cfg["num_classes"]), logits.shape
    assert bool(jnp.all(jnp.isfinite(logits)))
    print("KERNEL_OK")
</pallas_src>

<mosaic_0001>
module attributes {stable_mosaic.version = 11 : i64} {
  func.func @_prenorm_kernel(%arg0: memref<1x2048xf32, #tpu.memory_space<vmem>>, %arg1: memref<2x1x1xf32, #tpu.memory_space<vmem>>, %arg2: memref<2x1x1xf32, #tpu.memory_space<vmem>>, %arg3: memref<2x1x2048xf32, #tpu.memory_space<vmem>>) attributes {dimension_semantics = [], scalar_prefetch = 0 : i64, scratch_operands = 0 : i64, tpu.core_type = #tpu.core_type<tc>} {
    %c0 = arith.constant 0 : index
    %c0_0 = arith.constant 0 : index
    %0 = vector.load %arg0[%c0, %c0_0] : memref<1x2048xf32, #tpu.memory_space<vmem>>, vector<1x2048xf32>
    %1 = vector.shape_cast %0 : vector<1x2048xf32> to vector<1x1x2048xf32>
    %c0_1 = arith.constant 0 : index
    %c0_2 = arith.constant 0 : index
    %c0_3 = arith.constant 0 : index
    %2 = vector.load %arg1[%c0_1, %c0_2, %c0_3] : memref<2x1x1xf32, #tpu.memory_space<vmem>>, vector<2x1x1xf32>
    %3 = vector.broadcast %1 : vector<1x1x2048xf32> to vector<2x1x2048xf32>
    %4 = vector.broadcast %2 : vector<2x1x1xf32> to vector<2x1x2048xf32>
    %5 = arith.mulf %3, %4 : vector<2x1x2048xf32>
    %c0_4 = arith.constant 0 : index
    %c0_5 = arith.constant 0 : index
    %c0_6 = arith.constant 0 : index
    %6 = vector.load %arg2[%c0_4, %c0_5, %c0_6] : memref<2x1x1xf32, #tpu.memory_space<vmem>>, vector<2x1x1xf32>
    %7 = vector.broadcast %6 : vector<2x1x1xf32> to vector<2x1x2048xf32>
    %8 = arith.addf %5, %7 : vector<2x1x2048xf32>
    %cst = arith.constant 0.000000e+00 : f32
    %9 = vector.broadcast %cst : f32 to vector<2x1x2048xf32>
    %10 = arith.maximumf %8, %9 : vector<2x1x2048xf32>
    %c0_7 = arith.constant 0 : index
    %c0_8 = arith.constant 0 : index
    %c0_9 = arith.constant 0 : index
    %11 = vector.load %arg3[%c0_7, %c0_8, %c0_9] : memref<2x1x2048xf32, #tpu.memory_space<vmem>>, vector<2x1x2048xf32>
    tpu.vector_store %arg3[%c0_7, %c0_8, %c0_9], %10 {strides = array<i32>} : memref<2x1x2048xf32, #tpu.memory_space<vmem>>, vector<2x1x2048xf32>,
    return
  }
}

module attributes {stable_mosaic.version = 11 : i64} {
  func.func @_conv_kernel(%arg0: i32, %arg1: memref<5x512xf32, #tpu.memory_space<vmem>>, %arg2: memref<4x5xf32, #tpu.memory_space<vmem>>, %arg3: memref<4x1xf32, #tpu.memory_space<vmem>>, %arg4: memref<4x1xf32, #tpu.memory_space<vmem>>, %arg5: memref<4x512xf32, #tpu.memory_space<vmem>>) attributes {dimension_semantics = [#tpu.dimension_semantics<parallel>], iteration_bounds = array<i64: 2>, scalar_prefetch = 0 : i64, scratch_operands = 0 : i64, tpu.core_type = #tpu.core_type<tc>, window_params = [{transform_indices = @transform_0, window_bounds = array<i64: 5, 512>}, {pipeline_mode = #tpu.pipeline_mode<synchronous>, transform_indices = @transform_1, window_bounds = array<i64: 4, 5>}, {pipeline_mode = #tpu.pipeline_mode<synchronous>, transform_indices = @transform_2, window_bounds = array<i64: 4, 1>}, {pipeline_mode = #tpu.pipeline_mode<synchronous>, transform_indices = @transform_3, window_bounds = array<i64: 4, 1>}, {transform_indices = @transform_4, window_bounds = array<i64: 4, 512>}]} {
    %c0 = arith.constant 0 : index
    %c0_0 = arith.constant 0 : index
    %0 = vector.load %arg2[%c0, %c0_0] : memref<4x5xf32, #tpu.memory_space<vmem>>, vector<4x5xf32>
    %1 = arith.truncf %0 : vector<4x5xf32> to vector<4x5xbf16>
    %c0_1 = arith.constant 0 : index
    %c0_2 = arith.constant 0 : index
    %2 = vector.load %arg1[%c0_1, %c0_2] : memref<5x512xf32, #tpu.memory_space<vmem>>, vector<5x512xf32>
    %3 = arith.truncf %2 : vector<5x512xf32> to vector<5x512xbf16>
    %cst = arith.constant dense<0.000000e+00> : vector<4x512xf32>
    %4 = tpu.matmul %1, %3, %cst {dimension_numbers = #tpu.dot_dimension_numbers<[1], [0], [0], [1], [0, 0, 1, 1], [], []>} : vector<4x5xbf16>, vector<5x512xbf16>, vector<4x512xf32> -> vector<4x512xf32>
    %c0_3 = arith.constant 0 : index
    %c0_4 = arith.constant 0 : index
    %5 = vector.load %arg3[%c0_3, %c0_4] : memref<4x1xf32, #tpu.memory_space<vmem>>, vector<4x1xf32>
    %6 = vector.broadcast %5 : vector<4x1xf32> to vector<4x512xf32>
    %7 = arith.mulf %4, %6 : vector<4x512xf32>
    %c0_5 = arith.constant 0 : index
    %c0_6 = arith.constant 0 : index
    %8 = vector.load %arg4[%c0_5, %c0_6] : memref<4x1xf32, #tpu.memory_space<vmem>>, vector<4x1xf32>
    %9 = vector.broadcast %8 : vector<4x1xf32> to vector<4x512xf32>
    %10 = arith.addf %7, %9 : vector<4x512xf32>
    %c0_7 = arith.constant 0 : index
    %c0_8 = arith.constant 0 : index
    %11 = vector.load %arg5[%c0_7, %c0_8] : memref<4x512xf32, #tpu.memory_space<vmem>>, vector<4x512xf32>
    tpu.vector_store %arg5[%c0_7, %c0_8], %10 {strides = array<i32>} : memref<4x512xf32, #tpu.memory_space<vmem>>, vector<4x512xf32>,
    return
  }
  func.func @transform_0(%arg0: i32) -> (i32, i32) {
    %c0_i32 = arith.constant 0 : i32
    %c0_i32_0 = arith.constant 0 : i32
    return %c0_i32, %arg0 : i32, i32
  }
  func.func @transform_1(%arg0: i32) -> (i32, i32) {
    %c0_i32 = arith.constant 0 : i32
    %c0_i32_0 = arith.constant 0 : i32
    %c0_i32_1 = arith.constant 0 : i32
    return %c0_i32, %c0_i32_0 : i32, i32
  }
  func.func @transform_2(%arg0: i32) -> (i32, i32) {
    %c0_i32 = arith.constant 0 : i32
    %c0_i32_0 = arith.constant 0 : i32
    %c0_i32_1 = arith.constant 0 : i32
    return %c0_i32, %c0_i32_0 : i32, i32
  }
  func.func @transform_3(%arg0: i32) -> (i32, i32) {
    %c0_i32 = arith.constant 0 : i32
    %c0_i32_0 = arith.constant 0 : i32
    %c0_i32_1 = arith.constant 0 : i32
    return %c0_i32, %c0_i32_0 : i32, i32
  }
  func.func @transform_4(%arg0: i32) -> (i32, i32) {
    %c0_i32 = arith.constant 0 : i32
    %c0_i32_0 = arith.constant 0 : i32
    return %c0_i32, %arg0 : i32, i32
  }
}

module attributes {stable_mosaic.version = 11 : i64} {
  func.func @_prenorm_kernel(%arg0: memref<8x1024xf32, #tpu.memory_space<vmem>>, %arg1: memref<2x8x1xf32, #tpu.memory_space<vmem>>, %arg2: memref<2x8x1xf32, #tpu.memory_space<vmem>>, %arg3: memref<2x8x1024xf32, #tpu.memory_space<vmem>>) attributes {dimension_semantics = [], scalar_prefetch = 0 : i64, scratch_operands = 0 : i64, tpu.core_type = #tpu.core_type<tc>} {
    %c0 = arith.constant 0 : index
    %c0_0 = arith.constant 0 : index
    %0 = vector.load %arg0[%c0, %c0_0] : memref<8x1024xf32, #tpu.memory_space<vmem>>, vector<8x1024xf32>
    %1 = vector.shape_cast %0 : vector<8x1024xf32> to vector<1x8x1024xf32>
    %c0_1 = arith.constant 0 : index
    %c0_2 = arith.constant 0 : index
    %c0_3 = arith.constant 0 : index
    %2 = vector.load %arg1[%c0_1, %c0_2, %c0_3] : memref<2x8x1xf32, #tpu.memory_space<vmem>>, vector<2x8x1xf32>
    %3 = vector.broadcast %1 : vector<1x8x1024xf32> to vector<2x8x1024xf32>
    %4 = vector.broadcast %2 : vector<2x8x1xf32> to vector<2x8x1024xf32>
    %5 = arith.mulf %3, %4 : vector<2x8x1024xf32>
    %c0_4 = arith.constant 0 : index
    %c0_5 = arith.constant 0 : index
    %c0_6 = arith.constant 0 : index
    %6 = vector.load %arg2[%c0_4, %c0_5, %c0_6] : memref<2x8x1xf32, #tpu.memory_space<vmem>>, vector<2x8x1xf32>
    %7 = vector.broadcast %6 : vector<2x8x1xf32> to vector<2x8x1024xf32>
    %8 = arith.addf %5, %7 : vector<2x8x1024xf32>
    %cst = arith.constant 0.000000e+00 : f32
    %9 = vector.broadcast %cst : f32 to vector<2x8x1024xf32>
    %10 = arith.maximumf %8, %9 : vector<2x8x1024xf32>
    %c0_7 = arith.constant 0 : index
    %c0_8 = arith.constant 0 : index
    %c0_9 = arith.constant 0 : index
    %11 = vector.load %arg3[%c0_7, %c0_8, %c0_9] : memref<2x8x1024xf32, #tpu.memory_space<vmem>>, vector<2x8x1024xf32>
    tpu.vector_store %arg3[%c0_7, %c0_8, %c0_9], %10 {strides = array<i32>} : memref<2x8x1024xf32, #tpu.memory_space<vmem>>, vector<2x8x1024xf32>,
    return
  }
}

module attributes {stable_mosaic.version = 11 : i64} {
  func.func @_conv_kernel(%arg0: i32, %arg1: memref<128x512xf32, #tpu.memory_space<vmem>>, %arg2: memref<8x128xf32, #tpu.memory_space<vmem>>, %arg3: memref<8x1xf32, #tpu.memory_space<vmem>>, %arg4: memref<8x1xf32, #tpu.memory_space<vmem>>, %arg5: memref<8x512xf32, #tpu.memory_space<vmem>>) attributes {dimension_semantics = [#tpu.dimension_semantics<parallel>], iteration_bounds = array<i64: 1>, scalar_prefetch = 0 : i64, scratch_operands = 0 : i64, tpu.core_type = #tpu.core_type<tc>, window_params = [{transform_indices = @transform_0, window_bounds = array<i64: 128, 512>}, {pipeline_mode = #tpu.pipeline_mode<synchronous>, transform_indices = @transform_1, window_bounds = array<i64: 8, 128>}, {pipeline_mode = #tpu.pipeline_mode<synchronous>, transform_indices = @transform_2, window_bounds = array<i64: 8, 1>}, {pipeline_mode = #tpu.pipeline_mode<synchronous>, transform_indices = @transform_3, window_bounds = array<i64: 8, 1>}, {transform_indices = @transform_4, window_bounds = array<i64: 8, 512>}]} {
    %c0 = arith.constant 0 : index
    %c0_0 = arith.constant 0 : index
    %0 = vector.load %arg2[%c0, %c0_0] : memref<8x128xf32, #tpu.memory_space<vmem>>, vector<8x128xf32>
    %1 = arith.truncf %0 : vector<8x128xf32> to vector<8x128xbf16>
    %c0_1 = arith.constant 0 : index
    %c0_2 = arith.constant 0 : index
    %2 = vector.load %arg1[%c0_1, %c0_2] : memref<128x512xf32, #tpu.memory_space<vmem>>, vector<128x512xf32>
    %3 = arith.truncf %2 : vector<128x512xf32> to vector<128x512xbf16>
    %cst = arith.constant dense<0.000000e+00> : vector<8x512xf32>
    %4 = tpu.matmul %1, %3, %cst {dimension_numbers = #tpu.dot_dimension_numbers<[1], [0], [0], [1], [0, 0, 1, 1], [], []>} : vector<8x128xbf16>, vector<128x512xbf16>, vector<8x512xf32> -> vector<8x512xf32>
    %c0_3 = arith.constant 0 : index
    %c0_4 = arith.constant 0 : index
    %5 = vector.load %arg3[%c0_3, %c0_4] : memref<8x1xf32, #tpu.memory_space<vmem>>, vector<8x1xf32>
    %6 = vector.broadcast %5 : vector<8x1xf32> to vector<8x512xf32>
    %7 = arith.mulf %4, %6 : vector<8x512xf32>
    %c0_5 = arith.constant 0 : index
    %c0_6 = arith.constant 0 : index
    %8 = vector.load %arg4[%c0_5, %c0_6] : memref<8x1xf32, #tpu.memory_space<vmem>>, vector<8x1xf32>
    %9 = vector.broadcast %8 : vector<8x1xf32> to vector<8x512xf32>
    %10 = arith.addf %7, %9 : vector<8x512xf32>
    %c0_7 = arith.constant 0 : index
    %c0_8 = arith.constant 0 : index
    %11 = vector.load %arg5[%c0_7, %c0_8] : memref<8x512xf32, #tpu.memory_space<vmem>>, vector<8x512xf32>
    tpu.vector_store %arg5[%c0_7, %c0_8], %10 {strides = array<i32>} : memref<8x512xf32, #tpu.memory_space<vmem>>, vector<8x512xf32>,
    return
  }
  func.func @transform_0(%arg0: i32) -> (i32, i32) {
    %c0_i32 = arith.constant 0 : i32
    %c0_i32_0 = arith.constant 0 : i32
    return %c0_i32, %arg0 : i32, i32
  }
  func.func @transform_1(%arg0: i32) -> (i32, i32) {
    %c0_i32 = arith.constant 0 : i32
    %c0_i32_0 = arith.constant 0 : i32
    %c0_i32_1 = arith.constant 0 : i32
    return %c0_i32, %c0_i32_0 : i32, i32
  }
  func.func @transform_2(%arg0: i32) -> (i32, i32) {
    %c0_i32 = arith.constant 0 : i32
    %c0_i32_0 = arith.constant 0 : i32
    %c0_i32_1 = arith.constant 0 : i32
    return %c0_i32, %c0_i32_0 : i32, i32
  }
  func.func @transform_3(%arg0: i32) -> (i32, i32) {
    %c0_i32 = arith.constant 0 : i32
    %c0_i32_0 = arith.constant 0 : i32
    %c0_i32_1 = arith.constant 0 : i32
    return %c0_i32, %c0_i32_0 : i32, i32
  }
  func.func @transform_4(%arg0: i32) -> (i32, i32) {
    %c0_i32 = arith.constant 0 : i32
    %c0_i32_0 = arith.constant 0 : i32
    return %c0_i32, %arg0 : i32, i32
  }
}

module attributes {stable_mosaic.version = 11 : i64} {
  func.func @_conv_kernel(%arg0: i32, %arg1: memref<64x512xf32, #tpu.memory_space<vmem>>, %arg2: memref<8x64xf32, #tpu.memory_space<vmem>>, %arg3: memref<8x1xf32, #tpu.memory_space<vmem>>, %arg4: memref<8x1xf32, #tpu.memory_space<vmem>>, %arg5: memref<8x512xf32, #tpu.memory_space<vmem>>) attributes {dimension_semantics = [#tpu.dimension_semantics<parallel>], iteration_bounds = array<i64: 1>, scalar_prefetch = 0 : i64, scratch_operands = 0 : i64, tpu.core_type = #tpu.core_type<tc>, window_params = [{transform_indices = @transform_0, window_bounds = array<i64: 64, 512>}, {pipeline_mode = #tpu.pipeline_mode<synchronous>, transform_indices = @transform_1, window_bounds = array<i64: 8, 64>}, {pipeline_mode = #tpu.pipeline_mode<synchronous>, transform_indices = @transform_2, window_bounds = array<i64: 8, 1>}, {pipeline_mode = #tpu.pipeline_mode<synchronous>, transform_indices = @transform_3, window_bounds = array<i64: 8, 1>}, {transform_indices = @transform_4, window_bounds = array<i64: 8, 512>}]} {
    %c0 = arith.constant 0 : index
    %c0_0 = arith.constant 0 : index
    %0 = vector.load %arg2[%c0, %c0_0] : memref<8x64xf32, #tpu.memory_space<vmem>>, vector<8x64xf32>
    %1 = arith.truncf %0 : vector<8x64xf32> to vector<8x64xbf16>
    %c0_1 = arith.constant 0 : index
    %c0_2 = arith.constant 0 : index
    %2 = vector.load %arg1[%c0_1, %c0_2] : memref<64x512xf32, #tpu.memory_space<vmem>>, vector<64x512xf32>
    %3 = arith.truncf %2 : vector<64x512xf32> to vector<64x512xbf16>
    %cst = arith.constant dense<0.000000e+00> : vector<8x512xf32>
    %4 = tpu.matmul %1, %3, %cst {dimension_numbers = #tpu.dot_dimension_numbers<[1], [0], [0], [1], [0, 0, 1, 1], [], []>} : vector<8x64xbf16>, vector<64x512xbf16>, vector<8x512xf32> -> vector<8x512xf32>
    %c0_3 = arith.constant 0 : index
    %c0_4 = arith.constant 0 : index
    %5 = vector.load %arg3[%c0_3, %c0_4] : memref<8x1xf32, #tpu.memory_space<vmem>>, vector<8x1xf32>
    %6 = vector.broadcast %5 : vector<8x1xf32> to vector<8x512xf32>
    %7 = arith.mulf %4, %6 : vector<8x512xf32>
    %c0_5 = arith.constant 0 : index
    %c0_6 = arith.constant 0 : index
    %8 = vector.load %arg4[%c0_5, %c0_6] : memref<8x1xf32, #tpu.memory_space<vmem>>, vector<8x1xf32>
    %9 = vector.broadcast %8 : vector<8x1xf32> to vector<8x512xf32>
    %10 = arith.addf %7, %9 : vector<8x512xf32>
    %c0_7 = arith.constant 0 : index
    %c0_8 = arith.constant 0 : index
    %11 = vector.load %arg5[%c0_7, %c0_8] : memref<8x512xf32, #tpu.memory_space<vmem>>, vector<8x512xf32>
    tpu.vector_store %arg5[%c0_7, %c0_8], %10 {strides = array<i32>} : memref<8x512xf32, #tpu.memory_space<vmem>>, vector<8x512xf32>,
    return
  }
  func.func @transform_0(%arg0: i32) -> (i32, i32) {
    %c0_i32 = arith.constant 0 : i32
    %c0_i32_0 = arith.constant 0 : i32
    return %c0_i32, %arg0 : i32, i32
  }
  func.func @transform_1(%arg0: i32) -> (i32, i32) {
    %c0_i32 = arith.constant 0 : i32
    %c0_i32_0 = arith.constant 0 : i32
    %c0_i32_1 = arith.constant 0 : i32
    return %c0_i32, %c0_i32_0 : i32, i32
  }
  func.func @transform_2(%arg0: i32) -> (i32, i32) {
    %c0_i32 = arith.constant 0 : i32
    %c0_i32_0 = arith.constant 0 : i32
    %c0_i32_1 = arith.constant 0 : i32
    return %c0_i32, %c0_i32_0 : i32, i32
  }
  func.func @transform_3(%arg0: i32) -> (i32, i32) {
    %c0_i32 = arith.constant 0 : i32
    %c0_i32_0 = arith.constant 0 : i32
    %c0_i32_1 = arith.constant 0 : i32
    return %c0_i32, %c0_i32_0 : i32, i32
  }
  func.func @transform_4(%arg0: i32) -> (i32, i32) {
    %c0_i32 = arith.constant 0 : i32
    %c0_i32_0 = arith.constant 0 : i32
    return %c0_i32, %arg0 : i32, i32
  }
}

module attributes {stable_mosaic.version = 11 : i64} {
  func.func @_conv_kernel(%arg0: i32, %arg1: memref<144x512xf32, #tpu.memory_space<vmem>>, %arg2: memref<16x144xf32, #tpu.memory_space<vmem>>, %arg3: memref<16x1xf32, #tpu.memory_space<vmem>>, %arg4: memref<16x1xf32, #tpu.memory_space<vmem>>, %arg5: memref<16x512xf32, #tpu.memory_space<vmem>>) attributes {dimension_semantics = [#tpu.dimension_semantics<parallel>], iteration_bounds = array<i64: 1>, scalar_prefetch = 0 : i64, scratch_operands = 0 : i64, tpu.core_type = #tpu.core_type<tc>, window_params = [{transform_indices = @transform_0, window_bounds = array<i64: 144, 512>}, {pipeline_mode = #tpu.pipeline_mode<synchronous>, transform_indices = @transform_1, window_bounds = array<i64: 16, 144>}, {pipeline_mode = #tpu.pipeline_mode<synchronous>, transform_indices = @transform_2, window_bounds = array<i64: 16, 1>}, {pipeline_mode = #tpu.pipeline_mode<synchronous>, transform_indices = @transform_3, window_bounds = array<i64: 16, 1>}, {transform_indices = @transform_4, window_bounds = array<i64: 16, 512>}]} {
    %c0 = arith.constant 0 : index
    %c0_0 = arith.constant 0 : index
    %0 = vector.load %arg2[%c0, %c0_0] : memref<16x144xf32, #tpu.memory_space<vmem>>, vector<16x144xf32>
    %1 = arith.truncf %0 : vector<16x144xf32> to vector<16x144xbf16>
    %c0_1 = arith.constant 0 : index
    %c0_2 = arith.constant 0 : index
    %2 = vector.load %arg1[%c0_1, %c0_2] : memref<144x512xf32, #tpu.memory_space<vmem>>, vector<144x512xf32>
    %3 = arith.truncf %2 : vector<144x512xf32> to vector<144x512xbf16>
    %cst = arith.constant dense<0.000000e+00> : vector<16x512xf32>
    %4 = tpu.matmul %1, %3, %cst {dimension_numbers = #tpu.dot_dimension_numbers<[1], [0], [0], [1], [0, 0, 1, 1], [], []>} : vector<16x144xbf16>, vector<144x512xbf16>, vector<16x512xf32> -> vector<16x512xf32>
    %c0_3 = arith.constant 0 : index
    %c0_4 = arith.constant 0 : index
    %5 = vector.load %arg3[%c0_3, %c0_4] : memref<16x1xf32, #tpu.memory_space<vmem>>, vector<16x1xf32>
    %6 = vector.broadcast %5 : vector<16x1xf32> to vector<16x512xf32>
    %7 = arith.mulf %4, %6 : vector<16x512xf32>
    %c0_5 = arith.constant 0 : index
    %c0_6 = arith.constant 0 : index
    %8 = vector.load %arg4[%c0_5, %c0_6] : memref<16x1xf32, #tpu.memory_space<vmem>>, vector<16x1xf32>
    %9 = vector.broadcast %8 : vector<16x1xf32> to vector<16x512xf32>
    %10 = arith.addf %7, %9 : vector<16x512xf32>
    %cst_7 = arith.constant 0.000000e+00 : f32
    %11 = vector.broadcast %cst_7 : f32 to vector<16x512xf32>
    %12 = arith.maximumf %10, %11 : vector<16x512xf32>
    %c0_8 = arith.constant 0 : index
    %c0_9 = arith.constant 0 : index
    %13 = vector.load %arg5[%c0_8, %c0_9] : memref<16x512xf32, #tpu.memory_space<vmem>>, vector<16x512xf32>
    tpu.vector_store %arg5[%c0_8, %c0_9], %12 {strides = array<i32>} : memref<16x512xf32, #tpu.memory_space<vmem>>, vector<16x512xf32>,
    return
  }
  func.func @transform_0(%arg0: i32) -> (i32, i32) {
    %c0_i32 = arith.constant 0 : i32
    %c0_i32_0 = arith.constant 0 : i32
    return %c0_i32, %arg0 : i32, i32
  }
  func.func @transform_1(%arg0: i32) -> (i32, i32) {
    %c0_i32 = arith.constant 0 : i32
    %c0_i32_0 = arith.constant 0 : i32
    %c0_i32_1 = arith.constant 0 : i32
    return %c0_i32, %c0_i32_0 : i32, i32
  }
  func.func @transform_2(%arg0: i32) -> (i32, i32) {
    %c0_i32 = arith.constant 0 : i32
    %c0_i32_0 = arith.constant 0 : i32
    %c0_i32_1 = arith.constant 0 : i32
    return %c0_i32, %c0_i32_0 : i32, i32
  }
  func.func @transform_3(%arg0: i32) -> (i32, i32) {
    %c0_i32 = arith.constant 0 : i32
    %c0_i32_0 = arith.constant 0 : i32
    %c0_i32_1 = arith.constant 0 : i32
    return %c0_i32, %c0_i32_0 : i32, i32
  }
  func.func @transform_4(%arg0: i32) -> (i32, i32) {
    %c0_i32 = arith.constant 0 : i32
    %c0_i32_0 = arith.constant 0 : i32
    return %c0_i32, %arg0 : i32, i32
  }
}

module attributes {stable_mosaic.version = 11 : i64} {
  func.func @_conv_kernel(%arg0: i32, %arg1: memref<144x512xf32, #tpu.memory_space<vmem>>, %arg2: memref<16x144xf32, #tpu.memory_space<vmem>>, %arg3: memref<16x1xf32, #tpu.memory_space<vmem>>, %arg4: memref<16x1xf32, #tpu.memory_space<vmem>>, %arg5: memref<16x512xf32, #tpu.memory_space<vmem>>, %arg6: memref<16x1xf32, #tpu.memory_space<vmem>>, %arg7: memref<16x1xf32, #tpu.memory_space<vmem>>, %arg8: memref<16x512xf32, #tpu.memory_space<vmem>>) attributes {dimension_semantics = [#tpu.dimension_semantics<parallel>], iteration_bounds = array<i64: 1>, scalar_prefetch = 0 : i64, scratch_operands = 0 : i64, tpu.core_type = #tpu.core_type<tc>, window_params = [{transform_indices = @transform_0, window_bounds = array<i64: 144, 512>}, {pipeline_mode = #tpu.pipeline_mode<synchronous>, transform_indices = @transform_1, window_bounds = array<i64: 16, 144>}, {pipeline_mode = #tpu.pipeline_mode<synchronous>, transform_indices = @transform_2, window_bounds = array<i64: 16, 1>}, {pipeline_mode = #tpu.pipeline_mode<synchronous>, transform_indices = @transform_3, window_bounds = array<i64: 16, 1>}, {transform_indices = @transform_4, window_bounds = array<i64: 16, 512>}, {pipeline_mode = #tpu.pipeline_mode<synchronous>, transform_indices = @transform_5, window_bounds = array<i64: 16, 1>}, {pipeline_mode = #tpu.pipeline_mode<synchronous>, transform_indices = @transform_6, window_bounds = array<i64: 16, 1>}, {transform_indices = @transform_7, window_bounds = array<i64: 16, 512>}]} {
    %c0 = arith.constant 0 : index
    %c0_0 = arith.constant 0 : index
    %0 = vector.load %arg2[%c0, %c0_0] : memref<16x144xf32, #tpu.memory_space<vmem>>, vector<16x144xf32>
    %1 = arith.truncf %0 : vector<16x144xf32> to vector<16x144xbf16>
    %c0_1 = arith.constant 0 : index
    %c0_2 = arith.constant 0 : index
    %2 = vector.load %arg1[%c0_1, %c0_2] : memref<144x512xf32, #tpu.memory_space<vmem>>, vector<144x512xf32>
    %3 = arith.truncf %2 : vector<144x512xf32> to vector<144x512xbf16>
    %cst = arith.constant dense<0.000000e+00> : vector<16x512xf32>
    %4 = tpu.matmul %1, %3, %cst {dimension_numbers = #tpu.dot_dimension_numbers<[1], [0], [0], [1], [0, 0, 1, 1], [], []>} : vector<16x144xbf16>, vector<144x512xbf16>, vector<16x512xf32> -> vector<16x512xf32>
    %c0_3 = arith.constant 0 : index
    %c0_4 = arith.constant 0 : index
    %5 = vector.load %arg3[%c0_3, %c0_4] : memref<16x1xf32, #tpu.memory_space<vmem>>, vector<16x1xf32>
    %6 = vector.broadcast %5 : vector<16x1xf32> to vector<16x512xf32>
    %7 = arith.mulf %4, %6 : vector<16x512xf32>
    %c0_5 = arith.constant 0 : index
    %c0_6 = arith.constant 0 : index
    %8 = vector.load %arg4[%c0_5, %c0_6] : memref<16x1xf32, #tpu.memory_space<vmem>>, vector<16x1xf32>
    %9 = vector.broadcast %8 : vector<16x1xf32> to vector<16x512xf32>
    %10 = arith.addf %7, %9 : vector<16x512xf32>
    %c0_7 = arith.constant 0 : index
    %c0_8 = arith.constant 0 : index
    %11 = vector.load %arg5[%c0_7, %c0_8] : memref<16x512xf32, #tpu.memory_space<vmem>>, vector<16x512xf32>
    %12 = arith.addf %10, %11 : vector<16x512xf32>
    %cst_9 = arith.constant 0.000000e+00 : f32
    %13 = vector.broadcast %cst_9 : f32 to vector<16x512xf32>
    %14 = arith.maximumf %12, %13 : vector<16x512xf32>
    %c0_10 = arith.constant 0 : index
    %c0_11 = arith.constant 0 : index
    %15 = vector.load %arg6[%c0_10, %c0_11] : memref<16x1xf32, #tpu.memory_space<vmem>>, vector<16x1xf32>
    %16 = vector.broadcast %15 : vector<16x1xf32> to vector<16x512xf32>
    %17 = arith.mulf %14, %16 : vector<16x512xf32>
    %c0_12 = arith.constant 0 : index
    %c0_13 = arith.constant 0 : index
    %18 = vector.load %arg7[%c0_12, %c0_13] : memref<16x1xf32, #tpu.memory_space<vmem>>, vector<16x1xf32>
    %19 = vector.broadcast %18 : vector<16x1xf32> to vector<16x512xf32>
    %20 = arith.addf %17, %19 : vector<16x512xf32>
    %cst_14 = arith.constant 0.000000e+00 : f32
    %21 = vector.broadcast %cst_14 : f32 to vector<16x512xf32>
    %22 = arith.maximumf %20, %21 : vector<16x512xf32>
    %c0_15 = arith.constant 0 : index
    %c0_16 = arith.constant 0 : index
    %23 = vector.load %arg8[%c0_15, %c0_16] : memref<16x512xf32, #tpu.memory_space<vmem>>, vector<16x512xf32>
    tpu.vector_store %arg8[%c0_15, %c0_16], %22 {strides = array<i32>} : memref<16x512xf32, #tpu.memory_space<vmem>>, vector<16x512xf32>,
    return
  }
  func.func @transform_0(%arg0: i32) -> (i32, i32) {
    %c0_i32 = arith.constant 0 : i32
    %c0_i32_0 = arith.constant 0 : i32
    return %c0_i32, %arg0 : i32, i32
  }
  func.func @transform_1(%arg0: i32) -> (i32, i32) {
    %c0_i32 = arith.constant 0 : i32
    %c0_i32_0 = arith.constant 0 : i32
    %c0_i32_1 = arith.constant 0 : i32
    return %c0_i32, %c0_i32_0 : i32, i32
  }
  func.func @transform_2(%arg0: i32) -> (i32, i32) {
    %c0_i32 = arith.constant 0 : i32
    %c0_i32_0 = arith.constant 0 : i32
    %c0_i32_1 = arith.constant 0 : i32
    return %c0_i32, %c0_i32_0 : i32, i32
  }
  func.func @transform_3(%arg0: i32) -> (i32, i32) {
    %c0_i32 = arith.constant 0 : i32
    %c0_i32_0 = arith.constant 0 : i32
    %c0_i32_1 = arith.constant 0 : i32
    return %c0_i32, %c0_i32_0 : i32, i32
  }
  func.func @transform_4(%arg0: i32) -> (i32, i32) {
    %c0_i32 = arith.constant 0 : i32
    %c0_i32_0 = arith.constant 0 : i32
    return %c0_i32, %arg0 : i32, i32
  }
  func.func @transform_5(%arg0: i32) -> (i32, i32) {
    %c0_i32 = arith.constant 0 : i32
    %c0_i32_0 = arith.constant 0 : i32
    %c0_i32_1 = arith.constant 0 : i32
    return %c0_i32, %c0_i32_0 : i32, i32
  }
  func.func @transform_6(%arg0: i32) -> (i32, i32) {
    %c0_i32 = arith.constant 0 : i32
    %c0_i32_0 = arith.constant 0 : i32
    %c0_i32_1 = arith.constant 0 : i32
    return %c0_i32, %c0_i32_0 : i32, i32
  }
  func.func @transform_7(%arg0: i32) -> (i32, i32) {
    %c0_i32 = arith.constant 0 : i32
    %c0_i32_0 = arith.constant 0 : i32
    return %c0_i32, %arg0 : i32, i32
  }
}

module attributes {stable_mosaic.version = 11 : i64} {
  func.func @_conv_kernel(%arg0: i32, %arg1: memref<144x90xf32, #tpu.memory_space<vmem>>, %arg2: memref<16x144xf32, #tpu.memory_space<vmem>>, %arg3: memref<16x1xf32, #tpu.memory_space<vmem>>, %arg4: memref<16x1xf32, #tpu.memory_space<vmem>>, %arg5: memref<16x1xf32, #tpu.memory_space<vmem>>, %arg6: memref<16x1xf32, #tpu.memory_space<vmem>>, %arg7: memref<16x90xf32, #tpu.memory_space<vmem>>) attributes {dimension_semantics = [#tpu.dimension_semantics<parallel>], iteration_bounds = array<i64: 1>, scalar_prefetch = 0 : i64, scratch_operands = 0 : i64, tpu.core_type = #tpu.core_type<tc>, window_params = [{transform_indices = @transform_0, window_bounds = array<i64: 144, 90>}, {pipeline_mode = #tpu.pipeline_mode<synchronous>, transform_indices = @transform_1, window_bounds = array<i64: 16, 144>}, {pipeline_mode = #tpu.pipeline_mode<synchronous>, transform_indices = @transform_2, window_bounds = array<i64: 16, 1>}, {pipeline_mode = #tpu.pipeline_mode<synchronous>, transform_indices = @transform_3, window_bounds = array<i64: 16, 1>}, {pipeline_mode = #tpu.pipeline_mode<synchronous>, transform_indices = @transform_4, window_bounds = array<i64: 16, 1>}, {pipeline_mode = #tpu.pipeline_mode<synchronous>, transform_indices = @transform_5, window_bounds = array<i64: 16, 1>}, {transform_indices = @transform_6, window_bounds = array<i64: 16, 90>}]} {
    %c0 = arith.constant 0 : index
    %c0_0 = arith.constant 0 : index
    %0 = vector.load %arg2[%c0, %c0_0] : memref<16x144xf32, #tpu.memory_space<vmem>>, vector<16x144xf32>
    %1 = arith.truncf %0 : vector<16x144xf32> to vector<16x144xbf16>
    %c0_1 = arith.constant 0 : index
    %c0_2 = arith.constant 0 : index
    %2 = vector.load %arg1[%c0_1, %c0_2] : memref<144x90xf32, #tpu.memory_space<vmem>>, vector<144x90xf32>
    %3 = arith.truncf %2 : vector<144x90xf32> to vector<144x90xbf16>
    %cst = arith.constant dense<0.000000e+00> : vector<16x90xf32>
    %4 = tpu.matmul %1, %3, %cst {dimension_numbers = #tpu.dot_dimension_numbers<[1], [0], [0], [1], [0, 0, 1, 1], [], []>} : vector<16x144xbf16>, vector<144x90xbf16>, vector<16x90xf32> -> vector<16x90xf32>
    %c0_3 = arith.constant 0 : index
    %c0_4 = arith.constant 0 : index
    %5 = vector.load %arg3[%c0_3, %c0_4] : memref<16x1xf32, #tpu.memory_space<vmem>>, vector<16x1xf32>
    %6 = vector.broadcast %5 : vector<16x1xf32> to vector<16x90xf32>
    %7 = arith.mulf %4, %6 : vector<16x90xf32>
    %c0_5 = arith.constant 0 : index
    %c0_6 = arith.constant 0 : index
    %8 = vector.load %arg4[%c0_5, %c0_6] : memref<16x1xf32, #tpu.memory_space<vmem>>, vector<16x1xf32>
    %9 = vector.broadcast %8 : vector<16x1xf32> to vector<16x90xf32>
    %10 = arith.addf %7, %9 : vector<16x90xf32>
    %c0_7 = arith.constant 0 : index
    %c0_8 = arith.constant 0 : index
    %11 = vector.load %arg5[%c0_7, %c0_8] : memref<16x1xf32, #tpu.memory_space<vmem>>, vector<16x1xf32>
    %12 = vector.broadcast %11 : vector<16x1xf32> to vector<16x90xf32>
    %13 = arith.mulf %10, %12 : vector<16x90xf32>
    %c0_9 = arith.constant 0 : index
    %c0_10 = arith.constant 0 : index
    %14 = vector.load %arg6[%c0_9, %c0_10] : memref<16x1xf32, #tpu.memory_space<vmem>>, vector<16x1xf32>
    %15 = vector.broadcast %14 : vector<16x1xf32> to vector<16x90xf32>
    %16 = arith.addf %13, %15 : vector<16x90xf32>
    %cst_11 = arith.constant 0.000000e+00 : f32
    %17 = vector.broadcast %cst_11 : f32 to vector<16x90xf32>
    %18 = arith.maximumf %16, %17 : vector<16x90xf32>
    %c0_12 = arith.constant 0 : index
    %c0_13 = arith.constant 0 : index
    %19 = vector.load %arg7[%c0_12, %c0_13] : memref<16x90xf32, #tpu.memory_space<vmem>>, vector<16x90xf32>
    tpu.vector_store %arg7[%c0_12, %c0_13], %18 {strides = array<i32>} : memref<16x90xf32, #tpu.memory_space<vmem>>, vector<16x90xf32>,
    return
  }
  func.func @transform_0(%arg0: i32) -> (i32, i32) {
    %c0_i32 = arith.constant 0 : i32
    %c0_i32_0 = arith.constant 0 : i32
    return %c0_i32, %arg0 : i32, i32
  }
  func.func @transform_1(%arg0: i32) -> (i32, i32) {
    %c0_i32 = arith.constant 0 : i32
    %c0_i32_0 = arith.constant 0 : i32
    %c0_i32_1 = arith.constant 0 : i32
    return %c0_i32, %c0_i32_0 : i32, i32
  }
  func.func @transform_2(%arg0: i32) -> (i32, i32) {
    %c0_i32 = arith.constant 0 : i32
    %c0_i32_0 = arith.constant 0 : i32
    %c0_i32_1 = arith.constant 0 : i32
    return %c0_i32, %c0_i32_0 : i32, i32
  }
  func.func @transform_3(%arg0: i32) -> (i32, i32) {
    %c0_i32 = arith.constant 0 : i32
    %c0_i32_0 = arith.constant 0 : i32
    %c0_i32_1 = arith.constant 0 : i32
    return %c0_i32, %c0_i32_0 : i32, i32
  }
  func.func @transform_4(%arg0: i32) -> (i32, i32) {
    %c0_i32 = arith.constant 0 : i32
    %c0_i32_0 = arith.constant 0 : i32
    %c0_i32_1 = arith.constant 0 : i32
    return %c0_i32, %c0_i32_0 : i32, i32
  }
  func.func @transform_5(%arg0: i32) -> (i32, i32) {
    %c0_i32 = arith.constant 0 : i32
    %c0_i32_0 = arith.constant 0 : i32
    %c0_i32_1 = arith.constant 0 : i32
    return %c0_i32, %c0_i32_0 : i32, i32
  }
  func.func @transform_6(%arg0: i32) -> (i32, i32) {
    %c0_i32 = arith.constant 0 : i32
    %c0_i32_0 = arith.constant 0 : i32
    return %c0_i32, %arg0 : i32, i32
  }
}

module attributes {stable_mosaic.version = 11 : i64} {
  func.func @_conv_kernel(%arg0: i32, %arg1: memref<144x26xf32, #tpu.memory_space<vmem>>, %arg2: memref<8x144xf32, #tpu.memory_space<vmem>>, %arg3: memref<8x1xf32, #tpu.memory_space<vmem>>, %arg4: memref<8x1xf32, #tpu.memory_space<vmem>>, %arg5: memref<8x26xf32, #tpu.memory_space<vmem>>) attributes {dimension_semantics = [#tpu.dimension_semantics<parallel>], iteration_bounds = array<i64: 1>, scalar_prefetch = 0 : i64, scratch_operands = 0 : i64, tpu.core_type = #tpu.core_type<tc>, window_params = [{transform_indices = @transform_0, window_bounds = array<i64: 144, 26>}, {pipeline_mode = #tpu.pipeline_mode<synchronous>, transform_indices = @transform_1, window_bounds = array<i64: 8, 144>}, {pipeline_mode = #tpu.pipeline_mode<synchronous>, transform_indices = @transform_2, window_bounds = array<i64: 8, 1>}, {pipeline_mode = #tpu.pipeline_mode<synchronous>, transform_indices = @transform_3, window_bounds = array<i64: 8, 1>}, {transform_indices = @transform_4, window_bounds = array<i64: 8, 26>}]} {
    %c0 = arith.constant 0 : index
    %c0_0 = arith.constant 0 : index
    %0 = vector.load %arg2[%c0, %c0_0] : memref<8x144xf32, #tpu.memory_space<vmem>>, vector<8x144xf32>
    %1 = arith.truncf %0 : vector<8x144xf32> to vector<8x144xbf16>
    %c0_1 = arith.constant 0 : index
    %c0_2 = arith.constant 0 : index
    %2 = vector.load %arg1[%c0_1, %c0_2] : memref<144x26xf32, #tpu.memory_space<vmem>>, vector<144x26xf32>
    %3 = arith.truncf %2 : vector<144x26xf32> to vector<144x26xbf16>
    %cst = arith.constant dense<0.000000e+00> : vector<8x26xf32>
    %4 = tpu.matmul %1, %3, %cst {dimension_numbers = #tpu.dot_dimension_numbers<[1], [0], [0], [1], [0, 0, 1, 1], [], []>} : vector<8x144xbf16>, vector<144x26xbf16>, vector<8x26xf32> -> vector<8x26xf32>
    %c0_3 = arith.constant 0 : index
    %c0_4 = arith.constant 0 : index
    %5 = vector.load %arg3[%c0_3, %c0_4] : memref<8x1xf32, #tpu.memory_space<vmem>>, vector<8x1xf32>
    %6 = vector.broadcast %5 : vector<8x1xf32> to vector<8x26xf32>
    %7 = arith.mulf %4, %6 : vector<8x26xf32>
    %c0_5 = arith.constant 0 : index
    %c0_6 = arith.constant 0 : index
    %8 = vector.load %arg4[%c0_5, %c0_6] : memref<8x1xf32, #tpu.memory_space<vmem>>, vector<8x1xf32>
    %9 = vector.broadcast %8 : vector<8x1xf32> to vector<8x26xf32>
    %10 = arith.addf %7, %9 : vector<8x26xf32>
    %c0_7 = arith.constant 0 : index
    %c0_8 = arith.constant 0 : index
    %11 = vector.load %arg5[%c0_7, %c0_8] : memref<8x26xf32, #tpu.memory_space<vmem>>, vector<8x26xf32>
    tpu.vector_store %arg5[%c0_7, %c0_8], %10 {strides = array<i32>} : memref<8x26xf32, #tpu.memory_space<vmem>>, vector<8x26xf32>,
    return
  }
  func.func @transform_0(%arg0: i32) -> (i32, i32) {
    %c0_i32 = arith.constant 0 : i32
    %c0_i32_0 = arith.constant 0 : i32
    return %c0_i32, %arg0 : i32, i32
  }
  func.func @transform_1(%arg0: i32) -> (i32, i32) {
    %c0_i32 = arith.constant 0 : i32
    %c0_i32_0 = arith.constant 0 : i32
    %c0_i32_1 = arith.constant 0 : i32
    return %c0_i32, %c0_i32_0 : i32, i32
  }
  func.func @transform_2(%arg0: i32) -> (i32, i32) {
    %c0_i32 = arith.constant 0 : i32
    %c0_i32_0 = arith.constant 0 : i32
    %c0_i32_1 = arith.constant 0 : i32
    return %c0_i32, %c0_i32_0 : i32, i32
  }
  func.func @transform_3(%arg0: i32) -> (i32, i32) {
    %c0_i32 = arith.constant 0 : i32
    %c0_i32_0 = arith.constant 0 : i32
    %c0_i32_1 = arith.constant 0 : i32
    return %c0_i32, %c0_i32_0 : i32, i32
  }
  func.func @transform_4(%arg0: i32) -> (i32, i32) {
    %c0_i32 = arith.constant 0 : i32
    %c0_i32_0 = arith.constant 0 : i32
    return %c0_i32, %arg0 : i32, i32
  }
}

module attributes {stable_mosaic.version = 11 : i64} {
  func.func @_classifier_kernel(%arg0: memref<2x104xf32, #tpu.memory_space<vmem>>, %arg1: memref<104x32xf32, #tpu.memory_space<vmem>>, %arg2: memref<1x32xf32, #tpu.memory_space<vmem>>, %arg3: memref<32x5xf32, #tpu.memory_space<vmem>>, %arg4: memref<1x5xf32, #tpu.memory_space<vmem>>, %arg5: memref<2x5xf32, #tpu.memory_space<vmem>>) attributes {dimension_semantics = [], scalar_prefetch = 0 : i64, scratch_operands = 0 : i64, tpu.core_type = #tpu.core_type<tc>} {
    %c0 = arith.constant 0 : index
    %c0_0 = arith.constant 0 : index
    %0 = vector.load %arg0[%c0, %c0_0] : memref<2x104xf32, #tpu.memory_space<vmem>>, vector<2x104xf32>
    %c0_1 = arith.constant 0 : index
    %c0_2 = arith.constant 0 : index
    %1 = vector.load %arg1[%c0_1, %c0_2] : memref<104x32xf32, #tpu.memory_space<vmem>>, vector<104x32xf32>
    %cst = arith.constant dense<0.000000e+00> : vector<2x32xf32>
    %2 = tpu.matmul %0, %1, %cst {dimension_numbers = #tpu.dot_dimension_numbers<[1], [0], [0], [1], [0, 0, 1, 1], [], []>} : vector<2x104xf32>, vector<104x32xf32>, vector<2x32xf32> -> vector<2x32xf32>
    %c0_3 = arith.constant 0 : index
    %c0_4 = arith.constant 0 : index
    %3 = vector.load %arg2[%c0_3, %c0_4] : memref<1x32xf32, #tpu.memory_space<vmem>>, vector<1x32xf32>
    %4 = vector.broadcast %3 : vector<1x32xf32> to vector<2x32xf32>
    %5 = arith.addf %2, %4 : vector<2x32xf32>
    %cst_5 = arith.constant 0.000000e+00 : f32
    %6 = vector.broadcast %cst_5 : f32 to vector<2x32xf32>
    %7 = arith.maximumf %5, %6 : vector<2x32xf32>
    %c0_6 = arith.constant 0 : index
    %c0_7 = arith.constant 0 : index
    %8 = vector.load %arg3[%c0_6, %c0_7] : memref<32x5xf32, #tpu.memory_space<vmem>>, vector<32x5xf32>
    %cst_8 = arith.constant dense<0.000000e+00> : vector<2x5xf32>
    %9 = tpu.matmul %7, %8, %cst_8 {dimension_numbers = #tpu.dot_dimension_numbers<[1], [0], [0], [1], [0, 0, 1, 1], [], []>} : vector<2x32xf32>, vector<32x5xf32>, vector<2x5xf32> -> vector<2x5xf32>
    %c0_9 = arith.constant 0 : index
    %c0_10 = arith.constant 0 : index
    %10 = vector.load %arg4[%c0_9, %c0_10] : memref<1x5xf32, #tpu.memory_space<vmem>>, vector<1x5xf32>
    %11 = vector.broadcast %10 : vector<1x5xf32> to vector<2x5xf32>
    %12 = arith.addf %9, %11 : vector<2x5xf32>
    %c0_11 = arith.constant 0 : index
    %c0_12 = arith.constant 0 : index
    %13 = vector.load %arg5[%c0_11, %c0_12] : memref<2x5xf32, #tpu.memory_space<vmem>>, vector<2x5xf32>
    tpu.vector_store %arg5[%c0_11, %c0_12], %12 {strides = array<i32>} : memref<2x5xf32, #tpu.memory_space<vmem>>, vector<2x5xf32>,
    return
  }
}

</mosaic_0001>

<bundles_post_ra>
// kernel: squeeze.4
= control target key start
LH: loop header
LB: loop body
LE: loop exit
PB: predicated region body
PF: predicated region fallthrough
CT: control target
= control target key end

     0   :  { %vm3_vm0 = vcmask 523264   ;;  %s58_s0 = inlined_call_operand.vmem [shape: f32[2048], index: 0, kind: input, shape index: {}]   ;;  %s59_s1 = inlined_call_operand.vmem [shape: f32[1,2,16,64], index: 1, kind: output, shape index: {}]  }
   0x1   :  { %v10_v0 = vld [vmem:[%s58_s0] sm:$0xff]   ;;  %v23_v1 = vld [vmem:[%s58_s0 + $0x8] sm:$0xff]   ;;  %s29_s0 = smov 64  }
   0x2   :  { %11 = vrot.lane.b32.xlu0 %v10_v0, %s29_s0  ;;  %4 = vst.msk [vmem:[%s59_s1] ss:$2 sm:$0xff] %vm3_vm0, %v10_v0   ;;  %24 = vst.msk [vmem:[%s59_s1 + $0x10] ss:$2 sm:$0xff] %vm3_vm0, %v23_v1  }
   0x6   :  { %18 = vrot.lane.b32.xlu0 %v23_v1, %s29_s0 }
  0x74   :  { %v12_v2 = vpop.permute.xlu0 %11  }
  0x75   :  { %25 = vst.msk [vmem:[%s59_s1 + $0x1] ss:$2 sm:$0xff] %vm3_vm0, %v12_v2  }
  0x78   :  { %v19_v3 = vpop.permute.xlu0 %18  }
  0x79   :  { %27 = vst.msk [vmem:[%s59_s1 + $0x11] ss:$2 sm:$0xff] %vm3_vm0, %v19_v3  }

// kernel: model_forward.11
= control target key start
LH: loop header
LB: loop body
LE: loop exit
PB: predicated region body
PF: predicated region fallthrough
CT: control target
= control target key end

     0   :  { %v79_v0 = vmov 0   ;;  %v23_v5 = vlaneseq  ;;  %s130_s2 = inlined_call_operand.vmem [shape: f32[2,1,1], index: 2, kind: input, shape index: {}]   ;;  %s131_s1 = inlined_call_operand.vmem [shape: f32[2,1,1], index: 1, kind: input, shape index: {}]   ;;  %s132_s0 = inlined_call_operand.vmem [shape: f32[1,2048], index: 0, kind: input, shape index: {}]   ;;  %s133_s3 = inlined_call_operand.vmem [shape: f32[2,1,2048], index: 3, kind: output, shape index: {}]  }
   0x1   :  { %78 = vset.pattern.permute.xlu1 %v79_v0  ;;  %77 = vset.pattern.permute.xlu0 %v79_v0  ;;  %v40_v1 = vld [vmem:[%s130_s2] sm:$0x1]  ;;  %v41_v3 = vld [vmem:[%s130_s2 + $0x1] sm:$0x1]  ;;  %v15_v11 = vld [vmem:[%s132_s0 + $0x8] sm:$0xff] }
   0x2   :  { %v16_v2 = vld [vmem:[%s131_s1] sm:$0x1]  ;;  %44 = vperm.xlu1 %78, %v40_v1   ;;  %v17_v4 = vld [vmem:[%s131_s1 + $0x1] sm:$0x1]  ;;  %v24_v6 = vshrl.u32 %v23_v5, 7 }
   0x3   :  { %20 = vperm.xlu0 %77, %v16_v2   ;;  %v14_v10 = vld [vmem:[%s132_s0] sm:$0xff] }
   0x4   :  { %v25_v7 = vsub.s32 0, %v24_v6 }
   0x6   :  { %53 = vperm.xlu1 %78, %v41_v3  }
   0x7   :  { %29 = vperm.xlu0 %77, %v17_v4  }
  0x7d   :  { %v45_v8 = vpop.permute.xlu1 %44 }
  0x7e   :  { %v21_v9 = vpop.permute.xlu0 %20  ;;  %v50_v12 = vrot.slane %v45_v8, %v25_v7 }
  0x7f   :  { %v26_v13 = vrot.slane %v21_v9, %v25_v7 }
  0x81   :  { %v36_v14 = vmul.f32 %v26_v13, %v14_v10  ;;  %v37_v15 = vmul.f32 %v26_v13, %v15_v11  ;;  %v54_v16 = vpop.permute.xlu1 %53 }
  0x82   :  { %v30_v17 = vpop.permute.xlu0 %29  ;;  %v59_v21 = vrot.slane %v54_v16, %v25_v7 }
  0x83   :  { %v60_v18 = vadd.f32 %v50_v12, %v36_v14  ;;  %v61_v19 = vadd.f32 %v50_v12, %v37_v15  ;;  %v35_v20 = vrot.slane %v30_v17, %v25_v7 }
  0x85   :  { %v64_v22 = vmax.f32 %v60_v18, 0.0  ;;  %v65_v23 = vmax.f32 %v61_v19, 0.0  ;;  %v38_v24 = vmul.f32 %v35_v20, %v14_v10  ;;  %v39_v25 = vmul.f32 %v35_v20, %v15_v11 }
  0x87   :  { %68 = vst [vmem:[%s133_s3] sm:$0xff] %v64_v22  ;;  %69 = vst [vmem:[%s133_s3 + $0x8] sm:$0xff] %v65_v23  ;;  %v62_v26 = vadd.f32 %v59_v21, %v38_v24  ;;  %v63_v27 = vadd.f32 %v59_v21, %v39_v25 }
  0x89   :  { %v66_v28 = vmax.f32 %v62_v26, 0.0  ;;  %v67_v29 = vmax.f32 %v63_v27, 0.0 }
  0x8b   :  { %70 = vst [vmem:[%s133_s3 + $0x10] sm:$0xff] %v66_v28  ;;  %71 = vst [vmem:[%s133_s3 + $0x18] sm:$0xff] %v67_v29 }

// kernel: model_forward.12
= control target key start
LH: loop header
LB: loop body
LE: loop exit
PB: predicated region body
PF: predicated region fallthrough
CT: control target
= control target key end

     0   :  { %9 = vsyncpa [#allocation3], 0  ;;  %s528_s15 = smov 0   ;;  %s576_s0 = inlined_call_operand.vmem [shape: f32[5,1024], index: 0, kind: input, shape index: {}]   ;;  %s577_s1 = inlined_call_operand.hbm [shape: f32[4,5], index: 1, kind: input, shape index: {}]   ;;  %s578_s2 = inlined_call_operand.vmem [shape: f32[4,1], index: 2, kind: input, shape index: {}]   ;;  %s579_s3 = inlined_call_operand.vmem [shape: f32[4,1], index: 3, kind: input, shape index: {}]   ;;  %s580_s4 = inlined_call_operand.vmem [shape: f32[4,1024], index: 4, kind: output, shape index: {}]  }
   0x1 LB: > { %s425_s16 = sadd.s32 4294967295, %s498_s15   ;;  %p427_p0 = scmp.ge.s32.totalorder %s498_s15, 1  ;;  %s498_s15 = sphi %s528_s15, %s15_s15  }
   0x2   : > { %p135_p1 = scmp.lt.s32.totalorder %s498_s15, 3  ;;  %p540_p3 = scmp.eq.s32.totalorder %s425_s16, 0 }
   0x3   : > { %s500_s19 = smov [#allocation2]  }
   0x4   : > { %p536_p2 = pnand %p427_p0, %p135_p1  ;;  %s148_s20 = sshll.u32 %s500_s19, 4  ;;  %s149_s20 = int_to_ptr.vmem [resolvable:$true] %s148_s20 }
   0x5   : > { %s473_s21 = scalar_lea.vmem %s149_s20, 64  ;;  %p481_p10 = scmp.lt.s32.totalorder %s149_s20, %s149_s20 }
   0x6   : > { %p444_p4 = pneg %p536_p2  ;;  %p474_p7 = scmp.ne.s32.totalorder %s149_s20, %s473_s21 }
   0x7   : > { %p482_p11 = scmp.lt.s32.totalorder %s473_s21, %s473_s21 }
   0x8   : > { %p445_p5 = pnand %p540_p3, %p444_p4 }
   0x9   : > { %p483_p12 = por %p482_p11, %p481_p10 }
   0xa   : > { %p464_p6 = pneg %p445_p5 }
   0xc   : > { %p476_p8 = pnand %p474_p7, %p464_p6 }
   0xe   : > { %p477_p9 = pneg %p476_p8 }
  0x10   : > { %p484_p13 = pnand %p483_p12, %p477_p9 }
  0x12   : > { %487 = shalt.err (!%p484_p13)
}
  0x13   : > { %447 = dma.hbm_to_vmem [thread:$0]  (!%p445_p5), %s577_s1, 64, %s149_s20, [#allocation3]  }
  0x14   : > { %176 = sbr.rel (%p536_p2) target bundleno = 243 (0xf3), region = 36 }
  0x19   : > { %493 = dma.done.wait (%p540_p3), [#allocation3], 64  }
  0x1a   : > { %495 = vsyncadd (%p540_p3), [#allocation3], 4294967232  ;;  %s432_s24 = sshll.u32 %s425_s16, 2  ;;  %vm229_vm0 = vcmask 1041408   ;;  %v501_v0 = vmov 0   ;;  %vm230_vm1 = vcmask 1042432  }
  0x1b   : > { %p203_p0 = scmp.lt.s32.totalorder %s432_s24, 7  ;;  %277 = vmatprep.mubr.bf16.mxu0 %v501_v0  ;;  %318 = vmatprep.mubr.bf16.mxu1 %v501_v0  ;;  %v502_v1 = vmov 65535   ;;  %v327_v11 = vld [vmem:[%s578_s2] sm:$0xf]  ;;  %vm225_vm2 = vcmask 39936  }
  0x1c   : > { %v231_v2 = vsel %vm229_vm0, 4294967295, %v502_v1  ;;  %461 = vset.pattern.permute.xlu0 %v501_v0  ;;  %v215_v13 = vld [vmem:[#allocation2] sm:$0xf] }
  0x1d   : > { %s584_s24 = smov (!%p203_p0, %s432_s24), 7  ;;  %v232_v3 = vsel %vm230_vm1, %v231_v2, 0  ;;  %330 = vperm.xlu0 %461, %v327_v11   ;;  %v337_v18 = vld [vmem:[%s579_s3] sm:$0xf]  ;;  %v216_v19 = vpack.c.bf16 %v215_v13, %v215_v13 }
  0x1e   : > { %s433_s25 = sshll.u32 %s584_s24, 3  ;;  %s435_s7 = sshll.u32 %s584_s24, 2 }
  0x1f   : > { %s206_s28 = scalar_lea.vmem %s576_s0, %s433_s25  ;;  %s212_s10 = scalar_lea.vmem %s580_s4, %s435_s7 }
  0x20   : > { %v218_v4 = vld [vmem:[%s206_s28 + $0x8] sm:$0x1f]  ;;  %v220_v5 = vld [vmem:[%s206_s28 + $0x18] sm:$0x1f]  ;;  %v217_v6 = vld [vmem:[%s206_s28] sm:$0x1f] }
  0x21   : > { %v222_v7 = vpack.c.bf16 %v218_v4, %v218_v4  ;;  %v224_v8 = vpack.c.bf16 %v220_v5, %v220_v5  ;;  %v221_v9 = vpack.c.bf16 %v217_v6, %v217_v6  ;;  %v219_v10 = vld [vmem:[%s206_s28 + $0x10] sm:$0x1f]  ;;  %340 = vperm.xlu0 %461, %v337_v18  }
  0x22   : > { %v223_v12 = vpack.c.bf16 %v219_v10, %v219_v10 }
  0x23   : > { %v237_v14 = vand.u32 %v232_v3, %v222_v7  ;;  %v243_v15 = vand.u32 %v232_v3, %v224_v8  ;;  %v234_v16 = vand.u32 %v232_v3, %v221_v9 }
  0x24   : > { %v240_v17 = vand.u32 %v232_v3, %v223_v12 }
  0x25   : > { %259 = vmatprep.subr.bf16.mxu0 %v237_v14  ;;  %300 = vmatprep.subr.bf16.mxu1 %v243_v15 }
  0x26   : > { %260 = vmatpush1.bf16.msra.mxu0 %v234_v16  ;;  %301 = vmatpush1.bf16.msra.mxu1 %v240_v17 }
  0x29   : > { %436 = vmatmul.mubr.msk.bf16.vlgmr.msra.gmra.mxu0 %vm225_vm2, %v216_v19  ;;  %437 = vmatmul.mubr.msk.bf16.vlgmr.msra.gmra.mxu1 %vm225_vm2, %v216_v19 }
  0x98   : > { %v331_v20 = vpop.permute.xlu0 %330 }
  0x9c   : > { %v341_v27 = vpop.permute.xlu0 %340 }
  0xe9   : > { %v279_v21 = vpop.f32.mrf.mxu0  ;;  %v320_v22 = vpop.f32.mrf.mxu1 }
  0xea   : > { %v333_v23 = vmul.f32 %v331_v20, %v279_v21  ;;  %v335_v24 = vmul.f32 %v331_v20, %v320_v22 }
  0xeb   : > { %v281_v25 = vpop.f32.mrf.mxu0  ;;  %v322_v26 = vpop.f32.mrf.mxu1 }
  0xec   : > { %v334_v28 = vmul.f32 %v331_v20, %v281_v25  ;;  %v336_v29 = vmul.f32 %v331_v20, %v322_v26  ;;  %v343_v32 = vadd.f32 %v341_v27, %v333_v23  ;;  %v345_v33 = vadd.f32 %v341_v27, %v335_v24 }
  0xed   : > { %v283_v30 = vpop.f32.mrf.mxu0  ;;  %v324_v31 = vpop.f32.mrf.mxu1 }
  0xee   : > { %v344_v34 = vadd.f32 %v341_v27, %v334_v28  ;;  %v346_v35 = vadd.f32 %v341_v27, %v336_v29 }
  0xef   : > { %v284_v36 = vpop.f32.mrf.mxu0  ;;  %v325_v37 = vpop.f32.mrf.mxu1 }
  0xf0   : > { %v351_v38 = vcombine.low %v343_v32, %v344_v34  ;;  %v352_v39 = vcombine.low %v345_v33, %v346_v35 }
  0xf2   : > { %355 = vst [vmem:[%s212_s10] sm:$0xff] %v351_v38  ;;  %356 = vst [vmem:[%s212_s10 + $0x8] sm:$0xff] %v352_v39 }
  0xf3 PF: > { %s15_s15 = sadd.s32 1, %s498_s15  }
  0xf4   : > { %p12_p1 = scmp.ge.s32.totalorder %s15_s15, 4  }
  0xf6   :  { %14 = sbr.rel (!%p12_p1) target bundleno = 1 (0x1), region = 71 }
  0xfb   :  { %379 = vsyncpa [#allocation3], 1 }
  0xfc   :  { %381 = vsyncpa [#allocation3 + $0x1], 1 }

// kernel: squeeze.6
= control target key start
LH: loop header
LB: loop body
LE: loop exit
PB: predicated region body
PF: predicated region fallthrough
CT: control target
= control target key end

     0   :  { %vm154_vm0 = vcmask 1047556   ;;  %s549_s14 = smov 96   ;;  %s550_s26 = smov 64   ;;  %vm3_vm1 = vcmask 261120   ;;  %s1128_s0 = inlined_call_operand.vmem [shape: f32[1,8,1024], index: 0, kind: input, shape index: {}]   ;;  %s1129_s1 = inlined_call_operand.vmem [shape: f32[8,2,16,32], index: 1, kind: output, shape index: {}]  }
   0x1   :  { %v484_v0 = vld [vmem:[%s1128_s0 + $0x2] ss:$8 sm:$0xf]   ;;  %v152_v3 = vld [vmem:[%s1128_s0] ss:$8 sm:$0xf]  }
   0x2   :  { %v485_v1 = vld [vmem:[%s1128_s0 + $0x2] ss:$8 sm:$0xf0]   ;;  %v153_v4 = vld [vmem:[%s1128_s0] ss:$8 sm:$0xf0]  }
   0x3   :  { %v177_v2 = vsel %vm154_vm0, %v485_v1, %v484_v0  ;;  %v155_v5 = vsel %vm154_vm0, %v153_v4, %v152_v3  ;;  %v487_v6 = vld [vmem:[%s1128_s0 + $0x3] ss:$8 sm:$0xf]   ;;  %v481_v9 = vld [vmem:[%s1128_s0 + $0x1] ss:$8 sm:$0xf]  }
   0x4   :  { %178 = vrot.lane.b32.xlu1 %v177_v2, %s549_s14  ;;  %v488_v7 = vld [vmem:[%s1128_s0 + $0x3] ss:$8 sm:$0xf0]   ;;  %156 = vrot.lane.b32.xlu0 %v155_v5, %s549_s14  ;;  %v482_v10 = vld [vmem:[%s1128_s0 + $0x1] ss:$8 sm:$0xf0]  }
   0x5   :  { %v188_v8 = vsel %vm154_vm0, %v488_v7, %v487_v6  ;;  %v166_v11 = vsel %vm154_vm0, %v482_v10, %v481_v9  ;;  %v493_v12 = vld [vmem:[%s1128_s0 + $0x5] ss:$8 sm:$0xf]   ;;  %v490_v14 = vld [vmem:[%s1128_s0 + $0x4] ss:$8 sm:$0xf]  }
   0x6   :  { %v494_v13 = vld [vmem:[%s1128_s0 + $0x5] ss:$8 sm:$0xf0]   ;;  %v491_v15 = vld [vmem:[%s1128_s0 + $0x4] ss:$8 sm:$0xf0]  }
   0x7   :  { %v210_v16 = vsel %vm154_vm0, %v494_v13, %v493_v12  ;;  %v199_v17 = vsel %vm154_vm0, %v491_v15, %v490_v14  ;;  %v499_v18 = vld [vmem:[%s1128_s0 + $0x7] ss:$8 sm:$0xf]   ;;  %v496_v20 = vld [vmem:[%s1128_s0 + $0x6] ss:$8 sm:$0xf]  }
   0x8   :  { %189 = vrot.lane.b32.xlu1 %v188_v8, %s549_s14  ;;  %167 = vrot.lane.b32.xlu0 %v166_v11, %s549_s14  ;;  %v500_v19 = vld [vmem:[%s1128_s0 + $0x7] ss:$8 sm:$0xf0]   ;;  %v497_v21 = vld [vmem:[%s1128_s0 + $0x6] ss:$8 sm:$0xf0]  }
   0x9   :  { %v232_v22 = vsel %vm154_vm0, %v500_v19, %v499_v18  ;;  %v221_v23 = vsel %vm154_vm0, %v497_v21, %v496_v20  ;;  %v503_v24 = vld [vmem:[%s1128_s0 + $0x1] ss:$8 sm:$0xf]   ;;  %v238_v26 = vld [vmem:[%s1128_s0] ss:$8 sm:$0xf]  }
   0xa   :  { %v504_v25 = vld [vmem:[%s1128_s0 + $0x1] ss:$8 sm:$0xf0]   ;;  %v239_v27 = vld [vmem:[%s1128_s0] ss:$8 sm:$0xf0]  }
   0xb   :  { %v252_v28 = vsel %vm154_vm0, %v504_v25, %v503_v24  ;;  %v241_v29 = vsel %vm154_vm0, %v239_v27, %v238_v26  ;;  %v509_v30 = vld [vmem:[%s1128_s0 + $0x3] ss:$8 sm:$0xf]   ;;  %v506_v32 = vld [vmem:[%s1128_s0 + $0x2] ss:$8 sm:$0xf]  }
   0xc   :  { %211 = vrot.lane.b32.xlu1 %v210_v16, %s549_s14  ;;  %200 = vrot.lane.b32.xlu0 %v199_v17, %s549_s14  ;;  %v510_v31 = vld [vmem:[%s1128_s0 + $0x3] ss:$8 sm:$0xf0]   ;;  %v507_v33 = vld [vmem:[%s1128_s0 + $0x2] ss:$8 sm:$0xf0]  }
   0xd   :  { %v274_v34 = vsel %vm154_vm0, %v510_v31, %v509_v30  ;;  %v263_v35 = vsel %vm154_vm0, %v507_v33, %v506_v32  ;;  %v515_v36 = vld [vmem:[%s1128_s0 + $0x5] ss:$8 sm:$0xf]   ;;  %v512_v38 = vld [vmem:[%s1128_s0 + $0x4] ss:$8 sm:$0xf]  }
   0xe   :  { %v516_v37 = vld [vmem:[%s1128_s0 + $0x5] ss:$8 sm:$0xf0]   ;;  %v513_v39 = vld [vmem:[%s1128_s0 + $0x4] ss:$8 sm:$0xf0]  }
   0xf   :  { %v296_v40 = vsel %vm154_vm0, %v516_v37, %v515_v36  ;;  %v285_v41 = vsel %vm154_vm0, %v513_v39, %v512_v38  ;;  %v521_v42 = vld [vmem:[%s1128_s0 + $0x7] ss:$8 sm:$0xf]   ;;  %v518_v44 = vld [vmem:[%s1128_s0 + $0x6] ss:$8 sm:$0xf]  }
  0x10   :  { %233 = vrot.lane.b32.xlu1 %v232_v22, %s549_s14  ;;  %222 = vrot.lane.b32.xlu0 %v221_v23, %s549_s14  ;;  %v522_v43 = vld [vmem:[%s1128_s0 + $0x7] ss:$8 sm:$0xf0]   ;;  %v519_v45 = vld [vmem:[%s1128_s0 + $0x6] ss:$8 sm:$0xf0]  }
  0x11   :  { %v318_v46 = vsel %vm154_vm0, %v522_v43, %v521_v42  ;;  %v307_v47 = vsel %vm154_vm0, %v519_v45, %v518_v44  ;;  %v525_v48 = vld [vmem:[%s1128_s0 + $0x1] ss:$8 sm:$0xf]   ;;  %v324_v50 = vld [vmem:[%s1128_s0] ss:$8 sm:$0xf]  }
  0x12   :  { %v526_v49 = vld [vmem:[%s1128_s0 + $0x1] ss:$8 sm:$0xf0]   ;;  %v325_v51 = vld [vmem:[%s1128_s0] ss:$8 sm:$0xf0]  }
  0x13   :  { %v338_v52 = vsel %vm154_vm0, %v526_v49, %v525_v48  ;;  %v531_v53 = vld [vmem:[%s1128_s0 + $0x3] ss:$8 sm:$0xf]   ;;  %v327_v55 = vsel %vm154_vm0, %v325_v51, %v324_v50  ;;  %v705_v56 = vld [vmem:[%s1128_s0 + $0x2] ss:$8 sm:$0xf]  }
  0x14   :  { %253 = vrot.lane.b32.xlu1 %v252_v28, %s550_s26  ;;  %242 = vrot.lane.b32.xlu0 %v241_v29, %s550_s26  ;;  %v532_v54 = vld [vmem:[%s1128_s0 + $0x3] ss:$8 sm:$0xf0]   ;;  %v710_v57 = vld [vmem:[%s1128_s0 + $0x2] ss:$8 sm:$0xf0]  }
  0x15   :  { %v2_v58 = vld [vmem:[%s1128_s0] sm:$0xff]   ;;  %v417_v59 = vld [vmem:[%s1128_s0 + $0x8] sm:$0xff]   ;;  %v426_v60 = vld [vmem:[%s1128_s0 + $0x10] sm:$0xff]   ;;  %s551_s7 = smov 32   ;;  %v360_v0 = vsel %vm154_vm0, %v532_v54, %v531_v53  ;;  %v349_v3 = vsel %vm154_vm0, %v710_v57, %v705_v56 }
  0x16   :  { %4 = vst.msk [vmem:[%s1129_s1] sm:$0x1] %vm3_vm1, %v2_v58   ;;  %410 = vst.msk [vmem:[%s1129_s1 + $0x1f] sm:$0x2] %vm3_vm1, %v2_v58   ;;  %v435_v61 = vld [vmem:[%s1128_s0 + $0x18] sm:$0xff]   ;;  %v444_v62 = vld [vmem:[%s1128_s0 + $0x20] sm:$0xff]  }
  0x17   :  { %411 = vst.msk [vmem:[%s1129_s1 + $0x3e] sm:$0x4] %vm3_vm1, %v2_v58   ;;  %412 = vst.msk [vmem:[%s1129_s1 + $0x5d] sm:$0x8] %vm3_vm1, %v2_v58   ;;  %v453_v63 = vld [vmem:[%s1128_s0 + $0x28] sm:$0xff]   ;;  %v462_v1 = vld [vmem:[%s1128_s0 + $0x30] sm:$0xff]  }
  0x18   :  { %275 = vrot.lane.b32.xlu1 %v274_v34, %s550_s26  ;;  %264 = vrot.lane.b32.xlu0 %v263_v35, %s550_s26  ;;  %413 = vst.msk [vmem:[%s1129_s1 + $0x7c] sm:$0x10] %vm3_vm1, %v2_v58   ;;  %414 = vst.msk [vmem:[%s1129_s1 + $0x9b] sm:$0x20] %vm3_vm1, %v2_v58  }
  0x19   :  { %415 = vst.msk [vmem:[%s1129_s1 + $0xba] sm:$0x40] %vm3_vm1, %v2_v58   ;;  %416 = vst.msk [vmem:[%s1129_s1 + $0xd9] sm:$0x80] %vm3_vm1, %v2_v58   ;;  %v471_v2 = vld [vmem:[%s1128_s0 + $0x38] sm:$0xff]  }
  0x1a   :  { %418 = vst.msk [vmem:[%s1129_s1 + $0x4] sm:$0x1] %vm3_vm1, %v417_v59   ;;  %419 = vst.msk [vmem:[%s1129_s1 + $0x23] sm:$0x2] %vm3_vm1, %v417_v59  }
  0x1b   :  { %420 = vst.msk [vmem:[%s1129_s1 + $0x42] sm:$0x4] %vm3_vm1, %v417_v59   ;;  %421 = vst.msk [vmem:[%s1129_s1 + $0x61] sm:$0x8] %vm3_vm1, %v417_v59  }
  0x1c   :  { %297 = vrot.lane.b32.xlu1 %v296_v40, %s550_s26  ;;  %286 = vrot.lane.b32.xlu0 %v285_v41, %s550_s26  ;;  %422 = vst.msk [vmem:[%s1129_s1 + $0x80] sm:$0x10] %vm3_vm1, %v417_v59   ;;  %423 = vst.msk [vmem:[%s1129_s1 + $0x9f] sm:$0x20] %vm3_vm1, %v417_v59  }
  0x1d   :  { %424 = vst.msk [vmem:[%s1129_s1 + $0xbe] sm:$0x40] %vm3_vm1, %v417_v59   ;;  %425 = vst.msk [vmem:[%s1129_s1 + $0xdd] sm:$0x80] %vm3_vm1, %v417_v59  }
  0x1e   :  { %427 = vst.msk [vmem:[%s1129_s1 + $0x8] sm:$0x1] %vm3_vm1, %v426_v60   ;;  %428 = vst.msk [vmem:[%s1129_s1 + $0x27] sm:$0x2] %vm3_vm1, %v426_v60  }
  0x1f   :  { %429 = vst.msk [vmem:[%s1129_s1 + $0x46] sm:$0x4] %vm3_vm1, %v426_v60   ;;  %430 = vst.msk [vmem:[%s1129_s1 + $0x65] sm:$0x8] %vm3_vm1, %v426_v60  }
  0x20   :  { %319 = vrot.lane.b32.xlu1 %v318_v46, %s550_s26  ;;  %308 = vrot.lane.b32.xlu0 %v307_v47, %s550_s26  ;;  %431 = vst.msk [vmem:[%s1129_s1 + $0x84] sm:$0x10] %vm3_vm1, %v426_v60   ;;  %432 = vst.msk [vmem:[%s1129_s1 + $0xa3] sm:$0x20] %vm3_vm1, %v426_v60  }
  0x21   :  { %433 = vst.msk [vmem:[%s1129_s1 + $0xc2] sm:$0x40] %vm3_vm1, %v426_v60   ;;  %434 = vst.msk [vmem:[%s1129_s1 + $0xe1] sm:$0x80] %vm3_vm1, %v426_v60  }
  0x22   :  { %436 = vst.msk [vmem:[%s1129_s1 + $0xc] sm:$0x1] %vm3_vm1, %v435_v61   ;;  %437 = vst.msk [vmem:[%s1129_s1 + $0x2b] sm:$0x2] %vm3_vm1, %v435_v61  }
  0x23   :  { %438 = vst.msk [vmem:[%s1129_s1 + $0x4a] sm:$0x4] %vm3_vm1, %v435_v61   ;;  %439 = vst.msk [vmem:[%s1129_s1 + $0x69] sm:$0x8] %vm3_vm1, %v435_v61  }
  0x24   :  { %339 = vrot.lane.b32.xlu1 %v338_v52, %s551_s7  ;;  %328 = vrot.lane.b32.xlu0 %v327_v55, %s551_s7  ;;  %440 = vst.msk [vmem:[%s1129_s1 + $0x88] sm:$0x10] %vm3_vm1, %v435_v61   ;;  %441 = vst.msk [vmem:[%s1129_s1 + $0xa7] sm:$0x20] %vm3_vm1, %v435_v61  }
  0x25   :  { %442 = vst.msk [vmem:[%s1129_s1 + $0xc6] sm:$0x40] %vm3_vm1, %v435_v61   ;;  %443 = vst.msk [vmem:[%s1129_s1 + $0xe5] sm:$0x80] %vm3_vm1, %v435_v61  }
  0x26   :  { %445 = vst.msk [vmem:[%s1129_s1 + $0x10] sm:$0x1] %vm3_vm1, %v444_v62   ;;  %446 = vst.msk [vmem:[%s1129_s1 + $0x2f] sm:$0x2] %vm3_vm1, %v444_v62  }
  0x27   :  { %447 = vst.msk [vmem:[%s1129_s1 + $0x4e] sm:$0x4] %vm3_vm1, %v444_v62   ;;  %448 = vst.msk [vmem:[%s1129_s1 + $0x6d] sm:$0x8] %vm3_vm1, %v444_v62  }
  0x28   :  { %449 = vst.msk [vmem:[%s1129_s1 + $0x8c] sm:$0x10] %vm3_vm1, %v444_v62   ;;  %450 = vst.msk [vmem:[%s1129_s1 + $0xab] sm:$0x20] %vm3_vm1, %v444_v62   ;;  %361 = vrot.lane.b32.xlu1 %v360_v0, %s551_s7  ;;  %350 = vrot.lane.b32.xlu0 %v349_v3, %s551_s7 }
  0x29   :  { %451 = vst.msk [vmem:[%s1129_s1 + $0xca] sm:$0x40] %vm3_vm1, %v444_v62   ;;  %452 = vst.msk [vmem:[%s1129_s1 + $0xe9] sm:$0x80] %vm3_vm1, %v444_v62  }
  0x2a   :  { %454 = vst.msk [vmem:[%s1129_s1 + $0x14] sm:$0x1] %vm3_vm1, %v453_v63   ;;  %455 = vst.msk [vmem:[%s1129_s1 + $0x33] sm:$0x2] %vm3_vm1, %v453_v63  }
  0x2b   :  { %456 = vst.msk [vmem:[%s1129_s1 + $0x52] sm:$0x4] %vm3_vm1, %v453_v63   ;;  %457 = vst.msk [vmem:[%s1129_s1 + $0x71] sm:$0x8] %vm3_vm1, %v453_v63  }
  0x2c   :  { %458 = vst.msk [vmem:[%s1129_s1 + $0x90] sm:$0x10] %vm3_vm1, %v453_v63   ;;  %459 = vst.msk [vmem:[%s1129_s1 + $0xaf] sm:$0x20] %vm3_vm1, %v453_v63  }
  0x2d   :  { %460 = vst.msk [vmem:[%s1129_s1 + $0xce] sm:$0x40] %vm3_vm1, %v453_v63   ;;  %461 = vst.msk [vmem:[%s1129_s1 + $0xed] sm:$0x80] %vm3_vm1, %v453_v63  }
  0x2e   :  { %v537_v4 = vld [vmem:[%s1128_s0 + $0x5] ss:$8 sm:$0xf]   ;;  %463 = vst.msk [vmem:[%s1129_s1 + $0x18] sm:$0x1] %vm3_vm1, %v462_v1  }
  0x2f   :  { %v538_v5 = vld [vmem:[%s1128_s0 + $0x5] ss:$8 sm:$0xf0]   ;;  %464 = vst.msk [vmem:[%s1129_s1 + $0x37] sm:$0x2] %vm3_vm1, %v462_v1  }
  0x30   :  { %465 = vst.msk [vmem:[%s1129_s1 + $0x56] sm:$0x4] %vm3_vm1, %v462_v1   ;;  %466 = vst.msk [vmem:[%s1129_s1 + $0x75] sm:$0x8] %vm3_vm1, %v462_v1   ;;  %v382_v8 = vsel %vm154_vm0, %v538_v5, %v537_v4 }
  0x31   :  { %467 = vst.msk [vmem:[%s1129_s1 + $0x94] sm:$0x10] %vm3_vm1, %v462_v1   ;;  %468 = vst.msk [vmem:[%s1129_s1 + $0xb3] sm:$0x20] %vm3_vm1, %v462_v1   ;;  %383 = vrot.lane.b32.xlu1 %v382_v8, %s551_s7 }
  0x32   :  { %469 = vst.msk [vmem:[%s1129_s1 + $0xd2] sm:$0x40] %vm3_vm1, %v462_v1   ;;  %470 = vst.msk [vmem:[%s1129_s1 + $0xf1] sm:$0x80] %vm3_vm1, %v462_v1  }
  0x33   :  { %472 = vst.msk [vmem:[%s1129_s1 + $0x1c] sm:$0x1] %vm3_vm1, %v471_v2   ;;  %473 = vst.msk [vmem:[%s1129_s1 + $0x3b] sm:$0x2] %vm3_vm1, %v471_v2  }
  0x34   :  { %474 = vst.msk [vmem:[%s1129_s1 + $0x5a] sm:$0x4] %vm3_vm1, %v471_v2   ;;  %475 = vst.msk [vmem:[%s1129_s1 + $0x79] sm:$0x8] %vm3_vm1, %v471_v2  }
  0x35   :  { %476 = vst.msk [vmem:[%s1129_s1 + $0x98] sm:$0x10] %vm3_vm1, %v471_v2   ;;  %477 = vst.msk [vmem:[%s1129_s1 + $0xb7] sm:$0x20] %vm3_vm1, %v471_v2  }
  0x36   :  { %478 = vst.msk [vmem:[%s1129_s1 + $0xd6] sm:$0x40] %vm3_vm1, %v471_v2   ;;  %479 = vst.msk [vmem:[%s1129_s1 + $0xf5] sm:$0x80] %vm3_vm1, %v471_v2  }
  0x37   :  { %v534_v6 = vld [vmem:[%s1128_s0 + $0x4] ss:$8 sm:$0xf]   ;;  %v543_v10 = vld [vmem:[%s1128_s0 + $0x7] ss:$8 sm:$0xf]  }
  0x38   :  { %v535_v7 = vld [vmem:[%s1128_s0 + $0x4] ss:$8 sm:$0xf0]   ;;  %v544_v11 = vld [vmem:[%s1128_s0 + $0x7] ss:$8 sm:$0xf0]  }
  0x39   :  { %v371_v9 = vsel %vm154_vm0, %v535_v7, %v534_v6  ;;  %v540_v12 = vld [vmem:[%s1128_s0 + $0x6] ss:$8 sm:$0xf]   ;;  %v404_v14 = vsel %vm154_vm0, %v544_v11, %v543_v10 }
  0x3a   :  { %v541_v13 = vld [vmem:[%s1128_s0 + $0x6] ss:$8 sm:$0xf0]   ;;  %372 = vrot.lane.b32.xlu0 %v371_v9, %s551_s7  ;;  %405 = vrot.lane.b32.xlu1 %v404_v14, %s551_s7 }
  0x3b   :  { %v393_v15 = vsel %vm154_vm0, %v541_v13, %v540_v12 }
  0x3e   :  { %394 = vrot.lane.b32.xlu0 %v393_v15, %s551_s7 }
  0x76   :  { %v179_v16 = vpop.permute.xlu1 %178   ;;  %v157_v17 = vpop.permute.xlu0 %156  }
  0x77   :  { %486 = vst.msk [vmem:[%s1129_s1 + $0x41] ss:$4 sm:$0xff] %vm3_vm1, %v179_v16   ;;  %480 = vst.msk [vmem:[%s1129_s1 + $0x1] ss:$4 sm:$0xff] %vm3_vm1, %v157_v17  }
  0x7a   :  { %v190_v18 = vpop.permute.xlu1 %189   ;;  %v168_v19 = vpop.permute.xlu0 %167  }
  0x7b   :  { %489 = vst.msk [vmem:[%s1129_s1 + $0x61] ss:$4 sm:$0xff] %vm3_vm1, %v190_v18   ;;  %483 = vst.msk [vmem:[%s1129_s1 + $0x21] ss:$4 sm:$0xff] %vm3_vm1, %v168_v19  }
  0x7e   :  { %v212_v20 = vpop.permute.xlu1 %211   ;;  %v201_v21 = vpop.permute.xlu0 %200  }
  0x7f   :  { %495 = vst.msk [vmem:[%s1129_s1 + $0xa1] ss:$4 sm:$0xff] %vm3_vm1, %v212_v20   ;;  %492 = vst.msk [vmem:[%s1129_s1 + $0x81] ss:$4 sm:$0xff] %vm3_vm1, %v201_v21  }
  0x82   :  { %v234_v22 = vpop.permute.xlu1 %233   ;;  %v223_v23 = vpop.permute.xlu0 %222  }
  0x83   :  { %501 = vst.msk [vmem:[%s1129_s1 + $0xe1] ss:$4 sm:$0xff] %vm3_vm1, %v234_v22   ;;  %498 = vst.msk [vmem:[%s1129_s1 + $0xc1] ss:$4 sm:$0xff] %vm3_vm1, %v223_v23  }
  0x86   :  { %v254_v24 = vpop.permute.xlu1 %253   ;;  %v243_v25 = vpop.permute.xlu0 %242  }
  0x87   :  { %505 = vst.msk [vmem:[%s1129_s1 + $0x22] ss:$4 sm:$0xff] %vm3_vm1, %v254_v24   ;;  %502 = vst.msk [vmem:[%s1129_s1 + $0x2] ss:$4 sm:$0xff] %vm3_vm1, %v243_v25  }
  0x8a   :  { %v276_v26 = vpop.permute.xlu1 %275   ;;  %v265_v27 = vpop.permute.xlu0 %264  }
  0x8b   :  { %511 = vst.msk [vmem:[%s1129_s1 + $0x62] ss:$4 sm:$0xff] %vm3_vm1, %v276_v26   ;;  %508 = vst.msk [vmem:[%s1129_s1 + $0x42] ss:$4 sm:$0xff] %vm3_vm1, %v265_v27  }
  0x8e   :  { %v298_v28 = vpop.permute.xlu1 %297   ;;  %v287_v29 = vpop.permute.xlu0 %286  }
  0x8f   :  { %517 = vst.msk [vmem:[%s1129_s1 + $0xa2] ss:$4 sm:$0xff] %vm3_vm1, %v298_v28   ;;  %514 = vst.msk [vmem:[%s1129_s1 + $0x82] ss:$4 sm:$0xff] %vm3_vm1, %v287_v29  }
  0x92   :  { %v320_v30 = vpop.permute.xlu1 %319   ;;  %v309_v31 = vpop.permute.xlu0 %308  }
  0x93   :  { %523 = vst.msk [vmem:[%s1129_s1 + $0xe2] ss:$4 sm:$0xff] %vm3_vm1, %v320_v30   ;;  %520 = vst.msk [vmem:[%s1129_s1 + $0xc2] ss:$4 sm:$0xff] %vm3_vm1, %v309_v31  }
  0x96   :  { %v340_v32 = vpop.permute.xlu1 %339   ;;  %v329_v33 = vpop.permute.xlu0 %328  }
  0x97   :  { %527 = vst.msk [vmem:[%s1129_s1 + $0x23] ss:$4 sm:$0xff] %vm3_vm1, %v340_v32   ;;  %524 = vst.msk [vmem:[%s1129_s1 + $0x3] ss:$4 sm:$0xff] %vm3_vm1, %v329_v33  }
  0x9a   :  { %v362_v34 = vpop.permute.xlu1 %361   ;;  %v351_v35 = vpop.permute.xlu0 %350  }
  0x9b   :  { %533 = vst.msk [vmem:[%s1129_s1 + $0x63] ss:$4 sm:$0xff] %vm3_vm1, %v362_v34   ;;  %530 = vst.msk [vmem:[%s1129_s1 + $0x43] ss:$4 sm:$0xff] %vm3_vm1, %v351_v35  }
  0xa3   :  { %v384_v36 = vpop.permute.xlu1 %383  }
  0xa4   :  { %539 = vst.msk [vmem:[%s1129_s1 + $0xa3] ss:$4 sm:$0xff] %vm3_vm1, %v384_v36  }
  0xac   :  { %v373_v37 = vpop.permute.xlu0 %372   ;;  %v406_v38 = vpop.permute.xlu1 %405  }
  0xad   :  { %536 = vst.msk [vmem:[%s1129_s1 + $0x83] ss:$4 sm:$0xff] %vm3_vm1, %v373_v37   ;;  %545 = vst.msk [vmem:[%s1129_s1 + $0xe3] ss:$4 sm:$0xff] %vm3_vm1, %v406_v38  }
  0xb0   :  { %v395_v39 = vpop.permute.xlu0 %394  }
  0xb1   :  { %542 = vst.msk [vmem:[%s1129_s1 + $0xc3] ss:$4 sm:$0xff] %vm3_vm1, %v395_v39  }

// kernel: model_forward.14
= control target key start
LH: loop header
LB: loop body
LE: loop exit
PB: predicated region body
PF: predicated region fallthrough
CT: control target
= control target key end

     0   :  { %v117_v0 = vmov 0   ;;  %s222_s2 = inlined_call_operand.vmem [shape: f32[2,8,1], index: 2, kind: input, shape index: {}]   ;;  %s223_s1 = inlined_call_operand.vmem [shape: f32[2,8,1], index: 1, kind: input, shape index: {}]   ;;  %s224_s0 = inlined_call_operand.vmem [shape: f32[8,1024], index: 0, kind: input, shape index: {}]   ;;  %s225_s3 = inlined_call_operand.vmem [shape: f32[2,8,1024], index: 3, kind: output, shape index: {}]  }
   0x1   :  { %116 = vset.pattern.permute.xlu1 %v117_v0  ;;  %115 = vset.pattern.permute.xlu0 %v117_v0  ;;  %v50_v1 = vld [vmem:[%s222_s2] sm:$0xff]  ;;  %v51_v3 = vld [vmem:[%s222_s2 + $0x8] sm:$0xff]  ;;  %v16_v7 = vld [vmem:[%s224_s0 + $0x10] sm:$0xff] }
   0x2   :  { %v22_v2 = vld [vmem:[%s223_s1] sm:$0xff]  ;;  %54 = vperm.xlu1 %116, %v50_v1   ;;  %v23_v4 = vld [vmem:[%s223_s1 + $0x8] sm:$0xff]  ;;  %v17_v8 = vld [vmem:[%s224_s0 + $0x18] sm:$0xff] }
   0x3   :  { %26 = vperm.xlu0 %115, %v22_v2   ;;  %v14_v5 = vld [vmem:[%s224_s0] sm:$0xff]  ;;  %v15_v6 = vld [vmem:[%s224_s0 + $0x8] sm:$0xff]  ;;  %v20_v11 = vld [vmem:[%s224_s0 + $0x30] sm:$0xff] }
   0x4   :  { %v18_v9 = vld [vmem:[%s224_s0 + $0x20] sm:$0xff]  ;;  %v19_v10 = vld [vmem:[%s224_s0 + $0x28] sm:$0xff]  ;;  %v21_v12 = vld [vmem:[%s224_s0 + $0x38] sm:$0xff] }
   0x6   :  { %59 = vperm.xlu1 %116, %v51_v3  }
   0x7   :  { %31 = vperm.xlu0 %115, %v23_v4  }
  0x7d   :  { %v55_v13 = vpop.permute.xlu1 %54 }
  0x7e   :  { %v27_v14 = vpop.permute.xlu0 %26 }
  0x7f   :  { %v34_v15 = vmul.f32 %v27_v14, %v14_v5  ;;  %v35_v16 = vmul.f32 %v27_v14, %v15_v6  ;;  %v36_v17 = vmul.f32 %v27_v14, %v16_v7  ;;  %v37_v18 = vmul.f32 %v27_v14, %v17_v8 }
  0x80   :  { %v38_v19 = vmul.f32 %v27_v14, %v18_v9  ;;  %v39_v20 = vmul.f32 %v27_v14, %v19_v10  ;;  %v40_v21 = vmul.f32 %v27_v14, %v20_v11  ;;  %v41_v22 = vmul.f32 %v27_v14, %v21_v12 }
  0x81   :  { %v62_v23 = vadd.f32 %v55_v13, %v34_v15  ;;  %v63_v24 = vadd.f32 %v55_v13, %v35_v16  ;;  %v64_v25 = vadd.f32 %v55_v13, %v36_v17  ;;  %v65_v26 = vadd.f32 %v55_v13, %v37_v18  ;;  %v60_v36 = vpop.permute.xlu1 %59 }
  0x82   :  { %v32_v27 = vpop.permute.xlu0 %31  ;;  %v66_v28 = vadd.f32 %v55_v13, %v38_v19  ;;  %v67_v29 = vadd.f32 %v55_v13, %v39_v20  ;;  %v68_v30 = vadd.f32 %v55_v13, %v40_v21  ;;  %v69_v31 = vadd.f32 %v55_v13, %v41_v22 }
  0x83   :  { %v42_v32 = vmul.f32 %v32_v27, %v14_v5  ;;  %v43_v33 = vmul.f32 %v32_v27, %v15_v6  ;;  %v44_v34 = vmul.f32 %v32_v27, %v16_v7  ;;  %v45_v35 = vmul.f32 %v32_v27, %v17_v8 }
  0x84   :  { %v46_v37 = vmul.f32 %v32_v27, %v18_v9  ;;  %v47_v38 = vmul.f32 %v32_v27, %v19_v10  ;;  %v48_v39 = vmul.f32 %v32_v27, %v20_v11  ;;  %v49_v40 = vmul.f32 %v32_v27, %v21_v12 }
  0x85   :  { %v70_v41 = vadd.f32 %v60_v36, %v42_v32  ;;  %v71_v42 = vadd.f32 %v60_v36, %v43_v33  ;;  %v72_v43 = vadd.f32 %v60_v36, %v44_v34  ;;  %v73_v44 = vadd.f32 %v60_v36, %v45_v35 }
  0x86   :  { %v74_v45 = vadd.f32 %v60_v36, %v46_v37  ;;  %v75_v46 = vadd.f32 %v60_v36, %v47_v38  ;;  %v76_v47 = vadd.f32 %v60_v36, %v48_v39  ;;  %v77_v48 = vadd.f32 %v60_v36, %v49_v40 }
  0x87   :  { %v78_v49 = vmax.f32 %v62_v23, 0.0  ;;  %v79_v50 = vmax.f32 %v63_v24, 0.0  ;;  %v80_v51 = vmax.f32 %v64_v25, 0.0  ;;  %v81_v52 = vmax.f32 %v65_v26, 0.0 }
  0x88   :  { %v82_v53 = vmax.f32 %v66_v28, 0.0  ;;  %v83_v54 = vmax.f32 %v67_v29, 0.0  ;;  %v84_v55 = vmax.f32 %v68_v30, 0.0  ;;  %v85_v56 = vmax.f32 %v69_v31, 0.0 }
  0x89   :  { %v86_v57 = vmax.f32 %v70_v41, 0.0  ;;  %v87_v58 = vmax.f32 %v71_v42, 0.0  ;;  %v88_v59 = vmax.f32 %v72_v43, 0.0  ;;  %v89_v60 = vmax.f32 %v73_v44, 0.0  ;;  %94 = vst [vmem:[%s225_s3] sm:$0xff] %v78_v49  ;;  %95 = vst [vmem:[%s225_s3 + $0x8] sm:$0xff] %v79_v50 }
  0x8a   :  { %96 = vst [vmem:[%s225_s3 + $0x10] sm:$0xff] %v80_v51  ;;  %97 = vst [vmem:[%s225_s3 + $0x18] sm:$0xff] %v81_v52  ;;  %v90_v61 = vmax.f32 %v74_v45, 0.0  ;;  %v91_v62 = vmax.f32 %v75_v46, 0.0  ;;  %v92_v63 = vmax.f32 %v76_v47, 0.0  ;;  %v93_v0 = vmax.f32 %v77_v48, 0.0 }
  0x8b   :  { %98 = vst [vmem:[%s225_s3 + $0x20] sm:$0xff] %v82_v53  ;;  %99 = vst [vmem:[%s225_s3 + $0x28] sm:$0xff] %v83_v54 }
  0x8c   :  { %100 = vst [vmem:[%s225_s3 + $0x30] sm:$0xff] %v84_v55  ;;  %101 = vst [vmem:[%s225_s3 + $0x38] sm:$0xff] %v85_v56 }
  0x8d   :  { %102 = vst [vmem:[%s225_s3 + $0x40] sm:$0xff] %v86_v57  ;;  %103 = vst [vmem:[%s225_s3 + $0x48] sm:$0xff] %v87_v58 }
  0x8e   :  { %104 = vst [vmem:[%s225_s3 + $0x50] sm:$0xff] %v88_v59  ;;  %105 = vst [vmem:[%s225_s3 + $0x58] sm:$0xff] %v89_v60 }
  0x8f   :  { %106 = vst [vmem:[%s225_s3 + $0x60] sm:$0xff] %v90_v61  ;;  %107 = vst [vmem:[%s225_s3 + $0x68] sm:$0xff] %v91_v62 }
  0x90   :  { %108 = vst [vmem:[%s225_s3 + $0x70] sm:$0xff] %v92_v63  ;;  %109 = vst [vmem:[%s225_s3 + $0x78] sm:$0xff] %v93_v0 }

// kernel: model_forward.15
= control target key start
LH: loop header
LB: loop body
LE: loop exit
PB: predicated region body
PF: predicated region fallthrough
CT: control target
= control target key end

     0   :  { %v228_v3 = vmov 0   ;;  %s467_s0 = inlined_call_operand.vmem [shape: f32[128,512], index: 0, kind: input, shape index: {}]   ;;  %s468_s2 = inlined_call_operand.vmem [shape: f32[8,1], index: 2, kind: input, shape index: {}]   ;;  %s469_s3 = inlined_call_operand.vmem [shape: f32[8,1], index: 3, kind: input, shape index: {}]   ;;  %s470_s1 = inlined_call_operand.vmem [shape: f32[8,128], index: 1, kind: input, shape index: {}]   ;;  %s471_s4 = inlined_call_operand.vmem [shape: f32[8,512], index: 4, kind: output, shape index: {}]  }
   0x1   :  { %v77_v0 = vld [vmem:[%s467_s0 + $0x1c8] sm:$0xff]  ;;  %v79_v2 = vld [vmem:[%s467_s0 + $0x1d8] sm:$0xff]  ;;  %148 = vmatprep.mubr.bf16.mxu0 %v228_v3  ;;  %189 = vmatprep.mubr.bf16.mxu1 %v228_v3  ;;  %v76_v6 = vld [vmem:[%s467_s0 + $0x1c0] sm:$0xff] }
   0x2   :  { %v81_v1 = vld [vmem:[%s467_s0 + $0x1e8] sm:$0xff]  ;;  %v83_v5 = vld [vmem:[%s467_s0 + $0x1f8] sm:$0xff]  ;;  %v80_v7 = vld [vmem:[%s467_s0 + $0x1e0] sm:$0xff]  ;;  %227 = vset.pattern.permute.xlu0 %v228_v3 }
   0x3   :  { %v113_v4 = vpack.c.bf16 %v81_v1, %v77_v0  ;;  %v115_v8 = vpack.c.bf16 %v83_v5, %v79_v2  ;;  %v112_v9 = vpack.c.bf16 %v80_v7, %v76_v6  ;;  %v78_v10 = vld [vmem:[%s467_s0 + $0x1d0] sm:$0xff]  ;;  %v69_v12 = vld [vmem:[%s467_s0 + $0x188] sm:$0xff]  ;;  %v71_v15 = vld [vmem:[%s467_s0 + $0x198] sm:$0xff] }
   0x4   :  { %v82_v11 = vld [vmem:[%s467_s0 + $0x1f0] sm:$0xff]  ;;  %v73_v14 = vld [vmem:[%s467_s0 + $0x1a8] sm:$0xff]  ;;  %v75_v16 = vld [vmem:[%s467_s0 + $0x1b8] sm:$0xff] }
   0x5   :  { %116 = vmatprep.subr.bf16.mxu0 %v113_v4  ;;  %v114_v13 = vpack.c.bf16 %v82_v11, %v78_v10  ;;  %157 = vmatprep.subr.bf16.mxu1 %v115_v8  ;;  %v109_v17 = vpack.c.bf16 %v73_v14, %v69_v12  ;;  %v111_v18 = vpack.c.bf16 %v75_v16, %v71_v15  ;;  %v68_v19 = vld [vmem:[%s467_s0 + $0x180] sm:$0xff]  ;;  %v70_v21 = vld [vmem:[%s467_s0 + $0x190] sm:$0xff]  ;;  %v61_v24 = vld [vmem:[%s467_s0 + $0x148] sm:$0xff] }
   0x6   :  { %117 = vmatpush1.bf16.msra.mxu0 %v112_v9  ;;  %v72_v20 = vld [vmem:[%s467_s0 + $0x1a0] sm:$0xff]  ;;  %v74_v23 = vld [vmem:[%s467_s0 + $0x1b0] sm:$0xff]  ;;  %v65_v25 = vld [vmem:[%s467_s0 + $0x168] sm:$0xff] }
   0x7   :  { %158 = vmatpush1.bf16.msra.mxu1 %v114_v13  ;;  %v108_v22 = vpack.c.bf16 %v72_v20, %v68_v19  ;;  %118 = vmatprep.subr.bf16.mxu0 %v109_v17  ;;  %v110_v26 = vpack.c.bf16 %v74_v23, %v70_v21  ;;  %v105_v27 = vpack.c.bf16 %v65_v25, %v61_v24  ;;  %v63_v28 = vld [vmem:[%s467_s0 + $0x158] sm:$0xff]  ;;  %v60_v30 = vld [vmem:[%s467_s0 + $0x140] sm:$0xff]  ;;  %v62_v33 = vld [vmem:[%s467_s0 + $0x150] sm:$0xff] }
   0x8   :  { %159 = vmatprep.subr.bf16.mxu1 %v111_v18  ;;  %v67_v29 = vld [vmem:[%s467_s0 + $0x178] sm:$0xff]  ;;  %v64_v32 = vld [vmem:[%s467_s0 + $0x160] sm:$0xff]  ;;  %v66_v34 = vld [vmem:[%s467_s0 + $0x170] sm:$0xff] }
   0x9   :  { %v107_v31 = vpack.c.bf16 %v67_v29, %v63_v28  ;;  %v104_v35 = vpack.c.bf16 %v64_v32, %v60_v30  ;;  %v53_v36 = vld [vmem:[%s467_s0 + $0x108] sm:$0xff]  ;;  %v55_v38 = vld [vmem:[%s467_s0 + $0x118] sm:$0xff]  ;;  %v106_v39 = vpack.c.bf16 %v66_v34, %v62_v33  ;;  %v52_v42 = vld [vmem:[%s467_s0 + $0x100] sm:$0xff] }
   0xa   :  { %119 = vmatpush1.bf16.msra.mxu0 %v108_v22  ;;  %v57_v37 = vld [vmem:[%s467_s0 + $0x128] sm:$0xff]  ;;  %v59_v41 = vld [vmem:[%s467_s0 + $0x138] sm:$0xff]  ;;  %v56_v43 = vld [vmem:[%s467_s0 + $0x120] sm:$0xff] }
   0xb   :  { %160 = vmatpush1.bf16.msra.mxu1 %v110_v26  ;;  %120 = vmatprep.subr.bf16.mxu0 %v105_v27  ;;  %v101_v40 = vpack.c.bf16 %v57_v37, %v53_v36  ;;  %v103_v44 = vpack.c.bf16 %v59_v41, %v55_v38  ;;  %v54_v45 = vld [vmem:[%s467_s0 + $0x110] sm:$0xff]  ;;  %v45_v47 = vld [vmem:[%s467_s0 + $0xc8] sm:$0xff]  ;;  %v47_v49 = vld [vmem:[%s467_s0 + $0xd8] sm:$0xff]  ;;  %v100_v51 = vpack.c.bf16 %v56_v43, %v52_v42 }
   0xc   :  { %161 = vmatprep.subr.bf16.mxu1 %v107_v31  ;;  %v58_v46 = vld [vmem:[%s467_s0 + $0x130] sm:$0xff]  ;;  %v49_v48 = vld [vmem:[%s467_s0 + $0xe8] sm:$0xff]  ;;  %v51_v50 = vld [vmem:[%s467_s0 + $0xf8] sm:$0xff] }
   0xd   :  { %v102_v52 = vpack.c.bf16 %v58_v46, %v54_v45  ;;  %v97_v53 = vpack.c.bf16 %v49_v48, %v45_v47  ;;  %v44_v54 = vld [vmem:[%s467_s0 + $0xc0] sm:$0xff]  ;;  %v46_v56 = vld [vmem:[%s467_s0 + $0xd0] sm:$0xff]  ;;  %v99_v57 = vpack.c.bf16 %v51_v50, %v47_v49  ;;  %v37_v59 = vld [vmem:[%s467_s0 + $0x88] sm:$0xff] }
   0xe   :  { %121 = vmatpush1.bf16.msra.mxu0 %v104_v35  ;;  %v48_v55 = vld [vmem:[%s467_s0 + $0xe0] sm:$0xff]  ;;  %v50_v58 = vld [vmem:[%s467_s0 + $0xf0] sm:$0xff]  ;;  %v41_v60 = vld [vmem:[%s467_s0 + $0xa8] sm:$0xff] }
   0xf   :  { %162 = vmatpush1.bf16.msra.mxu1 %v106_v39  ;;  %122 = vmatprep.subr.bf16.mxu0 %v101_v40  ;;  %v39_v61 = vld [vmem:[%s467_s0 + $0x98] sm:$0xff]  ;;  %v96_v63 = vpack.c.bf16 %v48_v55, %v44_v54  ;;  %v98_v0 = vpack.c.bf16 %v50_v58, %v46_v56  ;;  %v93_v1 = vpack.c.bf16 %v41_v60, %v37_v59  ;;  %v36_v2 = vld [vmem:[%s467_s0 + $0x80] sm:$0xff]  ;;  %v38_v4 = vld [vmem:[%s467_s0 + $0x90] sm:$0xff] }
  0x10   :  { %163 = vmatprep.subr.bf16.mxu1 %v103_v44  ;;  %v43_v62 = vld [vmem:[%s467_s0 + $0xb8] sm:$0xff]  ;;  %v40_v3 = vld [vmem:[%s467_s0 + $0xa0] sm:$0xff]  ;;  %v42_v6 = vld [vmem:[%s467_s0 + $0xb0] sm:$0xff] }
  0x11   :  { %v95_v5 = vpack.c.bf16 %v43_v62, %v39_v61  ;;  %v29_v7 = vld [vmem:[%s467_s0 + $0x48] sm:$0xff]  ;;  %v31_v9 = vld [vmem:[%s467_s0 + $0x58] sm:$0xff]  ;;  %v92_v11 = vpack.c.bf16 %v40_v3, %v36_v2  ;;  %v28_v12 = vld [vmem:[%s467_s0 + $0x40] sm:$0xff]  ;;  %v94_v13 = vpack.c.bf16 %v42_v6, %v38_v4 }
  0x12   :  { %123 = vmatpush1.bf16.msra.mxu0 %v100_v51  ;;  %v33_v8 = vld [vmem:[%s467_s0 + $0x68] sm:$0xff]  ;;  %v35_v10 = vld [vmem:[%s467_s0 + $0x78] sm:$0xff]  ;;  %v32_v15 = vld [vmem:[%s467_s0 + $0x60] sm:$0xff] }
  0x13   :  { %164 = vmatpush1.bf16.msra.mxu1 %v102_v52  ;;  %124 = vmatprep.subr.bf16.mxu0 %v97_v53  ;;  %v89_v14 = vpack.c.bf16 %v33_v8, %v29_v7  ;;  %v30_v16 = vld [vmem:[%s467_s0 + $0x50] sm:$0xff]  ;;  %v198_v17 = vld [vmem:[%s468_s2] sm:$0xff]  ;;  %v91_v18 = vpack.c.bf16 %v35_v10, %v31_v9  ;;  %v21_v20 = vld [vmem:[%s467_s0 + $0x8] sm:$0xff]  ;;  %v88_v25 = vpack.c.bf16 %v32_v15, %v28_v12 }
  0x14   :  { %165 = vmatprep.subr.bf16.mxu1 %v99_v57  ;;  %v34_v19 = vld [vmem:[%s467_s0 + $0x70] sm:$0xff]  ;;  %v25_v21 = vld [vmem:[%s467_s0 + $0x28] sm:$0xff]  ;;  %201 = vperm.xlu0 %227, %v198_v17   ;;  %v23_v22 = vld [vmem:[%s467_s0 + $0x18] sm:$0xff] }
  0x15   :  { %v27_v23 = vld [vmem:[%s467_s0 + $0x38] sm:$0xff]  ;;  %v208_v24 = vld [vmem:[%s469_s3] sm:$0xff]  ;;  %v90_v26 = vpack.c.bf16 %v34_v19, %v30_v16  ;;  %v85_v27 = vpack.c.bf16 %v25_v21, %v21_v20  ;;  %v22_v31 = vld [vmem:[%s467_s0 + $0x10] sm:$0xff] }
  0x16   :  { %125 = vmatpush1.bf16.msra.mxu0 %v96_v63  ;;  %v20_v28 = vld [vmem:[%s467_s0] sm:$0xff]  ;;  %v87_v30 = vpack.c.bf16 %v27_v23, %v23_v22  ;;  %v26_v32 = vld [vmem:[%s467_s0 + $0x30] sm:$0xff] }
  0x17   :  { %166 = vmatpush1.bf16.msra.mxu1 %v98_v0  ;;  %126 = vmatprep.subr.bf16.mxu0 %v93_v1  ;;  %v24_v29 = vld [vmem:[%s467_s0 + $0x20] sm:$0xff]  ;;  %v86_v35 = vpack.c.bf16 %v26_v32, %v22_v31 }
  0x18   :  { %167 = vmatprep.subr.bf16.mxu1 %v95_v5  ;;  %211 = vperm.xlu0 %227, %v208_v24   ;;  %v84_v33 = vpack.c.bf16 %v24_v29, %v20_v28  ;;  %v18_v34 = vld [vmem:[%s470_s1] sm:$0xff] }
  0x19   :  { %v19_v36 = vpack.c.bf16 %v18_v34, %v18_v34 }
  0x1a   :  { %127 = vmatpush1.bf16.msra.mxu0 %v92_v11 }
  0x1b   :  { %168 = vmatpush1.bf16.msra.mxu1 %v94_v13  ;;  %128 = vmatprep.subr.bf16.mxu0 %v89_v14 }
  0x1c   :  { %169 = vmatprep.subr.bf16.mxu1 %v91_v18 }
  0x1e   :  { %129 = vmatpush1.bf16.msra.mxu0 %v88_v25 }
  0x1f   :  { %170 = vmatpush1.bf16.msra.mxu1 %v90_v26  ;;  %130 = vmatprep.subr.bf16.mxu0 %v85_v27 }
  0x20   :  { %171 = vmatprep.subr.bf16.mxu1 %v87_v30 }
  0x22   :  { %131 = vmatpush1.bf16.msra.mxu0 %v84_v33 }
  0x23   :  { %172 = vmatpush1.bf16.msra.mxu1 %v86_v35 }
  0x25   :  { %149 = vmatmul.mubr.bf16.vlgmr.msra.gmra.mxu0 %v19_v36 }
  0x26   :  { %190 = vmatmul.mubr.bf16.vlgmr.msra.gmra.mxu1 %v19_v36 }
  0x8f   :  { %v202_v37 = vpop.permute.xlu0 %201 }
  0x93   :  { %v212_v41 = vpop.permute.xlu0 %211 }
  0xe5   :  { %v150_v38 = vpop.f32.mrf.mxu0 }
  0xe6   :  { %v204_v39 = vmul.f32 %v202_v37, %v150_v38  ;;  %v191_v40 = vpop.f32.mrf.mxu1 }
  0xe7   :  { %v206_v42 = vmul.f32 %v202_v37, %v191_v40  ;;  %v152_v43 = vpop.f32.mrf.mxu0 }
  0xe8   :  { %v214_v44 = vadd.f32 %v212_v41, %v204_v39  ;;  %v205_v45 = vmul.f32 %v202_v37, %v152_v43  ;;  %v193_v46 = vpop.f32.mrf.mxu1 }
  0xe9   :  { %v216_v47 = vadd.f32 %v212_v41, %v206_v42  ;;  %v207_v48 = vmul.f32 %v202_v37, %v193_v46  ;;  %v154_v49 = vpop.f32.mrf.mxu0 }
  0xea   :  { %218 = vst [vmem:[%s471_s4] sm:$0xff] %v214_v44  ;;  %v215_v50 = vadd.f32 %v212_v41, %v205_v45  ;;  %v195_v51 = vpop.f32.mrf.mxu1 }
  0xeb   :  { %220 = vst [vmem:[%s471_s4 + $0x10] sm:$0xff] %v216_v47  ;;  %v217_v52 = vadd.f32 %v212_v41, %v207_v48  ;;  %v155_v53 = vpop.f32.mrf.mxu0 }
  0xec   :  { %219 = vst [vmem:[%s471_s4 + $0x8] sm:$0xff] %v215_v50  ;;  %v196_v54 = vpop.f32.mrf.mxu1 }
  0xed   :  { %221 = vst [vmem:[%s471_s4 + $0x18] sm:$0xff] %v217_v52 }

// kernel: model_forward.16
= control target key start
LH: loop header
LB: loop body
LE: loop exit
PB: predicated region body
PF: predicated region fallthrough
CT: control target
= control target key end

     0   :  { %v186_v3 = vmov 0   ;;  %vm68_vm0 = vcmask 523264   ;;  %s329_s0 = inlined_call_operand.vmem [shape: f32[64,512], index: 0, kind: input, shape index: {}]   ;;  %s330_s2 = inlined_call_operand.vmem [shape: f32[8,1], index: 2, kind: input, shape index: {}]   ;;  %s331_s1 = inlined_call_operand.vmem [shape: f32[8,64], index: 1, kind: input, shape index: {}]   ;;  %s332_s3 = inlined_call_operand.vmem [shape: f32[8,1], index: 3, kind: input, shape index: {}]   ;;  %s333_s4 = inlined_call_operand.vmem [shape: f32[8,512], index: 4, kind: output, shape index: {}]  }
   0x1   :  { %v45_v0 = vld [vmem:[%s329_s0 + $0xc8] sm:$0xff]  ;;  %v47_v2 = vld [vmem:[%s329_s0 + $0xd8] sm:$0xff]  ;;  %104 = vmatprep.mubr.bf16.mxu0 %v186_v3  ;;  %145 = vmatprep.mubr.bf16.mxu1 %v186_v3  ;;  %v44_v6 = vld [vmem:[%s329_s0 + $0xc0] sm:$0xff] }
   0x2   :  { %v49_v1 = vld [vmem:[%s329_s0 + $0xe8] sm:$0xff]  ;;  %v51_v5 = vld [vmem:[%s329_s0 + $0xf8] sm:$0xff]  ;;  %v48_v7 = vld [vmem:[%s329_s0 + $0xe0] sm:$0xff]  ;;  %185 = vset.pattern.permute.xlu0 %v186_v3 }
   0x3   :  { %v65_v4 = vpack.c.bf16 %v49_v1, %v45_v0  ;;  %v67_v8 = vpack.c.bf16 %v51_v5, %v47_v2  ;;  %v64_v9 = vpack.c.bf16 %v48_v7, %v44_v6  ;;  %v46_v10 = vld [vmem:[%s329_s0 + $0xd0] sm:$0xff]  ;;  %v37_v12 = vld [vmem:[%s329_s0 + $0x88] sm:$0xff]  ;;  %v39_v15 = vld [vmem:[%s329_s0 + $0x98] sm:$0xff] }
   0x4   :  { %v50_v11 = vld [vmem:[%s329_s0 + $0xf0] sm:$0xff]  ;;  %v41_v14 = vld [vmem:[%s329_s0 + $0xa8] sm:$0xff]  ;;  %v43_v16 = vld [vmem:[%s329_s0 + $0xb8] sm:$0xff] }
   0x5   :  { %80 = vmatprep.subr.bf16.mxu0 %v65_v4  ;;  %v66_v13 = vpack.c.bf16 %v50_v11, %v46_v10  ;;  %121 = vmatprep.subr.bf16.mxu1 %v67_v8  ;;  %v61_v17 = vpack.c.bf16 %v41_v14, %v37_v12  ;;  %v63_v18 = vpack.c.bf16 %v43_v16, %v39_v15  ;;  %v36_v19 = vld [vmem:[%s329_s0 + $0x80] sm:$0xff]  ;;  %v38_v21 = vld [vmem:[%s329_s0 + $0x90] sm:$0xff]  ;;  %v29_v24 = vld [vmem:[%s329_s0 + $0x48] sm:$0xff] }
   0x6   :  { %81 = vmatpush1.bf16.msra.mxu0 %v64_v9  ;;  %v40_v20 = vld [vmem:[%s329_s0 + $0xa0] sm:$0xff]  ;;  %v42_v23 = vld [vmem:[%s329_s0 + $0xb0] sm:$0xff]  ;;  %v33_v25 = vld [vmem:[%s329_s0 + $0x68] sm:$0xff] }
   0x7   :  { %122 = vmatpush1.bf16.msra.mxu1 %v66_v13  ;;  %v60_v22 = vpack.c.bf16 %v40_v20, %v36_v19  ;;  %82 = vmatprep.subr.bf16.mxu0 %v61_v17  ;;  %v62_v26 = vpack.c.bf16 %v42_v23, %v38_v21  ;;  %v57_v27 = vpack.c.bf16 %v33_v25, %v29_v24  ;;  %v31_v28 = vld [vmem:[%s329_s0 + $0x58] sm:$0xff]  ;;  %v28_v30 = vld [vmem:[%s329_s0 + $0x40] sm:$0xff]  ;;  %v30_v33 = vld [vmem:[%s329_s0 + $0x50] sm:$0xff] }
   0x8   :  { %123 = vmatprep.subr.bf16.mxu1 %v63_v18  ;;  %v35_v29 = vld [vmem:[%s329_s0 + $0x78] sm:$0xff]  ;;  %v32_v32 = vld [vmem:[%s329_s0 + $0x60] sm:$0xff]  ;;  %v34_v34 = vld [vmem:[%s329_s0 + $0x70] sm:$0xff] }
   0x9   :  { %v59_v31 = vpack.c.bf16 %v35_v29, %v31_v28  ;;  %v56_v35 = vpack.c.bf16 %v32_v32, %v28_v30  ;;  %v21_v36 = vld [vmem:[%s329_s0 + $0x8] sm:$0xff]  ;;  %v23_v38 = vld [vmem:[%s329_s0 + $0x18] sm:$0xff]  ;;  %v58_v39 = vpack.c.bf16 %v34_v34, %v30_v33  ;;  %v20_v42 = vld [vmem:[%s329_s0] sm:$0xff] }
   0xa   :  { %83 = vmatpush1.bf16.msra.mxu0 %v60_v22  ;;  %v25_v37 = vld [vmem:[%s329_s0 + $0x28] sm:$0xff]  ;;  %v27_v41 = vld [vmem:[%s329_s0 + $0x38] sm:$0xff]  ;;  %v24_v43 = vld [vmem:[%s329_s0 + $0x20] sm:$0xff] }
   0xb   :  { %124 = vmatpush1.bf16.msra.mxu1 %v62_v26  ;;  %84 = vmatprep.subr.bf16.mxu0 %v57_v27  ;;  %v53_v40 = vpack.c.bf16 %v25_v37, %v21_v36  ;;  %v55_v44 = vpack.c.bf16 %v27_v41, %v23_v38  ;;  %v22_v45 = vld [vmem:[%s329_s0 + $0x10] sm:$0xff]  ;;  %v154_v47 = vld [vmem:[%s330_s2] sm:$0xff]  ;;  %v52_v48 = vpack.c.bf16 %v24_v43, %v20_v42 }
   0xc   :  { %125 = vmatprep.subr.bf16.mxu1 %v59_v31  ;;  %v26_v46 = vld [vmem:[%s329_s0 + $0x30] sm:$0xff]  ;;  %v18_v49 = vld [vmem:[%s331_s1] sm:$0xff]  ;;  %157 = vperm.xlu0 %185, %v154_v47  }
   0xd   :  { %v54_v50 = vpack.c.bf16 %v26_v46, %v22_v45  ;;  %v164_v51 = vld [vmem:[%s332_s3] sm:$0xff]  ;;  %v19_v52 = vpack.c.bf16 %v18_v49, %v18_v49 }
   0xe   :  { %85 = vmatpush1.bf16.msra.mxu0 %v56_v35 }
   0xf   :  { %126 = vmatpush1.bf16.msra.mxu1 %v58_v39  ;;  %86 = vmatprep.subr.bf16.mxu0 %v53_v40 }
  0x10   :  { %127 = vmatprep.subr.bf16.mxu1 %v55_v44  ;;  %167 = vperm.xlu0 %185, %v164_v51  }
  0x12   :  { %87 = vmatpush1.bf16.msra.mxu0 %v52_v48 }
  0x13   :  { %128 = vmatpush1.bf16.msra.mxu1 %v54_v50 }
  0x15   :  { %182 = vmatmul.mubr.msk.bf16.vlgmr.msra.gmra.mxu0 %vm68_vm0, %v19_v52 }
  0x16   :  { %183 = vmatmul.mubr.msk.bf16.vlgmr.msra.gmra.mxu1 %vm68_vm0, %v19_v52 }
  0x87   :  { %v158_v53 = vpop.permute.xlu0 %157 }
  0x8b   :  { %v168_v57 = vpop.permute.xlu0 %167 }
  0xd5   :  { %v106_v54 = vpop.f32.mrf.mxu0 }
  0xd6   :  { %v160_v55 = vmul.f32 %v158_v53, %v106_v54  ;;  %v147_v56 = vpop.f32.mrf.mxu1 }
  0xd7   :  { %v162_v58 = vmul.f32 %v158_v53, %v147_v56  ;;  %v108_v59 = vpop.f32.mrf.mxu0 }
  0xd8   :  { %v170_v60 = vadd.f32 %v168_v57, %v160_v55  ;;  %v161_v61 = vmul.f32 %v158_v53, %v108_v59  ;;  %v149_v62 = vpop.f32.mrf.mxu1 }
  0xd9   :  { %v172_v63 = vadd.f32 %v168_v57, %v162_v58  ;;  %v163_v0 = vmul.f32 %v158_v53, %v149_v62  ;;  %v110_v1 = vpop.f32.mrf.mxu0 }
  0xda   :  { %174 = vst [vmem:[%s333_s4] sm:$0xff] %v170_v60  ;;  %v171_v2 = vadd.f32 %v168_v57, %v161_v61  ;;  %v151_v3 = vpop.f32.mrf.mxu1 }
  0xdb   :  { %176 = vst [vmem:[%s333_s4 + $0x10] sm:$0xff] %v172_v63  ;;  %v173_v4 = vadd.f32 %v168_v57, %v163_v0  ;;  %v111_v5 = vpop.f32.mrf.mxu0 }
  0xdc   :  { %175 = vst [vmem:[%s333_s4 + $0x8] sm:$0xff] %v171_v2  ;;  %v152_v6 = vpop.f32.mrf.mxu1 }
  0xdd   :  { %177 = vst [vmem:[%s333_s4 + $0x18] sm:$0xff] %v173_v4 }

// kernel: model_forward.17
= control target key start
LH: loop header
LB: loop body
LE: loop exit
PB: predicated region body
PF: predicated region fallthrough
CT: control target
= control target key end

     0   :  { %v287_v3 = vmov 0   ;;  %vm132_vm0 = vcmask 130048   ;;  %s579_s0 = inlined_call_operand.vmem [shape: f32[144,512], index: 0, kind: input, shape index: {}]   ;;  %s580_s1 = inlined_call_operand.vmem [shape: f32[16,144], index: 1, kind: input, shape index: {}]   ;;  %s581_s2 = inlined_call_operand.vmem [shape: f32[16,1], index: 2, kind: input, shape index: {}]   ;;  %s582_s3 = inlined_call_operand.vmem [shape: f32[16,1], index: 3, kind: input, shape index: {}]   ;;  %s583_s4 = inlined_call_operand.vmem [shape: f32[16,512], index: 4, kind: output, shape index: {}]  }
   0x1   :  { %v81_v0 = vld [vmem:[%s579_s0 + $0x1c8] sm:$0xff]  ;;  %v83_v2 = vld [vmem:[%s579_s0 + $0x1d8] sm:$0xff]  ;;  %285 = vset.pattern.permute.xlu0 %v287_v3  ;;  %286 = vset.pattern.permute.xlu1 %v287_v3  ;;  %v80_v6 = vld [vmem:[%s579_s0 + $0x1c0] sm:$0xff] }
   0x2   :  { %v85_v1 = vld [vmem:[%s579_s0 + $0x1e8] sm:$0xff]  ;;  %v87_v5 = vld [vmem:[%s579_s0 + $0x1f8] sm:$0xff]  ;;  %v84_v7 = vld [vmem:[%s579_s0 + $0x1e0] sm:$0xff] }
   0x3   :  { %v125_v4 = vpack.c.bf16 %v85_v1, %v81_v0  ;;  %v127_v8 = vpack.c.bf16 %v87_v5, %v83_v2  ;;  %v124_v9 = vpack.c.bf16 %v84_v7, %v80_v6  ;;  %v82_v10 = vld [vmem:[%s579_s0 + $0x1d0] sm:$0xff]  ;;  %v73_v12 = vld [vmem:[%s579_s0 + $0x188] sm:$0xff]  ;;  %v75_v15 = vld [vmem:[%s579_s0 + $0x198] sm:$0xff] }
   0x4   :  { %v86_v11 = vld [vmem:[%s579_s0 + $0x1f0] sm:$0xff]  ;;  %v77_v14 = vld [vmem:[%s579_s0 + $0x1a8] sm:$0xff]  ;;  %v79_v16 = vld [vmem:[%s579_s0 + $0x1b8] sm:$0xff] }
   0x5   :  { %136 = vmatprep.subr.bf16.mxu0 %v125_v4  ;;  %v126_v13 = vpack.c.bf16 %v86_v11, %v82_v10  ;;  %179 = vmatprep.subr.bf16.mxu1 %v127_v8  ;;  %v121_v17 = vpack.c.bf16 %v77_v14, %v73_v12  ;;  %v123_v18 = vpack.c.bf16 %v79_v16, %v75_v15  ;;  %v72_v19 = vld [vmem:[%s579_s0 + $0x180] sm:$0xff]  ;;  %v74_v21 = vld [vmem:[%s579_s0 + $0x190] sm:$0xff]  ;;  %v65_v24 = vld [vmem:[%s579_s0 + $0x148] sm:$0xff] }
   0x6   :  { %137 = vmatpush1.bf16.msra.mxu0 %v124_v9  ;;  %v76_v20 = vld [vmem:[%s579_s0 + $0x1a0] sm:$0xff]  ;;  %v78_v23 = vld [vmem:[%s579_s0 + $0x1b0] sm:$0xff]  ;;  %v69_v25 = vld [vmem:[%s579_s0 + $0x168] sm:$0xff] }
   0x7   :  { %180 = vmatpush1.bf16.msra.mxu1 %v126_v13  ;;  %v120_v22 = vpack.c.bf16 %v76_v20, %v72_v19  ;;  %138 = vmatprep.subr.bf16.mxu0 %v121_v17  ;;  %v122_v26 = vpack.c.bf16 %v78_v23, %v74_v21  ;;  %v117_v27 = vpack.c.bf16 %v69_v25, %v65_v24  ;;  %v67_v28 = vld [vmem:[%s579_s0 + $0x158] sm:$0xff]  ;;  %v64_v30 = vld [vmem:[%s579_s0 + $0x140] sm:$0xff]  ;;  %v66_v33 = vld [vmem:[%s579_s0 + $0x150] sm:$0xff] }
   0x8   :  { %181 = vmatprep.subr.bf16.mxu1 %v123_v18  ;;  %v71_v29 = vld [vmem:[%s579_s0 + $0x178] sm:$0xff]  ;;  %v68_v32 = vld [vmem:[%s579_s0 + $0x160] sm:$0xff]  ;;  %v70_v34 = vld [vmem:[%s579_s0 + $0x170] sm:$0xff] }
   0x9   :  { %v119_v31 = vpack.c.bf16 %v71_v29, %v67_v28  ;;  %v116_v35 = vpack.c.bf16 %v68_v32, %v64_v30  ;;  %v57_v36 = vld [vmem:[%s579_s0 + $0x108] sm:$0xff]  ;;  %v59_v38 = vld [vmem:[%s579_s0 + $0x118] sm:$0xff]  ;;  %v118_v39 = vpack.c.bf16 %v70_v34, %v66_v33  ;;  %v56_v42 = vld [vmem:[%s579_s0 + $0x100] sm:$0xff] }
   0xa   :  { %139 = vmatpush1.bf16.msra.mxu0 %v120_v22  ;;  %v61_v37 = vld [vmem:[%s579_s0 + $0x128] sm:$0xff]  ;;  %v63_v41 = vld [vmem:[%s579_s0 + $0x138] sm:$0xff]  ;;  %v60_v43 = vld [vmem:[%s579_s0 + $0x120] sm:$0xff] }
   0xb   :  { %182 = vmatpush1.bf16.msra.mxu1 %v122_v26  ;;  %140 = vmatprep.subr.bf16.mxu0 %v117_v27  ;;  %v113_v40 = vpack.c.bf16 %v61_v37, %v57_v36  ;;  %v115_v44 = vpack.c.bf16 %v63_v41, %v59_v38  ;;  %v58_v45 = vld [vmem:[%s579_s0 + $0x110] sm:$0xff]  ;;  %v49_v47 = vld [vmem:[%s579_s0 + $0xc8] sm:$0xff]  ;;  %v51_v49 = vld [vmem:[%s579_s0 + $0xd8] sm:$0xff]  ;;  %v112_v51 = vpack.c.bf16 %v60_v43, %v56_v42 }
   0xc   :  { %183 = vmatprep.subr.bf16.mxu1 %v119_v31  ;;  %v62_v46 = vld [vmem:[%s579_s0 + $0x130] sm:$0xff]  ;;  %v53_v48 = vld [vmem:[%s579_s0 + $0xe8] sm:$0xff]  ;;  %v55_v50 = vld [vmem:[%s579_s0 + $0xf8] sm:$0xff] }
   0xd   :  { %v114_v52 = vpack.c.bf16 %v62_v46, %v58_v45  ;;  %v109_v53 = vpack.c.bf16 %v53_v48, %v49_v47  ;;  %v48_v54 = vld [vmem:[%s579_s0 + $0xc0] sm:$0xff]  ;;  %v50_v56 = vld [vmem:[%s579_s0 + $0xd0] sm:$0xff]  ;;  %v111_v57 = vpack.c.bf16 %v55_v50, %v51_v49  ;;  %v41_v59 = vld [vmem:[%s579_s0 + $0x88] sm:$0xff] }
   0xe   :  { %141 = vmatpush1.bf16.msra.mxu0 %v116_v35  ;;  %v52_v55 = vld [vmem:[%s579_s0 + $0xe0] sm:$0xff]  ;;  %v54_v58 = vld [vmem:[%s579_s0 + $0xf0] sm:$0xff]  ;;  %v45_v60 = vld [vmem:[%s579_s0 + $0xa8] sm:$0xff] }
   0xf   :  { %184 = vmatpush1.bf16.msra.mxu1 %v118_v39  ;;  %142 = vmatprep.subr.bf16.mxu0 %v113_v40  ;;  %v43_v61 = vld [vmem:[%s579_s0 + $0x98] sm:$0xff]  ;;  %v108_v63 = vpack.c.bf16 %v52_v55, %v48_v54  ;;  %v110_v0 = vpack.c.bf16 %v54_v58, %v50_v56  ;;  %v105_v1 = vpack.c.bf16 %v45_v60, %v41_v59  ;;  %v40_v2 = vld [vmem:[%s579_s0 + $0x80] sm:$0xff]  ;;  %v42_v4 = vld [vmem:[%s579_s0 + $0x90] sm:$0xff] }
  0x10   :  { %185 = vmatprep.subr.bf16.mxu1 %v115_v44  ;;  %v47_v62 = vld [vmem:[%s579_s0 + $0xb8] sm:$0xff]  ;;  %v44_v3 = vld [vmem:[%s579_s0 + $0xa0] sm:$0xff]  ;;  %v46_v6 = vld [vmem:[%s579_s0 + $0xb0] sm:$0xff] }
  0x11   :  { %v107_v5 = vpack.c.bf16 %v47_v62, %v43_v61  ;;  %v33_v7 = vld [vmem:[%s579_s0 + $0x48] sm:$0xff]  ;;  %v35_v9 = vld [vmem:[%s579_s0 + $0x58] sm:$0xff]  ;;  %v104_v11 = vpack.c.bf16 %v44_v3, %v40_v2  ;;  %v106_v12 = vpack.c.bf16 %v46_v6, %v42_v4  ;;  %v32_v14 = vld [vmem:[%s579_s0 + $0x40] sm:$0xff] }
  0x12   :  { %143 = vmatpush1.bf16.msra.mxu0 %v112_v51  ;;  %v37_v8 = vld [vmem:[%s579_s0 + $0x68] sm:$0xff]  ;;  %v39_v10 = vld [vmem:[%s579_s0 + $0x78] sm:$0xff]  ;;  %v36_v15 = vld [vmem:[%s579_s0 + $0x60] sm:$0xff] }
  0x13   :  { %186 = vmatpush1.bf16.msra.mxu1 %v114_v52  ;;  %144 = vmatprep.subr.bf16.mxu0 %v109_v53  ;;  %v101_v13 = vpack.c.bf16 %v37_v8, %v33_v7  ;;  %v34_v16 = vld [vmem:[%s579_s0 + $0x50] sm:$0xff]  ;;  %v103_v17 = vpack.c.bf16 %v39_v10, %v35_v9  ;;  %v25_v19 = vld [vmem:[%s579_s0 + $0x8] sm:$0xff]  ;;  %v27_v21 = vld [vmem:[%s579_s0 + $0x18] sm:$0xff]  ;;  %v100_v24 = vpack.c.bf16 %v36_v15, %v32_v14 }
  0x14   :  { %187 = vmatprep.subr.bf16.mxu1 %v111_v57  ;;  %v38_v18 = vld [vmem:[%s579_s0 + $0x70] sm:$0xff]  ;;  %v29_v20 = vld [vmem:[%s579_s0 + $0x28] sm:$0xff]  ;;  %v31_v22 = vld [vmem:[%s579_s0 + $0x38] sm:$0xff] }
  0x15   :  { %v24_v23 = vld [vmem:[%s579_s0] sm:$0xff]  ;;  %v19_v26 = vld [vmem:[%s580_s1 + $0x8] sm:$0xff]  ;;  %v21_v27 = vld [vmem:[%s580_s1 + $0x18] sm:$0xff]  ;;  %v102_v28 = vpack.c.bf16 %v38_v18, %v34_v16  ;;  %v97_v29 = vpack.c.bf16 %v29_v20, %v25_v19  ;;  %v99_v34 = vpack.c.bf16 %v31_v22, %v27_v21 }
  0x16   :  { %145 = vmatpush1.bf16.msra.mxu0 %v108_v63  ;;  %v28_v25 = vld [vmem:[%s579_s0 + $0x20] sm:$0xff]  ;;  %v26_v30 = vld [vmem:[%s579_s0 + $0x10] sm:$0xff]  ;;  %v23_v31 = vpack.c.bf16 %v21_v27, %v19_v26  ;;  %v89_v36 = vld [vmem:[%s579_s0 + $0x208] sm:$0xff] }
  0x17   :  { %188 = vmatpush1.bf16.msra.mxu1 %v110_v0  ;;  %146 = vmatprep.subr.bf16.mxu0 %v105_v1  ;;  %v222_v32 = vld [vmem:[%s581_s2] sm:$0xff]  ;;  %v30_v35 = vld [vmem:[%s579_s0 + $0x30] sm:$0xff]  ;;  %v93_v37 = vld [vmem:[%s579_s0 + $0x228] sm:$0xff]  ;;  %v96_v41 = vpack.c.bf16 %v28_v25, %v24_v23 }
  0x18   :  { %189 = vmatprep.subr.bf16.mxu1 %v107_v5  ;;  %v242_v33 = vld [vmem:[%s582_s3] sm:$0xff]  ;;  %226 = vperm.xlu0 %285, %v222_v32   ;;  %v91_v38 = vld [vmem:[%s579_s0 + $0x218] sm:$0xff]  ;;  %v223_v40 = vld [vmem:[%s581_s2 + $0x8] sm:$0xff]  ;;  %v98_v42 = vpack.c.bf16 %v30_v35, %v26_v30  ;;  %v129_v43 = vpack.c.bf16 %v93_v37, %v89_v36 }
  0x19   :  { %v95_v39 = vld [vmem:[%s579_s0 + $0x238] sm:$0xff]  ;;  %282 = vmatprep.mubr.msk.bf16.mxu0 %vm132_vm0, %v23_v31  ;;  %283 = vmatprep.mubr.msk.bf16.mxu1 %vm132_vm0, %v23_v31  ;;  %v88_v44 = vld [vmem:[%s579_s0 + $0x200] sm:$0xff]  ;;  %v243_v46 = vld [vmem:[%s582_s3 + $0x8] sm:$0xff] }
  0x1a   :  { %147 = vmatpush1.bf16.msra.mxu0 %v104_v11  ;;  %246 = vperm.xlu1 %286, %v242_v33   ;;  %v92_v45 = vld [vmem:[%s579_s0 + $0x220] sm:$0xff]  ;;  %v131_v47 = vpack.c.bf16 %v95_v39, %v91_v38  ;;  %v90_v48 = vld [vmem:[%s579_s0 + $0x210] sm:$0xff] }
  0x1b   :  { %190 = vmatpush1.bf16.msra.mxu1 %v106_v12  ;;  %148 = vmatprep.subr.bf16.mxu0 %v101_v13  ;;  %v94_v49 = vld [vmem:[%s579_s0 + $0x230] sm:$0xff]  ;;  %v128_v50 = vpack.c.bf16 %v92_v45, %v88_v44  ;;  %v18_v51 = vld [vmem:[%s580_s1] sm:$0xff] }
  0x1c   :  { %191 = vmatprep.subr.bf16.mxu1 %v103_v17  ;;  %231 = vperm.xlu0 %285, %v223_v40   ;;  %v20_v52 = vld [vmem:[%s580_s1 + $0x10] sm:$0xff]  ;;  %v130_v53 = vpack.c.bf16 %v94_v49, %v90_v48 }
  0x1d   :  { %v22_v54 = vpack.c.bf16 %v20_v52, %v18_v51 }
  0x1e   :  { %149 = vmatpush1.bf16.msra.mxu0 %v100_v24  ;;  %251 = vperm.xlu1 %286, %v243_v46  }
  0x1f   :  { %192 = vmatpush1.bf16.msra.mxu1 %v102_v28  ;;  %150 = vmatprep.subr.bf16.mxu0 %v97_v29 }
  0x20   :  { %193 = vmatprep.subr.bf16.mxu1 %v99_v34 }
  0x22   :  { %151 = vmatpush1.bf16.msra.mxu0 %v96_v41 }
  0x23   :  { %194 = vmatpush1.bf16.msra.mxu1 %v98_v42  ;;  %166 = vmatprep.subr.bf16.mxu0 %v129_v43 }
  0x24   :  { %209 = vmatprep.subr.bf16.mxu1 %v131_v47 }
  0x26   :  { %167 = vmatpush2.bf16.msra.mxu0 %v128_v50 }
  0x27   :  { %210 = vmatpush2.bf16.msra.mxu1 %v130_v53 }
  0x29   :  { %169 = vmatmul.mubr.bf16.vlgmr.msra.gmra.mxu0 %v22_v54 }
  0x2a   :  { %212 = vmatmul.mubr.bf16.vlgmr.msra.gmra.mxu1 %v22_v54 }
  0x93   :  { %v227_v55 = vpop.permute.xlu0 %226 }
  0x95   :  { %v247_v56 = vpop.permute.xlu1 %246 }
  0x97   :  { %v232_v2 = vpop.permute.xlu0 %231 }
  0x99   :  { %v252_v11 = vpop.permute.xlu1 %251 }
  0xe9   :  { %v170_v57 = vpop.f32.mrf.mxu0 }
  0xea   :  { %v234_v58 = vmul.f32 %v227_v55, %v170_v57  ;;  %v213_v59 = vpop.f32.mrf.mxu1 }
  0xeb   :  { %v236_v60 = vmul.f32 %v227_v55, %v213_v59  ;;  %v172_v61 = vpop.f32.mrf.mxu0 }
  0xec   :  { %v254_v62 = vadd.f32 %v247_v56, %v234_v58  ;;  %v235_v63 = vmul.f32 %v227_v55, %v172_v61  ;;  %v215_v0 = vpop.f32.mrf.mxu1 }
  0xed   :  { %v256_v1 = vadd.f32 %v247_v56, %v236_v60  ;;  %v237_v3 = vmul.f32 %v227_v55, %v215_v0  ;;  %v174_v4 = vpop.f32.mrf.mxu0 }
  0xee   :  { %v262_v5 = vmax.f32 %v254_v62, 0.0  ;;  %v255_v6 = vadd.f32 %v247_v56, %v235_v63  ;;  %v238_v7 = vmul.f32 %v232_v2, %v174_v4  ;;  %v217_v8 = vpop.f32.mrf.mxu1 }
  0xef   :  { %v264_v9 = vmax.f32 %v256_v1, 0.0  ;;  %v257_v10 = vadd.f32 %v247_v56, %v237_v3  ;;  %v240_v12 = vmul.f32 %v232_v2, %v217_v8  ;;  %v176_v13 = vpop.f32.mrf.mxu0 }
  0xf0   :  { %270 = vst [vmem:[%s583_s4] sm:$0xff] %v262_v5  ;;  %v263_v14 = vmax.f32 %v255_v6, 0.0  ;;  %v258_v15 = vadd.f32 %v252_v11, %v238_v7  ;;  %v239_v16 = vmul.f32 %v232_v2, %v176_v13  ;;  %v219_v17 = vpop.f32.mrf.mxu1 }
  0xf1   :  { %272 = vst [vmem:[%s583_s4 + $0x10] sm:$0xff] %v264_v9  ;;  %v265_v18 = vmax.f32 %v257_v10, 0.0  ;;  %v260_v19 = vadd.f32 %v252_v11, %v240_v12  ;;  %v241_v20 = vmul.f32 %v232_v2, %v219_v17 }
  0xf2   :  { %271 = vst [vmem:[%s583_s4 + $0x8] sm:$0xff] %v263_v14  ;;  %v266_v21 = vmax.f32 %v258_v15, 0.0  ;;  %v259_v22 = vadd.f32 %v252_v11, %v239_v16 }
  0xf3   :  { %273 = vst [vmem:[%s583_s4 + $0x18] sm:$0xff] %v265_v18  ;;  %v268_v23 = vmax.f32 %v260_v19, 0.0  ;;  %v261_v24 = vadd.f32 %v252_v11, %v241_v20 }
  0xf4   :  { %274 = vst [vmem:[%s583_s4 + $0x20] sm:$0xff] %v266_v21  ;;  %v267_v25 = vmax.f32 %v259_v22, 0.0 }
  0xf5   :  { %276 = vst [vmem:[%s583_s4 + $0x30] sm:$0xff] %v268_v23  ;;  %v269_v26 = vmax.f32 %v261_v24, 0.0 }
  0xf6   :  { %275 = vst [vmem:[%s583_s4 + $0x28] sm:$0xff] %v267_v25 }
  0xf7   :  { %277 = vst [vmem:[%s583_s4 + $0x38] sm:$0xff] %v269_v26 }

// kernel: model_forward.18
= control target key start
LH: loop header
LB: loop body
LE: loop exit
PB: predicated region body
PF: predicated region fallthrough
CT: control target
= control target key end

     0   :  { %v360_v3 = vmov 0   ;;  %vm141_vm0 = vcmask 130048   ;;  %s703_s0 = inlined_call_operand.vmem [shape: f32[144,512], index: 0, kind: input, shape index: {}]   ;;  %s704_s1 = inlined_call_operand.vmem [shape: f32[16,144], index: 1, kind: input, shape index: {}]   ;;  %s705_s2 = inlined_call_operand.vmem [shape: f32[16,1], index: 2, kind: input, shape index: {}]   ;;  %s706_s3 = inlined_call_operand.vmem [shape: f32[16,1], index: 3, kind: input, shape index: {}]   ;;  %s707_s5 = inlined_call_operand.vmem [shape: f32[16,1], index: 5, kind: input, shape index: {}]   ;;  %s708_s6 = inlined_call_operand.vmem [shape: f32[16,1], index: 6, kind: input, shape index: {}]   ;;  %s709_s4 = inlined_call_operand.vmem [shape: f32[16,512], index: 4, kind: input, shape index: {}]   ;;  %s710_s7 = inlined_call_operand.vmem [shape: f32[16,512], index: 7, kind: output, shape index: {}]  }
   0x1   :  { %v90_v0 = vld [vmem:[%s703_s0 + $0x1c8] sm:$0xff]  ;;  %v92_v2 = vld [vmem:[%s703_s0 + $0x1d8] sm:$0xff]  ;;  %358 = vset.pattern.permute.xlu0 %v360_v3  ;;  %359 = vset.pattern.permute.xlu1 %v360_v3  ;;  %v89_v6 = vld [vmem:[%s703_s0 + $0x1c0] sm:$0xff] }
   0x2   :  { %v94_v1 = vld [vmem:[%s703_s0 + $0x1e8] sm:$0xff]  ;;  %v96_v5 = vld [vmem:[%s703_s0 + $0x1f8] sm:$0xff]  ;;  %v93_v7 = vld [vmem:[%s703_s0 + $0x1e0] sm:$0xff] }
   0x3   :  { %v134_v4 = vpack.c.bf16 %v94_v1, %v90_v0  ;;  %v136_v8 = vpack.c.bf16 %v96_v5, %v92_v2  ;;  %v133_v9 = vpack.c.bf16 %v93_v7, %v89_v6  ;;  %v91_v10 = vld [vmem:[%s703_s0 + $0x1d0] sm:$0xff]  ;;  %v82_v12 = vld [vmem:[%s703_s0 + $0x188] sm:$0xff]  ;;  %v84_v15 = vld [vmem:[%s703_s0 + $0x198] sm:$0xff] }
   0x4   :  { %v95_v11 = vld [vmem:[%s703_s0 + $0x1f0] sm:$0xff]  ;;  %v86_v14 = vld [vmem:[%s703_s0 + $0x1a8] sm:$0xff]  ;;  %v88_v16 = vld [vmem:[%s703_s0 + $0x1b8] sm:$0xff] }
   0x5   :  { %145 = vmatprep.subr.bf16.mxu0 %v134_v4  ;;  %v135_v13 = vpack.c.bf16 %v95_v11, %v91_v10  ;;  %188 = vmatprep.subr.bf16.mxu1 %v136_v8  ;;  %v130_v17 = vpack.c.bf16 %v86_v14, %v82_v12  ;;  %v132_v18 = vpack.c.bf16 %v88_v16, %v84_v15  ;;  %v81_v19 = vld [vmem:[%s703_s0 + $0x180] sm:$0xff]  ;;  %v83_v21 = vld [vmem:[%s703_s0 + $0x190] sm:$0xff]  ;;  %v74_v24 = vld [vmem:[%s703_s0 + $0x148] sm:$0xff] }
   0x6   :  { %146 = vmatpush1.bf16.msra.mxu0 %v133_v9  ;;  %v85_v20 = vld [vmem:[%s703_s0 + $0x1a0] sm:$0xff]  ;;  %v87_v23 = vld [vmem:[%s703_s0 + $0x1b0] sm:$0xff]  ;;  %v78_v25 = vld [vmem:[%s703_s0 + $0x168] sm:$0xff] }
   0x7   :  { %189 = vmatpush1.bf16.msra.mxu1 %v135_v13  ;;  %v129_v22 = vpack.c.bf16 %v85_v20, %v81_v19  ;;  %147 = vmatprep.subr.bf16.mxu0 %v130_v17  ;;  %v131_v26 = vpack.c.bf16 %v87_v23, %v83_v21  ;;  %v126_v27 = vpack.c.bf16 %v78_v25, %v74_v24  ;;  %v76_v28 = vld [vmem:[%s703_s0 + $0x158] sm:$0xff]  ;;  %v73_v30 = vld [vmem:[%s703_s0 + $0x140] sm:$0xff]  ;;  %v75_v33 = vld [vmem:[%s703_s0 + $0x150] sm:$0xff] }
   0x8   :  { %190 = vmatprep.subr.bf16.mxu1 %v132_v18  ;;  %v80_v29 = vld [vmem:[%s703_s0 + $0x178] sm:$0xff]  ;;  %v77_v32 = vld [vmem:[%s703_s0 + $0x160] sm:$0xff]  ;;  %v79_v34 = vld [vmem:[%s703_s0 + $0x170] sm:$0xff] }
   0x9   :  { %v128_v31 = vpack.c.bf16 %v80_v29, %v76_v28  ;;  %v125_v35 = vpack.c.bf16 %v77_v32, %v73_v30  ;;  %v66_v36 = vld [vmem:[%s703_s0 + $0x108] sm:$0xff]  ;;  %v68_v38 = vld [vmem:[%s703_s0 + $0x118] sm:$0xff]  ;;  %v127_v39 = vpack.c.bf16 %v79_v34, %v75_v33  ;;  %v65_v42 = vld [vmem:[%s703_s0 + $0x100] sm:$0xff] }
   0xa   :  { %148 = vmatpush1.bf16.msra.mxu0 %v129_v22  ;;  %v70_v37 = vld [vmem:[%s703_s0 + $0x128] sm:$0xff]  ;;  %v72_v41 = vld [vmem:[%s703_s0 + $0x138] sm:$0xff]  ;;  %v69_v43 = vld [vmem:[%s703_s0 + $0x120] sm:$0xff] }
   0xb   :  { %191 = vmatpush1.bf16.msra.mxu1 %v131_v26  ;;  %149 = vmatprep.subr.bf16.mxu0 %v126_v27  ;;  %v122_v40 = vpack.c.bf16 %v70_v37, %v66_v36  ;;  %v124_v44 = vpack.c.bf16 %v72_v41, %v68_v38  ;;  %v67_v45 = vld [vmem:[%s703_s0 + $0x110] sm:$0xff]  ;;  %v58_v47 = vld [vmem:[%s703_s0 + $0xc8] sm:$0xff]  ;;  %v60_v49 = vld [vmem:[%s703_s0 + $0xd8] sm:$0xff]  ;;  %v121_v51 = vpack.c.bf16 %v69_v43, %v65_v42 }
   0xc   :  { %192 = vmatprep.subr.bf16.mxu1 %v128_v31  ;;  %v71_v46 = vld [vmem:[%s703_s0 + $0x130] sm:$0xff]  ;;  %v62_v48 = vld [vmem:[%s703_s0 + $0xe8] sm:$0xff]  ;;  %v64_v50 = vld [vmem:[%s703_s0 + $0xf8] sm:$0xff] }
   0xd   :  { %v123_v52 = vpack.c.bf16 %v71_v46, %v67_v45  ;;  %v118_v53 = vpack.c.bf16 %v62_v48, %v58_v47  ;;  %v57_v54 = vld [vmem:[%s703_s0 + $0xc0] sm:$0xff]  ;;  %v59_v56 = vld [vmem:[%s703_s0 + $0xd0] sm:$0xff]  ;;  %v120_v57 = vpack.c.bf16 %v64_v50, %v60_v49  ;;  %v50_v59 = vld [vmem:[%s703_s0 + $0x88] sm:$0xff] }
   0xe   :  { %150 = vmatpush1.bf16.msra.mxu0 %v125_v35  ;;  %v61_v55 = vld [vmem:[%s703_s0 + $0xe0] sm:$0xff]  ;;  %v63_v58 = vld [vmem:[%s703_s0 + $0xf0] sm:$0xff]  ;;  %v54_v60 = vld [vmem:[%s703_s0 + $0xa8] sm:$0xff] }
   0xf   :  { %193 = vmatpush1.bf16.msra.mxu1 %v127_v39  ;;  %151 = vmatprep.subr.bf16.mxu0 %v122_v40  ;;  %v52_v61 = vld [vmem:[%s703_s0 + $0x98] sm:$0xff]  ;;  %v117_v63 = vpack.c.bf16 %v61_v55, %v57_v54  ;;  %v119_v0 = vpack.c.bf16 %v63_v58, %v59_v56  ;;  %v114_v1 = vpack.c.bf16 %v54_v60, %v50_v59  ;;  %v49_v2 = vld [vmem:[%s703_s0 + $0x80] sm:$0xff]  ;;  %v51_v4 = vld [vmem:[%s703_s0 + $0x90] sm:$0xff] }
  0x10   :  { %194 = vmatprep.subr.bf16.mxu1 %v124_v44  ;;  %v56_v62 = vld [vmem:[%s703_s0 + $0xb8] sm:$0xff]  ;;  %v53_v3 = vld [vmem:[%s703_s0 + $0xa0] sm:$0xff]  ;;  %v55_v6 = vld [vmem:[%s703_s0 + $0xb0] sm:$0xff] }
  0x11   :  { %v116_v5 = vpack.c.bf16 %v56_v62, %v52_v61  ;;  %v42_v7 = vld [vmem:[%s703_s0 + $0x48] sm:$0xff]  ;;  %v44_v9 = vld [vmem:[%s703_s0 + $0x58] sm:$0xff]  ;;  %v113_v11 = vpack.c.bf16 %v53_v3, %v49_v2  ;;  %v115_v12 = vpack.c.bf16 %v55_v6, %v51_v4  ;;  %v41_v14 = vld [vmem:[%s703_s0 + $0x40] sm:$0xff] }
  0x12   :  { %152 = vmatpush1.bf16.msra.mxu0 %v121_v51  ;;  %v46_v8 = vld [vmem:[%s703_s0 + $0x68] sm:$0xff]  ;;  %v48_v10 = vld [vmem:[%s703_s0 + $0x78] sm:$0xff]  ;;  %v45_v15 = vld [vmem:[%s703_s0 + $0x60] sm:$0xff] }
  0x13   :  { %195 = vmatpush1.bf16.msra.mxu1 %v123_v52  ;;  %153 = vmatprep.subr.bf16.mxu0 %v118_v53  ;;  %v110_v13 = vpack.c.bf16 %v46_v8, %v42_v7  ;;  %v43_v16 = vld [vmem:[%s703_s0 + $0x50] sm:$0xff]  ;;  %v112_v17 = vpack.c.bf16 %v48_v10, %v44_v9  ;;  %v34_v19 = vld [vmem:[%s703_s0 + $0x8] sm:$0xff]  ;;  %v36_v21 = vld [vmem:[%s703_s0 + $0x18] sm:$0xff]  ;;  %v109_v24 = vpack.c.bf16 %v45_v15, %v41_v14 }
  0x14   :  { %196 = vmatprep.subr.bf16.mxu1 %v120_v57  ;;  %v47_v18 = vld [vmem:[%s703_s0 + $0x70] sm:$0xff]  ;;  %v38_v20 = vld [vmem:[%s703_s0 + $0x28] sm:$0xff]  ;;  %v40_v22 = vld [vmem:[%s703_s0 + $0x38] sm:$0xff] }
  0x15   :  { %v33_v23 = vld [vmem:[%s703_s0] sm:$0xff]  ;;  %v28_v26 = vld [vmem:[%s704_s1 + $0x8] sm:$0xff]  ;;  %v30_v27 = vld [vmem:[%s704_s1 + $0x18] sm:$0xff]  ;;  %v111_v28 = vpack.c.bf16 %v47_v18, %v43_v16  ;;  %v106_v29 = vpack.c.bf16 %v38_v20, %v34_v19  ;;  %v108_v34 = vpack.c.bf16 %v40_v22, %v36_v21 }
  0x16   :  { %154 = vmatpush1.bf16.msra.mxu0 %v117_v63  ;;  %v37_v25 = vld [vmem:[%s703_s0 + $0x20] sm:$0xff]  ;;  %v35_v30 = vld [vmem:[%s703_s0 + $0x10] sm:$0xff]  ;;  %v32_v31 = vpack.c.bf16 %v30_v27, %v28_v26  ;;  %v98_v36 = vld [vmem:[%s703_s0 + $0x208] sm:$0xff] }
  0x17   :  { %197 = vmatpush1.bf16.msra.mxu1 %v119_v0  ;;  %155 = vmatprep.subr.bf16.mxu0 %v114_v1  ;;  %v231_v32 = vld [vmem:[%s705_s2] sm:$0xff]  ;;  %v39_v35 = vld [vmem:[%s703_s0 + $0x30] sm:$0xff]  ;;  %v102_v37 = vld [vmem:[%s703_s0 + $0x228] sm:$0xff]  ;;  %v105_v41 = vpack.c.bf16 %v37_v25, %v33_v23 }
  0x18   :  { %198 = vmatprep.subr.bf16.mxu1 %v116_v5  ;;  %v251_v33 = vld [vmem:[%s706_s3] sm:$0xff]  ;;  %235 = vperm.xlu0 %358, %v231_v32   ;;  %v100_v38 = vld [vmem:[%s703_s0 + $0x218] sm:$0xff]  ;;  %v232_v40 = vld [vmem:[%s705_s2 + $0x8] sm:$0xff]  ;;  %v107_v42 = vpack.c.bf16 %v39_v35, %v35_v30  ;;  %v138_v43 = vpack.c.bf16 %v102_v37, %v98_v36 }
  0x19   :  { %v104_v39 = vld [vmem:[%s703_s0 + $0x238] sm:$0xff]  ;;  %355 = vmatprep.mubr.msk.bf16.mxu0 %vm141_vm0, %v32_v31  ;;  %356 = vmatprep.mubr.msk.bf16.mxu1 %vm141_vm0, %v32_v31  ;;  %v97_v44 = vld [vmem:[%s703_s0 + $0x200] sm:$0xff]  ;;  %v252_v46 = vld [vmem:[%s706_s3 + $0x8] sm:$0xff] }
  0x1a   :  { %156 = vmatpush1.bf16.msra.mxu0 %v113_v11  ;;  %255 = vperm.xlu1 %359, %v251_v33   ;;  %v101_v45 = vld [vmem:[%s703_s0 + $0x220] sm:$0xff]  ;;  %v140_v47 = vpack.c.bf16 %v104_v39, %v100_v38  ;;  %v99_v48 = vld [vmem:[%s703_s0 + $0x210] sm:$0xff]  ;;  %v296_v55 = vld [vmem:[%s707_s5 + $0x8] sm:$0xff] }
  0x1b   :  { %199 = vmatpush1.bf16.msra.mxu1 %v115_v12  ;;  %157 = vmatprep.subr.bf16.mxu0 %v110_v13  ;;  %v103_v49 = vld [vmem:[%s703_s0 + $0x230] sm:$0xff]  ;;  %v295_v50 = vld [vmem:[%s707_s5] sm:$0xff]  ;;  %v137_v51 = vpack.c.bf16 %v101_v45, %v97_v44  ;;  %v316_v58 = vld [vmem:[%s708_s6 + $0x8] sm:$0xff] }
  0x1c   :  { %200 = vmatprep.subr.bf16.mxu1 %v112_v17  ;;  %240 = vperm.xlu0 %358, %v232_v40   ;;  %v27_v52 = vld [vmem:[%s704_s1] sm:$0xff]  ;;  %v29_v53 = vld [vmem:[%s704_s1 + $0x10] sm:$0xff]  ;;  %v139_v54 = vpack.c.bf16 %v103_v49, %v99_v48  ;;  %v272_v11 = vld [vmem:[%s709_s4 + $0x8] sm:$0xff] }
  0x1d   :  { %v31_v56 = vpack.c.bf16 %v29_v53, %v27_v52  ;;  %v315_v57 = vld [vmem:[%s708_s6] sm:$0xff]  ;;  %v273_v6 = vld [vmem:[%s709_s4 + $0x10] sm:$0xff]  ;;  %v274_v16 = vld [vmem:[%s709_s4 + $0x18] sm:$0xff] }
  0x1e   :  { %158 = vmatpush1.bf16.msra.mxu0 %v109_v24  ;;  %260 = vperm.xlu1 %359, %v252_v46   ;;  %v271_v2 = vld [vmem:[%s709_s4] sm:$0xff]  ;;  %v277_v27 = vld [vmem:[%s709_s4 + $0x30] sm:$0xff]  ;;  %v278_v40 = vld [vmem:[%s709_s4 + $0x38] sm:$0xff] }
  0x1f   :  { %201 = vmatpush1.bf16.msra.mxu1 %v111_v28  ;;  %159 = vmatprep.subr.bf16.mxu0 %v106_v29  ;;  %v275_v21 = vld [vmem:[%s709_s4 + $0x20] sm:$0xff] }
  0x20   :  { %202 = vmatprep.subr.bf16.mxu1 %v108_v34  ;;  %299 = vperm.xlu0 %358, %v295_v50   ;;  %v276_v34 = vld [vmem:[%s709_s4 + $0x28] sm:$0xff] }
  0x22   :  { %160 = vmatpush1.bf16.msra.mxu0 %v105_v41  ;;  %304 = vperm.xlu1 %359, %v296_v55  }
  0x23   :  { %203 = vmatpush1.bf16.msra.mxu1 %v107_v42  ;;  %175 = vmatprep.subr.bf16.mxu0 %v138_v43 }
  0x24   :  { %218 = vmatprep.subr.bf16.mxu1 %v140_v47  ;;  %319 = vperm.xlu0 %358, %v315_v57  }
  0x26   :  { %176 = vmatpush2.bf16.msra.mxu0 %v137_v51  ;;  %324 = vperm.xlu1 %359, %v316_v58  }
  0x27   :  { %219 = vmatpush2.bf16.msra.mxu1 %v139_v54 }
  0x29   :  { %178 = vmatmul.mubr.bf16.vlgmr.msra.gmra.mxu0 %v31_v56 }
  0x2a   :  { %221 = vmatmul.mubr.bf16.vlgmr.msra.gmra.mxu1 %v31_v56 }
  0x93   :  { %v236_v59 = vpop.permute.xlu0 %235 }
  0x95   :  { %v256_v60 = vpop.permute.xlu1 %255 }
  0x97   :  { %v241_v61 = vpop.permute.xlu0 %240 }
  0x99   :  { %v261_v1 = vpop.permute.xlu1 %260 }
  0x9b   :  { %v300_v9 = vpop.permute.xlu0 %299 }
  0x9d   :  { %v305_v30 = vpop.permute.xlu1 %304 }
  0x9f   :  { %v320_v41 = vpop.permute.xlu0 %319 }
  0xe9   :  { %v179_v62 = vpop.f32.mrf.mxu0 }
  0xea   :  { %v243_v63 = vmul.f32 %v236_v59, %v179_v62  ;;  %v222_v0 = vpop.f32.mrf.mxu1 }
  0xeb   :  { %v245_v3 = vmul.f32 %v236_v59, %v222_v0  ;;  %v181_v4 = vpop.f32.mrf.mxu0 }
  0xec   :  { %v263_v5 = vadd.f32 %v256_v60, %v243_v63  ;;  %v244_v7 = vmul.f32 %v236_v59, %v181_v4  ;;  %v224_v8 = vpop.f32.mrf.mxu1 }
  0xed   :  { %v265_v10 = vadd.f32 %v256_v60, %v245_v3  ;;  %v246_v12 = vmul.f32 %v236_v59, %v224_v8  ;;  %v183_v13 = vpop.f32.mrf.mxu0 }
  0xee   :  { %v279_v14 = vadd.f32 %v271_v2, %v263_v5  ;;  %v264_v15 = vadd.f32 %v256_v60, %v244_v7  ;;  %v247_v17 = vmul.f32 %v241_v61, %v183_v13  ;;  %v226_v18 = vpop.f32.mrf.mxu1 }
  0xef   :  { %v281_v19 = vadd.f32 %v273_v6, %v265_v10  ;;  %v266_v20 = vadd.f32 %v256_v60, %v246_v12  ;;  %v249_v22 = vmul.f32 %v241_v61, %v226_v18  ;;  %v185_v23 = vpop.f32.mrf.mxu0  ;;  %v325_v60 = vpop.permute.xlu1 %324 }
  0xf0   :  { %v287_v24 = vmax.f32 %v279_v14, 0.0  ;;  %v280_v25 = vadd.f32 %v272_v11, %v264_v15  ;;  %v267_v26 = vadd.f32 %v261_v1, %v247_v17  ;;  %v248_v28 = vmul.f32 %v241_v61, %v185_v23  ;;  %v228_v29 = vpop.f32.mrf.mxu1 }
  0xf1   :  { %v289_v31 = vmax.f32 %v281_v19, 0.0  ;;  %v282_v32 = vadd.f32 %v274_v16, %v266_v20  ;;  %v269_v33 = vadd.f32 %v261_v1, %v249_v22  ;;  %v250_v35 = vmul.f32 %v241_v61, %v228_v29 }
  0xf2   :  { %v307_v36 = vmul.f32 %v300_v9, %v287_v24  ;;  %v288_v37 = vmax.f32 %v280_v25, 0.0  ;;  %v283_v38 = vadd.f32 %v275_v21, %v267_v26  ;;  %v268_v39 = vadd.f32 %v261_v1, %v248_v28 }
  0xf3   :  { %v309_v42 = vmul.f32 %v300_v9, %v289_v31  ;;  %v290_v43 = vmax.f32 %v282_v32, 0.0  ;;  %v285_v44 = vadd.f32 %v277_v27, %v269_v33  ;;  %v270_v45 = vadd.f32 %v261_v1, %v250_v35 }
  0xf4   :  { %v327_v46 = vadd.f32 %v320_v41, %v307_v36  ;;  %v308_v47 = vmul.f32 %v300_v9, %v288_v37  ;;  %v291_v48 = vmax.f32 %v283_v38, 0.0  ;;  %v284_v49 = vadd.f32 %v276_v34, %v268_v39 }
  0xf5   :  { %v329_v50 = vadd.f32 %v320_v41, %v309_v42  ;;  %v310_v51 = vmul.f32 %v300_v9, %v290_v43  ;;  %v293_v52 = vmax.f32 %v285_v44, 0.0  ;;  %v286_v53 = vadd.f32 %v278_v40, %v270_v45 }
  0xf6   :  { %v335_v54 = vmax.f32 %v327_v46, 0.0  ;;  %v328_v55 = vadd.f32 %v320_v41, %v308_v47  ;;  %v311_v56 = vmul.f32 %v305_v30, %v291_v48  ;;  %v292_v57 = vmax.f32 %v284_v49, 0.0 }
  0xf7   :  { %v337_v58 = vmax.f32 %v329_v50, 0.0  ;;  %v330_v59 = vadd.f32 %v320_v41, %v310_v51  ;;  %v313_v61 = vmul.f32 %v305_v30, %v293_v52  ;;  %v294_v62 = vmax.f32 %v286_v53, 0.0 }
  0xf8   :  { %343 = vst [vmem:[%s710_s7] sm:$0xff] %v335_v54  ;;  %v336_v63 = vmax.f32 %v328_v55, 0.0  ;;  %v331_v0 = vadd.f32 %v325_v60, %v311_v56  ;;  %v312_v1 = vmul.f32 %v305_v30, %v292_v57 }
  0xf9   :  { %345 = vst [vmem:[%s710_s7 + $0x10] sm:$0xff] %v337_v58  ;;  %v338_v2 = vmax.f32 %v330_v59, 0.0  ;;  %v333_v3 = vadd.f32 %v325_v60, %v313_v61  ;;  %v314_v4 = vmul.f32 %v305_v30, %v294_v62 }
  0xfa   :  { %344 = vst [vmem:[%s710_s7 + $0x8] sm:$0xff] %v336_v63  ;;  %v339_v5 = vmax.f32 %v331_v0, 0.0  ;;  %v332_v6 = vadd.f32 %v325_v60, %v312_v1 }
  0xfb   :  { %346 = vst [vmem:[%s710_s7 + $0x18] sm:$0xff] %v338_v2  ;;  %v341_v7 = vmax.f32 %v333_v3, 0.0  ;;  %v334_v8 = vadd.f32 %v325_v60, %v314_v4 }
  0xfc   :  { %347 = vst [vmem:[%s710_s7 + $0x20] sm:$0xff] %v339_v5  ;;  %v340_v9 = vmax.f32 %v332_v6, 0.0 }
  0xfd   :  { %349 = vst [vmem:[%s710_s7 + $0x30] sm:$0xff] %v341_v7  ;;  %v342_v10 = vmax.f32 %v334_v8, 0.0 }
  0xfe   :  { %348 = vst [vmem:[%s710_s7 + $0x28] sm:$0xff] %v340_v9 }
  0xff   :  { %350 = vst [vmem:[%s710_s7 + $0x38] sm:$0xff] %v342_v10 }

// kernel: model_forward.19
= control target key start
LH: loop header
LB: loop body
LE: loop exit
PB: predicated region body
PF: predicated region fallthrough
CT: control target
= control target key end

     0   :  { %v171_v0 = vmov 0   ;;  %vm57_vm0 = vcmask 130048   ;;  %vm160_vm1 = vcmask 736256   ;;  %s314_s0 = inlined_call_operand.vmem [shape: f32[144,90], index: 0, kind: input, shape index: {}]   ;;  %s315_s1 = inlined_call_operand.vmem [shape: f32[16,144], index: 1, kind: input, shape index: {}]   ;;  %s316_s3 = inlined_call_operand.vmem [shape: f32[16,1], index: 3, kind: input, shape index: {}]   ;;  %s317_s2 = inlined_call_operand.vmem [shape: f32[16,1], index: 2, kind: input, shape index: {}]   ;;  %s318_s4 = inlined_call_operand.vmem [shape: f32[16,1], index: 4, kind: input, shape index: {}]   ;;  %s319_s5 = inlined_call_operand.vmem [shape: f32[16,1], index: 5, kind: input, shape index: {}]   ;;  %s320_s6 = inlined_call_operand.vmem [shape: f32[16,90], index: 6, kind: output, shape index: {}]  }
   0x1   :  { %61 = vmatprep.subr.bf16.mxu0 %v171_v0  ;;  %v44_v1 = vld [vmem:[%s314_s0 + $0x70] sm:$0xff]  ;;  %v45_v2 = vld [vmem:[%s314_s0 + $0x78] sm:$0xff]  ;;  %v42_v3 = vld [vmem:[%s314_s0 + $0x60] sm:$0xff]  ;;  %170 = vset.pattern.permute.xlu1 %v171_v0 }
   0x2   :  { %v55_v4 = vpack.c.bf16 %v45_v2, %v44_v1  ;;  %v43_v5 = vld [vmem:[%s314_s0 + $0x68] sm:$0xff]  ;;  %169 = vset.pattern.permute.xlu0 %v171_v0  ;;  %v40_v7 = vld [vmem:[%s314_s0 + $0x50] sm:$0xff]  ;;  %v41_v8 = vld [vmem:[%s314_s0 + $0x58] sm:$0xff] }
   0x3   :  { %v54_v6 = vpack.c.bf16 %v43_v5, %v42_v3  ;;  %v25_v9 = vld [vmem:[%s315_s1 + $0x8] sm:$0xff]  ;;  %v27_v10 = vld [vmem:[%s315_s1 + $0x18] sm:$0xff]  ;;  %v53_v11 = vpack.c.bf16 %v41_v8, %v40_v7  ;;  %v116_v13 = vld [vmem:[%s316_s3] sm:$0xff] }
   0x4   :  { %62 = vmatpush1.bf16.msra.mxu0 %v55_v4  ;;  %v29_v12 = vpack.c.bf16 %v27_v10, %v25_v9  ;;  %v102_v14 = vld [vmem:[%s317_s2] sm:$0xff]  ;;  %v39_v16 = vld [vmem:[%s314_s0 + $0x48] sm:$0xff]  ;;  %120 = vperm.xlu1 %170, %v116_v13   ;;  %v36_v20 = vld [vmem:[%s314_s0 + $0x30] sm:$0xff] }
   0x5   :  { %63 = vmatprep.subr.bf16.mxu0 %v171_v0  ;;  %v38_v15 = vld [vmem:[%s314_s0 + $0x40] sm:$0xff]  ;;  %106 = vperm.xlu0 %169, %v102_v14   ;;  %v117_v17 = vld [vmem:[%s316_s3 + $0x8] sm:$0xff]  ;;  %v37_v21 = vld [vmem:[%s314_s0 + $0x38] sm:$0xff] }
   0x6   :  { %167 = vmatprep.mubr.msk.bf16.mxu0 %vm57_vm0, %v29_v12  ;;  %v103_v18 = vld [vmem:[%s317_s2 + $0x8] sm:$0xff]  ;;  %v52_v19 = vpack.c.bf16 %v39_v16, %v38_v15  ;;  %v130_v23 = vld [vmem:[%s318_s4] sm:$0xff]  ;;  %v51_v24 = vpack.c.bf16 %v37_v21, %v36_v20  ;;  %v32_v30 = vld [vmem:[%s314_s0 + $0x10] sm:$0xff] }
   0x7   :  { %v131_v22 = vld [vmem:[%s318_s4 + $0x8] sm:$0xff]  ;;  %v34_v25 = vld [vmem:[%s314_s0 + $0x20] sm:$0xff]  ;;  %v33_v31 = vld [vmem:[%s314_s0 + $0x18] sm:$0xff] }
   0x8   :  { %64 = vmatpush1.bf16.msra.mxu0 %v54_v6  ;;  %125 = vperm.xlu1 %170, %v117_v17   ;;  %v35_v26 = vld [vmem:[%s314_s0 + $0x28] sm:$0xff]  ;;  %v144_v28 = vld [vmem:[%s319_s5] sm:$0xff]  ;;  %v49_v32 = vpack.c.bf16 %v33_v31, %v32_v30  ;;  %v26_v40 = vld [vmem:[%s315_s1 + $0x10] sm:$0xff] }
   0x9   :  { %65 = vmatprep.subr.bf16.mxu0 %v171_v0  ;;  %111 = vperm.xlu0 %169, %v103_v18   ;;  %v145_v27 = vld [vmem:[%s319_s5 + $0x8] sm:$0xff]  ;;  %v50_v29 = vpack.c.bf16 %v35_v26, %v34_v25  ;;  %v30_v33 = vld [vmem:[%s314_s0] sm:$0xff] }
   0xa   :  { %v31_v34 = vld [vmem:[%s314_s0 + $0x8] sm:$0xff]  ;;  %v46_v36 = vld [vmem:[%s314_s0 + $0x80] sm:$0xff] }
   0xb   :  { %v48_v35 = vpack.c.bf16 %v31_v34, %v30_v33  ;;  %v47_v37 = vld [vmem:[%s314_s0 + $0x88] sm:$0xff]  ;;  %v24_v39 = vld [vmem:[%s315_s1] sm:$0xff] }
   0xc   :  { %66 = vmatpush1.bf16.msra.mxu0 %v53_v11  ;;  %139 = vperm.xlu1 %170, %v131_v22   ;;  %v56_v38 = vpack.c.bf16 %v47_v37, %v46_v36  ;;  %v28_v41 = vpack.c.bf16 %v26_v40, %v24_v39 }
   0xd   :  { %67 = vmatprep.subr.bf16.mxu0 %v171_v0  ;;  %134 = vperm.xlu0 %169, %v130_v23  }
  0x10   :  { %68 = vmatpush1.bf16.msra.mxu0 %v52_v19  ;;  %153 = vperm.xlu1 %170, %v145_v27  }
  0x11   :  { %69 = vmatprep.subr.bf16.mxu0 %v171_v0  ;;  %148 = vperm.xlu0 %169, %v144_v28  }
  0x14   :  { %70 = vmatpush1.bf16.msra.mxu0 %v51_v24 }
  0x15   :  { %71 = vmatprep.subr.bf16.mxu0 %v171_v0 }
  0x18   :  { %72 = vmatpush1.bf16.msra.mxu0 %v50_v29 }
  0x19   :  { %73 = vmatprep.subr.bf16.mxu0 %v171_v0 }
  0x1c   :  { %74 = vmatpush1.bf16.msra.mxu0 %v49_v32 }
  0x1d   :  { %75 = vmatprep.subr.bf16.mxu0 %v171_v0 }
  0x20   :  { %76 = vmatpush1.bf16.msra.mxu0 %v48_v35 }
  0x21   :  { %91 = vmatprep.subr.bf16.mxu0 %v171_v0 }
  0x24   :  { %92 = vmatpush2.bf16.msra.mxu0 %v56_v38 }
  0x27   :  { %94 = vmatmul.mubr.bf16.vlgmr.msra.gmra.mxu0 %v28_v41 }
  0x7f   :  { %v121_v43 = vpop.permute.xlu1 %120 }
  0x80   :  { %v107_v42 = vpop.permute.xlu0 %106 }
  0x83   :  { %v126_v45 = vpop.permute.xlu1 %125 }
  0x84   :  { %v112_v44 = vpop.permute.xlu0 %111 }
  0x87   :  { %v140_v51 = vpop.permute.xlu1 %139 }
  0x88   :  { %v135_v46 = vpop.permute.xlu0 %134 }
  0x8b   :  { %v154_v61 = vpop.permute.xlu1 %153 }
  0x8c   :  { %v149_v55 = vpop.permute.xlu0 %148 }
  0xe7   :  { %v95_v47 = vpop.f32.mrf.mxu0 }
  0xe8   :  { %v114_v48 = vmul.f32 %v107_v42, %v95_v47 }
  0xe9   :  { %v97_v49 = vpop.f32.mrf.mxu0 }
  0xea   :  { %v128_v50 = vadd.f32 %v121_v43, %v114_v48 }
  0xeb   :  { %v98_v52 = vpop.f32.mrf.mxu0 }
  0xec   :  { %v142_v53 = vmul.f32 %v135_v46, %v128_v50  ;;  %v115_v54 = vmul.f32 %v112_v44, %v98_v52 }
  0xed   :  { %v100_v56 = vpop.f32.mrf.mxu0 }
  0xee   :  { %v156_v57 = vadd.f32 %v149_v55, %v142_v53  ;;  %v129_v58 = vadd.f32 %v126_v45, %v115_v54 }
  0xf0   :  { %v158_v59 = vmax.f32 %v156_v57, 0.0  ;;  %v143_v60 = vmul.f32 %v140_v51, %v129_v58 }
  0xf2   :  { %161 = vst.msk [vmem:[%s320_s6] sm:$0xff] %vm160_vm1, %v158_v59  ;;  %v157_v62 = vadd.f32 %v154_v61, %v143_v60 }
  0xf4   :  { %v159_v63 = vmax.f32 %v157_v62, 0.0 }
  0xf6   :  { %162 = vst.msk [vmem:[%s320_s6 + $0x8] sm:$0xff] %vm160_vm1, %v159_v63 }

// kernel: model_forward.20
= control target key start
LH: loop header
LB: loop body
LE: loop exit
PB: predicated region body
PF: predicated region fallthrough
CT: control target
= control target key end

     0   :  { %v116_v0 = vmov 0   ;;  %vm49_vm0 = vcmask 130048   ;;  %vm107_vm1 = vcmask 211968   ;;  %s211_s0 = inlined_call_operand.vmem [shape: f32[144,26], index: 0, kind: input, shape index: {}]   ;;  %s212_s1 = inlined_call_operand.vmem [shape: f32[8,144], index: 1, kind: input, shape index: {}]   ;;  %s213_s2 = inlined_call_operand.vmem [shape: f32[8,1], index: 2, kind: input, shape index: {}]   ;;  %s214_s3 = inlined_call_operand.vmem [shape: f32[8,1], index: 3, kind: input, shape index: {}]   ;;  %s215_s4 = inlined_call_operand.vmem [shape: f32[8,26], index: 4, kind: output, shape index: {}]  }
   0x1   :  { %53 = vmatprep.subr.bf16.mxu0 %v116_v0  ;;  %v36_v1 = vld [vmem:[%s211_s0 + $0x70] sm:$0xff]  ;;  %v37_v2 = vld [vmem:[%s211_s0 + $0x78] sm:$0xff]  ;;  %v34_v3 = vld [vmem:[%s211_s0 + $0x60] sm:$0xff]  ;;  %115 = vset.pattern.permute.xlu0 %v116_v0 }
   0x2   :  { %v47_v4 = vpack.c.bf16 %v37_v2, %v36_v1  ;;  %v35_v5 = vld [vmem:[%s211_s0 + $0x68] sm:$0xff]  ;;  %v32_v7 = vld [vmem:[%s211_s0 + $0x50] sm:$0xff]  ;;  %v33_v8 = vld [vmem:[%s211_s0 + $0x58] sm:$0xff] }
   0x3   :  { %v46_v6 = vpack.c.bf16 %v35_v5, %v34_v3  ;;  %v19_v9 = vld [vmem:[%s212_s1 + $0x8] sm:$0xff]  ;;  %v93_v10 = vld [vmem:[%s213_s2] sm:$0xff]  ;;  %v45_v11 = vpack.c.bf16 %v33_v8, %v32_v7  ;;  %v28_v17 = vld [vmem:[%s211_s0 + $0x30] sm:$0xff] }
   0x4   :  { %54 = vmatpush1.bf16.msra.mxu0 %v47_v4  ;;  %v21_v12 = vpack.c.bf16 %v19_v9, %v19_v9  ;;  %96 = vperm.xlu0 %115, %v93_v10   ;;  %v30_v13 = vld [vmem:[%s211_s0 + $0x40] sm:$0xff]  ;;  %v31_v14 = vld [vmem:[%s211_s0 + $0x48] sm:$0xff]  ;;  %v29_v18 = vld [vmem:[%s211_s0 + $0x38] sm:$0xff] }
   0x5   :  { %55 = vmatprep.subr.bf16.mxu0 %v116_v0  ;;  %v100_v15 = vld [vmem:[%s214_s3] sm:$0xff]  ;;  %v44_v16 = vpack.c.bf16 %v31_v14, %v30_v13  ;;  %v43_v19 = vpack.c.bf16 %v29_v18, %v28_v17  ;;  %v27_v21 = vld [vmem:[%s211_s0 + $0x28] sm:$0xff]  ;;  %v24_v23 = vld [vmem:[%s211_s0 + $0x10] sm:$0xff] }
   0x6   :  { %113 = vmatprep.mubr.msk.bf16.mxu0 %vm49_vm0, %v21_v12  ;;  %v26_v20 = vld [vmem:[%s211_s0 + $0x20] sm:$0xff]  ;;  %v25_v24 = vld [vmem:[%s211_s0 + $0x18] sm:$0xff]  ;;  %v23_v27 = vld [vmem:[%s211_s0 + $0x8] sm:$0xff] }
   0x7   :  { %v42_v22 = vpack.c.bf16 %v27_v21, %v26_v20  ;;  %v41_v25 = vpack.c.bf16 %v25_v24, %v24_v23  ;;  %v22_v26 = vld [vmem:[%s211_s0] sm:$0xff]  ;;  %v39_v30 = vld [vmem:[%s211_s0 + $0x88] sm:$0xff] }
   0x8   :  { %56 = vmatpush1.bf16.msra.mxu0 %v46_v6  ;;  %103 = vperm.xlu0 %115, %v100_v15   ;;  %v40_v28 = vpack.c.bf16 %v23_v27, %v22_v26  ;;  %v38_v29 = vld [vmem:[%s211_s0 + $0x80] sm:$0xff] }
   0x9   :  { %57 = vmatprep.subr.bf16.mxu0 %v116_v0  ;;  %v48_v31 = vpack.c.bf16 %v39_v30, %v38_v29  ;;  %v18_v32 = vld [vmem:[%s212_s1] sm:$0xff] }
   0xa   :  { %v20_v33 = vpack.c.bf16 %v18_v32, %v18_v32 }
   0xc   :  { %58 = vmatpush1.bf16.msra.mxu0 %v45_v11 }
   0xd   :  { %59 = vmatprep.subr.bf16.mxu0 %v116_v0 }
  0x10   :  { %60 = vmatpush1.bf16.msra.mxu0 %v44_v16 }
  0x11   :  { %61 = vmatprep.subr.bf16.mxu0 %v116_v0 }
  0x14   :  { %62 = vmatpush1.bf16.msra.mxu0 %v43_v19 }
  0x15   :  { %63 = vmatprep.subr.bf16.mxu0 %v116_v0 }
  0x18   :  { %64 = vmatpush1.bf16.msra.mxu0 %v42_v22 }
  0x19   :  { %65 = vmatprep.subr.bf16.mxu0 %v116_v0 }
  0x1c   :  { %66 = vmatpush1.bf16.msra.mxu0 %v41_v25 }
  0x1d   :  { %67 = vmatprep.subr.bf16.mxu0 %v116_v0 }
  0x20   :  { %68 = vmatpush1.bf16.msra.mxu0 %v40_v28 }
  0x21   :  { %83 = vmatprep.subr.bf16.mxu0 %v116_v0 }
  0x24   :  { %84 = vmatpush2.bf16.msra.mxu0 %v48_v31 }
  0x27   :  { %86 = vmatmul.mubr.bf16.vlgmr.msra.gmra.mxu0 %v20_v33 }
  0x7f   :  { %v97_v34 = vpop.permute.xlu0 %96 }
  0x83   :  { %v104_v37 = vpop.permute.xlu0 %103 }
  0xe7   :  { %v87_v35 = vpop.f32.mrf.mxu0 }
  0xe8   :  { %v99_v36 = vmul.f32 %v97_v34, %v87_v35 }
  0xe9   :  { %v89_v38 = vpop.f32.mrf.mxu0 }
  0xea   :  { %v106_v39 = vadd.f32 %v104_v37, %v99_v36 }
  0xeb   :  { %v90_v40 = vpop.f32.mrf.mxu0 }
  0xec   :  { %108 = vst.msk [vmem:[%s215_s4] sm:$0xff] %vm107_vm1, %v106_v39 }
  0xed   :  { %v91_v41 = vpop.f32.mrf.mxu0 }

// kernel: model_forward.21
= control target key start
LH: loop header
LB: loop body
LE: loop exit
PB: predicated region body
PF: predicated region fallthrough
CT: control target
= control target key end

     0   :  { %v306_v1 = vmov 0.0   ;;  %vm307_vm0 = vmmov 0   ;;  %s402_s0 = inlined_call_operand.vmem [shape: f32[2,104], index: 0, kind: input, shape index: {}]   ;;  %s403_s1 = inlined_call_operand.vmem [shape: f32[104,32], index: 1, kind: input, shape index: {}]   ;;  %s404_s2 = inlined_call_operand.vmem [shape: f32[1,32], index: 2, kind: input, shape index: {}]   ;;  %s405_s3 = inlined_call_operand.vmem [shape: f32[32,5], index: 3, kind: input, shape index: {}]   ;;  %s406_s4 = inlined_call_operand.vmem [shape: f32[1,5], index: 4, kind: input, shape index: {}]   ;;  %s407_s5 = inlined_call_operand.hbm [shape: f32[2,5], index: 5, kind: output, shape index: {}]  }
   0x1   :  { %v34_v0 = vld [vmem:[%s403_s1 + $0x60] sm:$0xff]  ;;  %241 = vmatprep.subr.mxu0 %v306_v1  ;;  %v33_v2 = vld [vmem:[%s403_s1 + $0x58] sm:$0xff]  ;;  %267 = vmatprep.mubr.msk.f32.mxu0 %vm307_vm0, %v306_v1  ;;  %v32_v3 = vld [vmem:[%s403_s1 + $0x50] sm:$0xff] }
   0x2   :  { %242 = vmatpush3.msra.mxu0 %v34_v0  ;;  %270 = vmatprep.subr.mxu1 %v306_v1  ;;  %v120_v4 = vld [vmem:[%s405_s3 + $0x18] sm:$0xff]  ;;  %v31_v5 = vld [vmem:[%s403_s1 + $0x48] sm:$0xff] }
   0x3   :  { %243 = vmatprep.subr.mxu0 %v306_v1  ;;  %278 = vmatprep.mubr.msk.f32.mxu1 %vm307_vm0, %v306_v1 }
   0x4   :  { %244 = vmatpush3.msra.mxu0 %v33_v2  ;;  %271 = vmatpush3.msra.mxu1 %v120_v4 }
   0x5   :  { %245 = vmatprep.subr.mxu0 %v306_v1 }
   0x6   :  { %10 = vsyncpa [#allocation3], 0  ;;  %246 = vmatpush3.msra.mxu0 %v32_v3  ;;  %272 = vmatprep.subr.mxu1 %v306_v1  ;;  %v30_v6 = vld [vmem:[%s403_s1 + $0x40] sm:$0xff]  ;;  %v29_v7 = vld [vmem:[%s403_s1 + $0x38] sm:$0xff]  ;;  %vm42_vm1 = vcmask 850944   ;;  %vm128_vm2 = vcmask 261120  }
   0x7   :  { %247 = vmatprep.subr.mxu0 %v306_v1  ;;  %v28_v8 = vld [vmem:[%s403_s1 + $0x30] sm:$0xff]  ;;  %v27_v9 = vld [vmem:[%s403_s1 + $0x28] sm:$0xff]  ;;  %v26_v10 = vld [vmem:[%s403_s1 + $0x20] sm:$0xff]  ;;  %s308_s6 = smov [#allocation2]   ;;  %vm202_vm3 = vcmask 33792  }
   0x8   :  { %248 = vmatpush3.msra.mxu0 %v31_v5  ;;  %v25_v11 = vld [vmem:[%s403_s1 + $0x18] sm:$0xff]  ;;  %v24_v12 = vld [vmem:[%s403_s1 + $0x10] sm:$0xff]  ;;  %v23_v13 = vld [vmem:[%s403_s1 + $0x8] sm:$0xff]  ;;  %s210_s7 = sshll.u32 %s308_s6, 4  ;;  %s211_s7 = int_to_ptr.vmem [resolvable:$true] %s210_s7 }
   0x9   :  { %249 = vmatprep.subr.mxu0 %v306_v1  ;;  %v22_v14 = vld [vmem:[%s403_s1] sm:$0xff]  ;;  %v119_v16 = vld [vmem:[%s405_s3 + $0x10] sm:$0xff]  ;;  %v118_v17 = vld [vmem:[%s405_s3 + $0x8] sm:$0xff]  ;;  %p289_p1 = scmp.lt.s32.totalorder %s211_s7, %s211_s7 }
   0xa   :  { %250 = vmatpush3.msra.mxu0 %v30_v6  ;;  %v21_v15 = vld [vmem:[%s402_s0] sm:$0x3]  ;;  %273 = vmatpush3.msra.mxu1 %v119_v16 }
   0xb   :  { %251 = vmatprep.subr.mxu0 %v306_v1  ;;  %274 = vmatprep.subr.mxu1 %v306_v1  ;;  %v117_v18 = vld [vmem:[%s405_s3] sm:$0xff]  ;;  %s284_s3 = scalar_lea.vmem %s211_s7, 32 }
   0xc   :  { %252 = vmatpush3.msra.mxu0 %v29_v7  ;;  %275 = vmatpush3.msra.mxu1 %v118_v17  ;;  %v218_v19 = vld [vmem:[%s404_s2] ss:$0 sm:$0xff]  ;;  %p285_p0 = scmp.ne.s32.totalorder %s211_s7, %s284_s3  ;;  %p290_p2 = scmp.lt.s32.totalorder %s284_s3, %s284_s3 }
   0xd   :  { %253 = vmatprep.subr.mxu0 %v306_v1  ;;  %276 = vmatprep.subr.mxu1 %v306_v1  ;;  %v220_v24 = vld [vmem:[%s406_s4] ss:$0 sm:$0xff] }
   0xe   :  { %254 = vmatpush3.msra.mxu0 %v28_v8  ;;  %277 = vmatpush3.msra.mxu1 %v117_v18  ;;  %p291_p3 = por %p290_p2, %p289_p1 }
   0xf   :  { %255 = vmatprep.subr.mxu0 %v306_v1 }
  0x10   :  { %256 = vmatpush3.msra.mxu0 %v27_v9  ;;  %p292_p4 = pnand %p291_p3, %p285_p0 }
  0x11   :  { %257 = vmatprep.subr.mxu0 %v306_v1 }
  0x12   :  { %258 = vmatpush3.msra.mxu0 %v26_v10 }
  0x13   :  { %259 = vmatprep.subr.mxu0 %v306_v1 }
  0x14   :  { %260 = vmatpush3.msra.mxu0 %v25_v11 }
  0x15   :  { %261 = vmatprep.subr.mxu0 %v306_v1 }
  0x16   :  { %262 = vmatpush3.msra.mxu0 %v24_v12 }
  0x17   :  { %263 = vmatprep.subr.mxu0 %v306_v1 }
  0x18   :  { %264 = vmatpush3.msra.mxu0 %v23_v13 }
  0x19   :  { %265 = vmatprep.subr.mxu0 %v306_v1 }
  0x1a   :  { %266 = vmatpush3.msra.mxu0 %v22_v14 }
  0x1b   :  { %268 = vmatmul.mubr.msk.f32.vlgmr.msra.gmra.mxu0 %vm42_vm1, %v21_v15 }
  0xdb   :  { %v112_v20 = vpop.f32.mrf.mxu0 }
  0xdc   :  { %v113_v21 = vadd.f32 %v218_v19, %v112_v20 }
  0xdd   :  { %v269_v22 = vpop.f32.mrf.mxu0 }
  0xde   :  { %v116_v23 = vmax.f32 %v113_v21, 0.0 }
  0xe0   :  { %279 = vmatmul.mubr.msk.f32.vlgmr.msra.gmra.mxu1 %vm128_vm2, %v116_v23 }
 0x1a0   :  { %v198_v25 = vpop.f32.mrf.mxu1 }
 0x1a1   :  { %v199_v26 = vadd.f32 %v220_v24, %v198_v25 }
 0x1a2   :  { %v280_v27 = vpop.f32.mrf.mxu1 }
 0x1a3   :  { %203 = vst.msk [vmem:[#allocation2] sm:$0x3] %vm202_vm3, %v199_v26 }
 0x1a4   :  { %295 = shalt.err (!%p292_p4)
}
 0x1a5   :  { %213 = dma.vmem_to_hbm [thread:$0]  %s211_s7, 32, %s407_s5, [#allocation3]  }
 0x1a6   :  { %304 = dma.done.wait [#allocation3], 32  }
 0x1a7   :  { %305 = vsyncadd [#allocation3], 4294967264 }
 0x1a8   :  { %217 = vsyncpa [#allocation3], 1 }

</bundles_post_ra>
